<compile_context>
chip_gen: v7x
topology: tpu7x:2x2x1
jax: 0.10.0
libtpu: 0.0.40
codegen_flags: <defaults>
</compile_context>

<pallas_src>
import math
import functools

import jax
import jax.numpy as jnp
from jax.experimental import pallas as pl
from jax.experimental.pallas import tpu as pltpu

# Matmul operands are cast to bf16; accumulation, softmax and LayerNorm in f32.
_COMPUTE_DTYPE = jnp.bfloat16

# Row indices inside the packed (16, Do) bias / LayerNorm-parameter slab.
_SBQ, _SBK, _SBV, _SBO, _SG, _SB = 0, 1, 2, 3, 4, 5
_EBQ, _EBK, _EBV, _EBO, _EG, _EB = 6, 7, 8, 9, 10, 11
_FB2, _FG, _FB = 12, 13, 14
_VEC_ROWS = 16

_WEIGHT_ORDER = ["sWq", "sWk", "sWv", "sWo", "eWq", "eWk", "eWv", "eWo", "fW1", "fW2"]
_VEC_ORDER = ["sbq", "sbk", "sbv", "sbo", "sg", "sb",
              "ebq", "ebk", "ebv", "ebo", "eg", "eb",
              "fb2", "fg", "fb"]


# ----------------------------- kernel helpers ------------------------------

def _head_major3(t):   # (M, H, d) -> (H, M, d); lane (d) axis untouched
    if hasattr(pltpu, "einshape"):
        return pltpu.einshape("mhd->hmd", t)
    return jnp.transpose(t, (1, 0, 2))


def _layer_norm(x, gamma, beta, eps=1e-6):
    mu = jnp.mean(x, axis=-1, keepdims=True)
    xc = x - mu
    var = jnp.mean(xc * xc, axis=-1, keepdims=True)
    return xc * jax.lax.rsqrt(var + eps) * gamma + beta


def _linear(x, w, b):
    # bf16 operands, f32 accumulation on the MXU.
    return jnp.dot(x.astype(w.dtype), w, preferred_element_type=jnp.float32) + b


def _mha(q_in, k_in, v_in, bb, q_len, k_len,
         Wq, bq, Wk, bk, Wv, bv, Wo_r, bo, num_heads, bias=None):
    """Multi-headed attention on row-flattened (bb*len, feature) tiles.

    q_in: (bb*q_len, Dq_in), k_in/v_in: (bb*k_len, Dm).
    Wo_r is the output projection reshaped to (H, dph, Do) so the context can
    be contracted per head WITHOUT the head-minor relayout.
    Returns (bb*q_len, Do) f32.
    """
    H = num_heads
    model_dim = Wq.shape[1]
    dph = model_dim // H

    q = _linear(q_in, Wq, bq) * (1.0 / math.sqrt(dph))     # (bb*Q, Dm) f32
    k = _linear(k_in, Wk, bk)                              # (bb*K, Dm) f32
    v = _linear(v_in, Wv, bv)                              # (bb*K, Dm) f32

    def to_heads(t, length):
        # (bb*L, H*dph) -> h-major (H*bb, L, dph). The only data-moving step is
        # the 3-D (M, H, d) -> (H, M, d) swap; the rest are major-dim reshapes.
        t = _head_major3(t.reshape(bb * length, H, dph))
        return t.reshape(H * bb, length, dph).astype(_COMPUTE_DTYPE)

    qh = to_heads(q, q_len)      # (G, Q, dph), G = H*bb, g = h*bb + b
    kh = to_heads(k, k_len)      # (G, K, dph)
    vh = to_heads(v, k_len)      # (G, K, dph)

    # NOTE: "gqd,gkd->gqk" contracts both operands' last dims; at production
    # key lengths, produce kh pre-transposed as (G, dph, K) to avoid a vxpose.
    scores = jnp.einsum("gqd,gkd->gqk", qh, kh,
                        preferred_element_type=jnp.float32)   # (G, Q, K) f32
    if bias is not None:
        # bias: (bb, 1-or-Q, K) additive f32 mask, head-independent.
        scores = (scores.reshape(H, bb, q_len, k_len) + bias[None]
                  ).reshape(H * bb, q_len, k_len)

    m = jnp.max(scores, axis=-1, keepdims=True)
    e = jnp.exp(scores - m)
    denom = jnp.sum(e, axis=-1, keepdims=True)
    attn = (e * pl.reciprocal(denom, approx=True)).astype(_COMPUTE_DTYPE)

    ctx = jnp.einsum("gqk,gkd->gqd", attn, vh,
                     preferred_element_type=jnp.float32)      # (G, Q, dph) f32

    # Output projection: sum over heads of (bb*Q, dph) @ (dph, Do); no
    # head-minor transpose, no lane relayout, no concatenate.
    ctx = ctx.reshape(H, bb, q_len, dph)
    out = _linear(ctx[0].reshape(bb * q_len, dph), Wo_r[0], bo)
    for h in range(1, H):
        out = out + jnp.dot(ctx[h].reshape(bb * q_len, dph).astype(Wo_r.dtype),
                            Wo_r[h], preferred_element_type=jnp.float32)
    return out


# --------------------------------- kernel ----------------------------------

def _kernel(num_heads,
            x_ref, key_ref, val_ref, enc_ref, bias_ref,
            sWq, sWk, sWv, sWo, eWq, eWk, eWv, eWo, fW1, fW2,
            vec_ref, fb1_ref,
            out_ref):
    bb, q_len, dq = x_ref.shape
    s_len = key_ref.shape[1]
    e_len = enc_ref.shape[1]
    H = num_heads

    # Flatten the batch block into the matmul row (M) dimension.
    xf = x_ref[...].reshape(bb * q_len, dq)                       # f32
    keyf = key_ref[...].reshape(bb * s_len, key_ref.shape[2])     # bf16
    valf = val_ref[...].reshape(bb * s_len, val_ref.shape[2])     # bf16
    encf = enc_ref[...].reshape(bb * e_len, enc_ref.shape[2])     # bf16
    bias = bias_ref[...]                                          # (bb, 1|Q, E) f32

    V = vec_ref[...]     # (16, Do) f32 packed biases / LayerNorm params

    # --- self attention + residual + LayerNorm (dropout = identity) ---
    a1 = _mha(xf, keyf, valf, bb, q_len, s_len,
              sWq[...], V[_SBQ:_SBQ + 1], sWk[...], V[_SBK:_SBK + 1],
              sWv[...], V[_SBV:_SBV + 1], sWo[...], V[_SBO:_SBO + 1],
              H, bias=None)
    hidden = _layer_norm(xf + a1, V[_SG:_SG + 1], V[_SB:_SB + 1])

    # --- source (encoder) attention + residual + LayerNorm ---
    a2 = _mha(hidden, encf, encf, bb, q_len, e_len,
              eWq[...], V[_EBQ:_EBQ + 1], eWk[...], V[_EBK:_EBK + 1],
              eWv[...], V[_EBV:_EBV + 1], eWo[...], V[_EBO:_EBO + 1],
              H, bias=bias)
    h2 = _layer_norm(hidden + a2, V[_EG:_EG + 1], V[_EB:_EB + 1])

    # --- feed forward (Linear -> ReLU -> Linear) + residual + LayerNorm ---
    ff = jnp.maximum(_linear(h2, fW1[...], fb1_ref[...]), 0.0)
    ff = _linear(ff, fW2[...], V[_FB2:_FB2 + 1])
    out = _layer_norm(h2 + ff, V[_FG:_FG + 1], V[_FB:_FB + 1])
    out_ref[...] = out.reshape(bb, q_len, out_ref.shape[2]).astype(out_ref.dtype)


# --------------------------------- wrapper ---------------------------------

def self_and_source_attention(x, key, val, enc_mem, enc_mask, params, num_heads,
                              batch_block=None):
    B, Q, Dq = x.shape
    E = enc_mem.shape[1]
    Do = params["sWq"].shape[1]
    # TODO(synk): LayerNormResidual's shortcut Linear for query_size != output_size
    # is not implemented; this path assumes the identity shortcut (Dq == Do).
    assert Dq == Do, "identity residual shortcut requires query_size == output_size"
    assert Do % num_heads == 0
    dph = Do // num_heads

    # Batch folding: fold batches until M = batch_block*Q >= 32 while keeping a
    # >=2-way "parallel" grid axis (v7x megacore) when B allows it.
    if batch_block is None:
        batch_block = 1
        while (batch_block * Q < 32 and B % (batch_block * 2) == 0
               and B // (batch_block * 2) >= 2):
            batch_block *= 2
    assert B % batch_block == 0
    n_blocks = B // batch_block

    # Matmul-only inputs travel HBM->VMEM in bf16 (x stays f32: it feeds the
    # f32 residual path). Bit-identical: the kernel cast them to bf16 anyway.
    key_c = key.astype(_COMPUTE_DTYPE)
    val_c = val.astype(_COMPUTE_DTYPE)
    enc_c = enc_mem.astype(_COMPUTE_DTYPE)

    # Precompute the key mask as an additive f32 bias (one broadcast add in the
    # kernel instead of an int compare + select inside the softmax path).
    if enc_mask is None:
        mask_bias = jnp.zeros((B, 1, E), jnp.float32)
    else:
        m = enc_mask.reshape(B, -1, E)
        mask_bias = jnp.where(m != 0, jnp.float32(-1e18),
                              jnp.float32(0.0)).astype(jnp.float32)

    # Pack the 15 tiny (1, Do) bias / LayerNorm vectors into one slab.
    vec_rows = [params[k].astype(jnp.float32).reshape(1, Do) for k in _VEC_ORDER]
    vec_rows.append(jnp.zeros((_VEC_ROWS - len(vec_rows), Do), jnp.float32))
    vecs = jnp.concatenate(vec_rows, axis=0)               # (16, Do)

    # bf16 weights; the two output projections are reshaped to (H, dph, Do) so
    # the kernel contracts (head, dph) without a head-minor relayout.
    weights = []
    for k in _WEIGHT_ORDER:
        w = params[k].astype(_COMPUTE_DTYPE)
        if k in ("sWo", "eWo"):
            w = w.reshape(num_heads, dph, Do)
        weights.append(w)
    fb1 = params["fb1"].astype(jnp.float32).reshape(1, 4 * Do)

    def per_block(arr):
        nz = arr.ndim - 1
        return pl.BlockSpec((batch_block,) + arr.shape[1:],
                            lambda b, _nz=nz: (b,) + (0,) * _nz)

    # Weights / packed params: whole-array VMEM residents -> copied once, not
    # part of the (double-buffered) pipeline.
    # TODO(synk): at production widths (Do >= 1024), K-tile fW1/fW2 over an
    # "arbitrary" grid axis on v7x (64 MiB VMEM) instead of keeping them resident.
    resident = pl.BlockSpec(memory_space=pltpu.MemorySpace.VMEM)

    in_specs = [per_block(a) for a in (x, key_c, val_c, enc_c, mask_bias)]
    in_specs += [resident] * (len(weights) + 2)

    # Scoped-VMEM budget ~= real footprint (resident weights + double-buffered
    # activation blocks) + slack, rather than a blanket 48 MiB (matters on
    # v7x's 64 MiB per-TC VMEM).
    def nbytes(a):
        return int(a.size) * a.dtype.itemsize
    resident_bytes = sum(nbytes(w) for w in weights) + nbytes(vecs) + nbytes(fb1)
    block_bytes = sum(nbytes(a) // n_blocks for a in (x, key_c, val_c, enc_c, mask_bias))
    block_bytes += batch_block * Q * Do * 4                 # output block
    vmem_limit = int(resident_bytes + 2 * block_bytes + (6 << 20))

    return pl.pallas_call(
        functools.partial(_kernel, num_heads),
        out_shape=jax.ShapeDtypeStruct((B, Q, Do), jnp.float32),
        grid=(n_blocks,),
        in_specs=in_specs,
        out_specs=pl.BlockSpec((batch_block, Q, Do), lambda b: (b, 0, 0)),
        compiler_params=pltpu.CompilerParams(
            dimension_semantics=("parallel",),   # batch blocks sharded across v7x TCs
            vmem_limit_bytes=vmem_limit),
    )(x, key_c, val_c, enc_c, mask_bias, *weights, vecs, fb1)


# -------------------------- params & pure-JAX ref ---------------------------

def init_params(key, Dq, Dm, Do):
    ks = iter(jax.random.split(key, 40))
    wdt = jnp.bfloat16

    def w(shape, scale=0.05, dtype=jnp.float32):
        return (scale * jax.random.normal(next(ks), shape)).astype(dtype)

    p = {}
    # self-attention MHA + its LayerNorm
    p["sWq"], p["sbq"] = w((Dq, Do), dtype=wdt), w((1, Do))
    p["sWk"], p["sbk"] = w((Dm, Do), dtype=wdt), w((1, Do))
    p["sWv"], p["sbv"] = w((Dm, Do), dtype=wdt), w((1, Do))
    p["sWo"], p["sbo"] = w((Do, Do), dtype=wdt), w((1, Do))
    p["sg"], p["sb"] = 1.0 + w((1, Do)), w((1, Do))
    # encoder-attention MHA + LayerNorm
    p["eWq"], p["ebq"] = w((Do, Do), dtype=wdt), w((1, Do))
    p["eWk"], p["ebk"] = w((Dm, Do), dtype=wdt), w((1, Do))
    p["eWv"], p["ebv"] = w((Dm, Do), dtype=wdt), w((1, Do))
    p["eWo"], p["ebo"] = w((Do, Do), dtype=wdt), w((1, Do))
    p["eg"], p["eb"] = 1.0 + w((1, Do)), w((1, Do))
    # feed-forward + LayerNorm
    p["fW1"], p["fb1"] = w((Do, 4 * Do), dtype=wdt), w((1, 4 * Do))
    p["fW2"], p["fb2"] = w((4 * Do, Do), dtype=wdt), w((1, Do))
    p["fg"], p["fb"] = 1.0 + w((1, Do)), w((1, Do))
    return p


def ref_forward(x, key, val, enc, enc_mask, p, H):
    """Pure-JAX reference with the same mixed-precision policy (bf16 matmul
    operands, f32 accumulation / softmax / LayerNorm)."""
    cd = _COMPUTE_DTYPE

    def lin(a, w, b):
        return jnp.dot(a.astype(cd), w.astype(cd),
                       preferred_element_type=jnp.float32) + b

    def ln(z, g, b, eps=1e-6):
        mu = z.mean(-1, keepdims=True)
        var = ((z - mu) ** 2).mean(-1, keepdims=True)
        return (z - mu) * jax.lax.rsqrt(var + eps) * g + b

    def mha(q, k, v, Wq, bq, Wk, bk, Wv, bv, Wo, bo, mask):
        B_, Qn, _ = q.shape
        Kn = k.shape[1]
        Do_ = Wq.shape[1]
        dph = Do_ // H
        qq = (lin(q, Wq, bq) * (1.0 / math.sqrt(dph))).reshape(B_, Qn, H, dph)
        qq = qq.transpose(0, 2, 1, 3).astype(cd)
        kk = lin(k, Wk, bk).reshape(B_, Kn, H, dph).transpose(0, 2, 1, 3).astype(cd)
        vv = lin(v, Wv, bv).reshape(B_, Kn, H, dph).transpose(0, 2, 1, 3).astype(cd)
        sc = jnp.einsum("bhqd,bhkd->bhqk", qq, kk, preferred_element_type=jnp.float32)
        if mask is not None:
            sc = jnp.where(mask[:, None, :, :] != 0, -1e18, sc)
        at = jax.nn.softmax(sc, axis=-1)
        ctx = jnp.einsum("bhqk,bhkd->bhqd", at.astype(cd), vv,
                         preferred_element_type=jnp.float32)
        ctx = ctx.transpose(0, 2, 1, 3).reshape(B_, Qn, Do_)
        return lin(ctx, Wo, bo)

    a1 = mha(x, key, val, p["sWq"], p["sbq"], p["sWk"], p["sbk"],
             p["sWv"], p["sbv"], p["sWo"], p["sbo"], None)
    hidden = ln(x + a1, p["sg"], p["sb"])
    a2 = mha(hidden, enc, enc, p["eWq"], p["ebq"], p["eWk"], p["ebk"],
             p["eWv"], p["ebv"], p["eWo"], p["ebo"], enc_mask)
    h2 = ln(hidden + a2, p["eg"], p["eb"])
    ff = jnp.maximum(lin(h2, p["fW1"], p["fb1"]), 0.0)
    ff = lin(ff, p["fW2"], p["fb2"])
    return ln(h2 + ff, p["fg"], p["fb"])


# ----------------------------------- main -----------------------------------

if __name__ == "__main__":
    # Small but lane-dense shapes: feature dims are multiples of 128, dph = 128.
    # B = 4 so batch folding gives M = 32 rows per grid step AND a 2-way
    # "parallel" grid axis (v7x megacore).
    B, Q, S, E = 4, 16, 16, 16         # batch, query len, self kv len, enc len
    Dq, Dm, Do, H = 256, 128, 256, 2   # query_size, mem_size, output_size, heads

    root = jax.random.PRNGKey(0)
    kx, kk, kv, ke, kp = jax.random.split(root, 5)
    x = jax.random.normal(kx, (B, Q, Dq), jnp.float32)
    key = jax.random.normal(kk, (B, S, Dm), jnp.float32)
    val = jax.random.normal(kv, (B, S, Dm), jnp.float32)
    enc = jax.random.normal(ke, (B, E, Dm), jnp.float32)
    # (B, 1, E) int mask: nonzero = masked key (PyTorch masked_fill semantics)
    enc_mask = (jnp.arange(E)[None, :] >=
                (E - 1 - jnp.arange(B)[:, None])).astype(jnp.int32)[:, None, :]

    params = init_params(kp, Dq, Dm, Do)

    out = self_and_source_attention(x, key, val, enc, enc_mask, params, H)
    out = jax.block_until_ready(out)

    ref = ref_forward(x, key, val, enc, enc_mask, params, H)
    assert out.shape == (B, Q, Do)
    max_err = float(jnp.max(jnp.abs(out - ref)))
    # bf16 matmuls + EUP approximate reciprocal in softmax -> loose-ish bound
    # on the O(1) LayerNorm-normalized outputs.
    assert max_err < 2e-2, max_err
    print("KERNEL_OK")
</pallas_src>

<mosaic_0001>
module attributes {stable_mosaic.version = 11 : i64} {
  func.func @_kernel(%arg0: i32, %arg1: memref<2x16x256xf32, #tpu.memory_space<vmem>>, %arg2: memref<2x16x128xbf16, #tpu.memory_space<vmem>>, %arg3: memref<2x16x128xbf16, #tpu.memory_space<vmem>>, %arg4: memref<2x16x128xbf16, #tpu.memory_space<vmem>>, %arg5: memref<2x1x16xf32, #tpu.memory_space<vmem>>, %arg6: memref<256x256xbf16, #tpu.memory_space<vmem>>, %arg7: memref<128x256xbf16, #tpu.memory_space<vmem>>, %arg8: memref<128x256xbf16, #tpu.memory_space<vmem>>, %arg9: memref<2x128x256xbf16, #tpu.memory_space<vmem>>, %arg10: memref<256x256xbf16, #tpu.memory_space<vmem>>, %arg11: memref<128x256xbf16, #tpu.memory_space<vmem>>, %arg12: memref<128x256xbf16, #tpu.memory_space<vmem>>, %arg13: memref<2x128x256xbf16, #tpu.memory_space<vmem>>, %arg14: memref<256x1024xbf16, #tpu.memory_space<vmem>>, %arg15: memref<1024x256xbf16, #tpu.memory_space<vmem>>, %arg16: memref<16x256xf32, #tpu.memory_space<vmem>>, %arg17: memref<1x1024xf32, #tpu.memory_space<vmem>>, %arg18: memref<2x16x256xf32, #tpu.memory_space<vmem>>) attributes {dimension_semantics = [#tpu.dimension_semantics<parallel>], iteration_bounds = array<i64: 2>, scalar_prefetch = 0 : i64, scratch_operands = 0 : i64, tpu.core_type = #tpu.core_type<tc>, window_params = [{transform_indices = @transform_0, window_bounds = array<i64: 2, 16, 256>}, {transform_indices = @transform_1, window_bounds = array<i64: 2, 16, 128>}, {transform_indices = @transform_2, window_bounds = array<i64: 2, 16, 128>}, {transform_indices = @transform_3, window_bounds = array<i64: 2, 16, 128>}, {transform_indices = @transform_4, window_bounds = array<i64: 2, 1, 16>}, {pipeline_mode = #tpu.pipeline_mode<synchronous>, transform_indices = @transform_5, window_bounds = array<i64: 256, 256>}, {pipeline_mode = #tpu.pipeline_mode<synchronous>, transform_indices = @transform_6, window_bounds = array<i64: 128, 256>}, {pipeline_mode = #tpu.pipeline_mode<synchronous>, transform_indices = @transform_7, window_bounds = array<i64: 128, 256>}, {pipeline_mode = #tpu.pipeline_mode<synchronous>, transform_indices = @transform_8, window_bounds = array<i64: 2, 128, 256>}, {pipeline_mode = #tpu.pipeline_mode<synchronous>, transform_indices = @transform_9, window_bounds = array<i64: 256, 256>}, {pipeline_mode = #tpu.pipeline_mode<synchronous>, transform_indices = @transform_10, window_bounds = array<i64: 128, 256>}, {pipeline_mode = #tpu.pipeline_mode<synchronous>, transform_indices = @transform_11, window_bounds = array<i64: 128, 256>}, {pipeline_mode = #tpu.pipeline_mode<synchronous>, transform_indices = @transform_12, window_bounds = array<i64: 2, 128, 256>}, {pipeline_mode = #tpu.pipeline_mode<synchronous>, transform_indices = @transform_13, window_bounds = array<i64: 256, 1024>}, {pipeline_mode = #tpu.pipeline_mode<synchronous>, transform_indices = @transform_14, window_bounds = array<i64: 1024, 256>}, {pipeline_mode = #tpu.pipeline_mode<synchronous>, transform_indices = @transform_15, window_bounds = array<i64: 16, 256>}, {pipeline_mode = #tpu.pipeline_mode<synchronous>, transform_indices = @transform_16, window_bounds = array<i64: 1, 1024>}, {transform_indices = @transform_17, window_bounds = array<i64: 2, 16, 256>}]} {
    %c0 = arith.constant 0 : index
    %c0_0 = arith.constant 0 : index
    %c0_1 = arith.constant 0 : index
    %0 = vector.load %arg1[%c0, %c0_0, %c0_1] : memref<2x16x256xf32, #tpu.memory_space<vmem>>, vector<2x16x256xf32>
    %1 = vector.shape_cast %0 : vector<2x16x256xf32> to vector<32x256xf32>
    %c0_2 = arith.constant 0 : index
    %c0_3 = arith.constant 0 : index
    %c0_4 = arith.constant 0 : index
    %2 = vector.load %arg2[%c0_2, %c0_3, %c0_4] : memref<2x16x128xbf16, #tpu.memory_space<vmem>>, vector<2x16x128xbf16>
    %3 = vector.shape_cast %2 : vector<2x16x128xbf16> to vector<32x128xbf16>
    %c0_5 = arith.constant 0 : index
    %c0_6 = arith.constant 0 : index
    %c0_7 = arith.constant 0 : index
    %4 = vector.load %arg3[%c0_5, %c0_6, %c0_7] : memref<2x16x128xbf16, #tpu.memory_space<vmem>>, vector<2x16x128xbf16>
    %5 = vector.shape_cast %4 : vector<2x16x128xbf16> to vector<32x128xbf16>
    %c0_8 = arith.constant 0 : index
    %c0_9 = arith.constant 0 : index
    %c0_10 = arith.constant 0 : index
    %6 = vector.load %arg4[%c0_8, %c0_9, %c0_10] : memref<2x16x128xbf16, #tpu.memory_space<vmem>>, vector<2x16x128xbf16>
    %7 = vector.shape_cast %6 : vector<2x16x128xbf16> to vector<32x128xbf16>
    %c0_11 = arith.constant 0 : index
    %c0_12 = arith.constant 0 : index
    %c0_13 = arith.constant 0 : index
    %8 = vector.load %arg5[%c0_11, %c0_12, %c0_13] : memref<2x1x16xf32, #tpu.memory_space<vmem>>, vector<2x1x16xf32>
    %c0_14 = arith.constant 0 : index
    %c0_15 = arith.constant 0 : index
    %9 = vector.load %arg16[%c0_14, %c0_15] : memref<16x256xf32, #tpu.memory_space<vmem>>, vector<16x256xf32>
    %c0_16 = arith.constant 0 : index
    %c0_17 = arith.constant 0 : index
    %10 = vector.load %arg6[%c0_16, %c0_17] : memref<256x256xbf16, #tpu.memory_space<vmem>>, vector<256x256xbf16>
    %11 = vector.extract_strided_slice %9 {offsets = [0, 0], sizes = [1, 256], strides = [1, 1]} : vector<16x256xf32> to vector<1x256xf32>
    %c0_18 = arith.constant 0 : index
    %c0_19 = arith.constant 0 : index
    %12 = vector.load %arg7[%c0_18, %c0_19] : memref<128x256xbf16, #tpu.memory_space<vmem>>, vector<128x256xbf16>
    %13 = vector.extract_strided_slice %9 {offsets = [1, 0], sizes = [1, 256], strides = [1, 1]} : vector<16x256xf32> to vector<1x256xf32>
    %c0_20 = arith.constant 0 : index
    %c0_21 = arith.constant 0 : index
    %14 = vector.load %arg8[%c0_20, %c0_21] : memref<128x256xbf16, #tpu.memory_space<vmem>>, vector<128x256xbf16>
    %15 = vector.extract_strided_slice %9 {offsets = [2, 0], sizes = [1, 256], strides = [1, 1]} : vector<16x256xf32> to vector<1x256xf32>
    %c0_22 = arith.constant 0 : index
    %c0_23 = arith.constant 0 : index
    %c0_24 = arith.constant 0 : index
    %16 = vector.load %arg9[%c0_22, %c0_23, %c0_24] : memref<2x128x256xbf16, #tpu.memory_space<vmem>>, vector<2x128x256xbf16>
    %17 = vector.extract_strided_slice %9 {offsets = [3, 0], sizes = [1, 256], strides = [1, 1]} : vector<16x256xf32> to vector<1x256xf32>
    %18 = arith.truncf %1 : vector<32x256xf32> to vector<32x256xbf16>
    %cst = arith.constant dense<0.000000e+00> : vector<32x256xf32>
    %19 = tpu.matmul %18, %10, %cst {dimension_numbers = #tpu.dot_dimension_numbers<[1], [0], [0], [1], [0, 0, 1, 1], [], []>} : vector<32x256xbf16>, vector<256x256xbf16>, vector<32x256xf32> -> vector<32x256xf32>
    %20 = vector.broadcast %11 : vector<1x256xf32> to vector<32x256xf32>
    %21 = arith.addf %19, %20 : vector<32x256xf32>
    %cst_25 = arith.constant 0.0883883461 : f32
    %22 = vector.broadcast %cst_25 : f32 to vector<32x256xf32>
    %23 = arith.mulf %21, %22 : vector<32x256xf32>
    %cst_26 = arith.constant dense<0.000000e+00> : vector<32x256xf32>
    %24 = tpu.matmul %3, %12, %cst_26 {dimension_numbers = #tpu.dot_dimension_numbers<[1], [0], [0], [1], [0, 0, 1, 1], [], []>} : vector<32x128xbf16>, vector<128x256xbf16>, vector<32x256xf32> -> vector<32x256xf32>
    %25 = vector.broadcast %13 : vector<1x256xf32> to vector<32x256xf32>
    %26 = arith.addf %24, %25 : vector<32x256xf32>
    %cst_27 = arith.constant dense<0.000000e+00> : vector<32x256xf32>
    %27 = tpu.matmul %5, %14, %cst_27 {dimension_numbers = #tpu.dot_dimension_numbers<[1], [0], [0], [1], [0, 0, 1, 1], [], []>} : vector<32x128xbf16>, vector<128x256xbf16>, vector<32x256xf32> -> vector<32x256xf32>
    %28 = vector.broadcast %15 : vector<1x256xf32> to vector<32x256xf32>
    %29 = arith.addf %27, %28 : vector<32x256xf32>
    %30 = vector.shape_cast %23 : vector<32x256xf32> to vector<32x2x128xf32>
    %31 = tpu.transpose %30, [1, 0, 2] : vector<32x2x128xf32> -> vector<2x32x128xf32>
    %32 = vector.shape_cast %31 : vector<2x32x128xf32> to vector<4x16x128xf32>
    %33 = arith.truncf %32 : vector<4x16x128xf32> to vector<4x16x128xbf16>
    %34 = vector.shape_cast %26 : vector<32x256xf32> to vector<32x2x128xf32>
    %35 = tpu.transpose %34, [1, 0, 2] : vector<32x2x128xf32> -> vector<2x32x128xf32>
    %36 = vector.shape_cast %35 : vector<2x32x128xf32> to vector<4x16x128xf32>
    %37 = arith.truncf %36 : vector<4x16x128xf32> to vector<4x16x128xbf16>
    %38 = vector.shape_cast %29 : vector<32x256xf32> to vector<32x2x128xf32>
    %39 = tpu.transpose %38, [1, 0, 2] : vector<32x2x128xf32> -> vector<2x32x128xf32>
    %40 = vector.shape_cast %39 : vector<2x32x128xf32> to vector<4x16x128xf32>
    %41 = arith.truncf %40 : vector<4x16x128xf32> to vector<4x16x128xbf16>
    "tpu.trace_start"() <{level = 10 : i32, message = "gqd,gkd->gqk"}> : () -> ()
    %cst_28 = arith.constant dense<0.000000e+00> : vector<4x16x16xf32>
    %42 = tpu.matmul %33, %37, %cst_28 {dimension_numbers = #tpu.dot_dimension_numbers<[2], [2], [1], [1], [0, 0, 0, 1, 1, 1], [0], [0]>} : vector<4x16x128xbf16>, vector<4x16x128xbf16>, vector<4x16x16xf32> -> vector<4x16x16xf32>
    "tpu.trace_stop"() : () -> ()
    %cst_29 = arith.constant dense<0xFF800000> : vector<4x16xf32>
    %43 = vector.multi_reduction <maximumf>, %42, %cst_29 [2] : vector<4x16x16xf32> to vector<4x16xf32>
    %44 = vector.shape_cast %43 : vector<4x16xf32> to vector<4x16x1xf32>
    %45 = vector.broadcast %44 : vector<4x16x1xf32> to vector<4x16x16xf32>
    %46 = arith.subf %42, %45 : vector<4x16x16xf32>
    %47 = math.exp %46 : vector<4x16x16xf32>
    %cst_30 = arith.constant dense<0.000000e+00> : vector<4x16xf32>
    %48 = vector.multi_reduction <add>, %47, %cst_30 [2] : vector<4x16x16xf32> to vector<4x16xf32>
    %49 = vector.shape_cast %48 : vector<4x16xf32> to vector<4x16x1xf32>
    %50 = tpu.reciprocal %49 {approx = true} : vector<4x16x1xf32> -> vector<4x16x1xf32>
    %51 = vector.broadcast %50 : vector<4x16x1xf32> to vector<4x16x16xf32>
    %52 = arith.mulf %47, %51 : vector<4x16x16xf32>
    %53 = arith.truncf %52 : vector<4x16x16xf32> to vector<4x16x16xbf16>
    "tpu.trace_start"() <{level = 10 : i32, message = "gqk,gkd->gqd"}> : () -> ()
    %cst_31 = arith.constant dense<0.000000e+00> : vector<4x16x128xf32>
    %54 = tpu.matmul %53, %41, %cst_31 {dimension_numbers = #tpu.dot_dimension_numbers<[2], [1], [1], [2], [0, 0, 0, 1, 1, 2], [0], [0]>} : vector<4x16x16xbf16>, vector<4x16x128xbf16>, vector<4x16x128xf32> -> vector<4x16x128xf32>
    "tpu.trace_stop"() : () -> ()
    %55 = vector.shape_cast %54 : vector<4x16x128xf32> to vector<2x2x16x128xf32>
    %56 = vector.extract_strided_slice %55 {offsets = [0, 0, 0, 0], sizes = [1, 2, 16, 128], strides = [1, 1, 1, 1]} : vector<2x2x16x128xf32> to vector<1x2x16x128xf32>
    %57 = vector.shape_cast %56 : vector<1x2x16x128xf32> to vector<2x16x128xf32>
    %58 = vector.shape_cast %57 : vector<2x16x128xf32> to vector<32x128xf32>
    %59 = vector.extract_strided_slice %16 {offsets = [0, 0, 0], sizes = [1, 128, 256], strides = [1, 1, 1]} : vector<2x128x256xbf16> to vector<1x128x256xbf16>
    %60 = vector.shape_cast %59 : vector<1x128x256xbf16> to vector<128x256xbf16>
    %61 = arith.truncf %58 : vector<32x128xf32> to vector<32x128xbf16>
    %cst_32 = arith.constant dense<0.000000e+00> : vector<32x256xf32>
    %62 = tpu.matmul %61, %60, %cst_32 {dimension_numbers = #tpu.dot_dimension_numbers<[1], [0], [0], [1], [0, 0, 1, 1], [], []>} : vector<32x128xbf16>, vector<128x256xbf16>, vector<32x256xf32> -> vector<32x256xf32>
    %63 = vector.broadcast %17 : vector<1x256xf32> to vector<32x256xf32>
    %64 = arith.addf %62, %63 : vector<32x256xf32>
    %65 = vector.extract_strided_slice %55 {offsets = [1, 0, 0, 0], sizes = [1, 2, 16, 128], strides = [1, 1, 1, 1]} : vector<2x2x16x128xf32> to vector<1x2x16x128xf32>
    %66 = vector.shape_cast %65 : vector<1x2x16x128xf32> to vector<2x16x128xf32>
    %67 = vector.shape_cast %66 : vector<2x16x128xf32> to vector<32x128xf32>
    %68 = arith.truncf %67 : vector<32x128xf32> to vector<32x128xbf16>
    %69 = vector.extract_strided_slice %16 {offsets = [1, 0, 0], sizes = [1, 128, 256], strides = [1, 1, 1]} : vector<2x128x256xbf16> to vector<1x128x256xbf16>
    %70 = vector.shape_cast %69 : vector<1x128x256xbf16> to vector<128x256xbf16>
    %cst_33 = arith.constant dense<0.000000e+00> : vector<32x256xf32>
    %71 = tpu.matmul %68, %70, %cst_33 {dimension_numbers = #tpu.dot_dimension_numbers<[1], [0], [0], [1], [0, 0, 1, 1], [], []>} : vector<32x128xbf16>, vector<128x256xbf16>, vector<32x256xf32> -> vector<32x256xf32>
    %72 = arith.addf %64, %71 : vector<32x256xf32>
    %73 = arith.addf %1, %72 : vector<32x256xf32>
    %74 = vector.extract_strided_slice %9 {offsets = [4, 0], sizes = [1, 256], strides = [1, 1]} : vector<16x256xf32> to vector<1x256xf32>
    %75 = vector.extract_strided_slice %9 {offsets = [5, 0], sizes = [1, 256], strides = [1, 1]} : vector<16x256xf32> to vector<1x256xf32>
    %cst_34 = arith.constant dense<0.000000e+00> : vector<32xf32>
    %76 = vector.multi_reduction <add>, %73, %cst_34 [1] : vector<32x256xf32> to vector<32xf32>
    %77 = vector.shape_cast %76 : vector<32xf32> to vector<32x1xf32>
    %cst_35 = arith.constant 2.560000e+02 : f32
    %78 = vector.broadcast %cst_35 : f32 to vector<32x1xf32>
    %79 = arith.divf %77, %78 : vector<32x1xf32>
    %80 = vector.broadcast %79 : vector<32x1xf32> to vector<32x256xf32>
    %81 = arith.subf %73, %80 : vector<32x256xf32>
    %82 = arith.mulf %81, %81 : vector<32x256xf32>
    %cst_36 = arith.constant dense<0.000000e+00> : vector<32xf32>
    %83 = vector.multi_reduction <add>, %82, %cst_36 [1] : vector<32x256xf32> to vector<32xf32>
    %84 = vector.shape_cast %83 : vector<32xf32> to vector<32x1xf32>
    %cst_37 = arith.constant 2.560000e+02 : f32
    %85 = vector.broadcast %cst_37 : f32 to vector<32x1xf32>
    %86 = arith.divf %84, %85 : vector<32x1xf32>
    %cst_38 = arith.constant 9.99999997E-7 : f32
    %87 = vector.broadcast %cst_38 : f32 to vector<32x1xf32>
    %88 = arith.addf %86, %87 : vector<32x1xf32>
    %89 = math.rsqrt %88 : vector<32x1xf32>
    %90 = vector.broadcast %89 : vector<32x1xf32> to vector<32x256xf32>
    %91 = arith.mulf %81, %90 : vector<32x256xf32>
    %92 = vector.broadcast %74 : vector<1x256xf32> to vector<32x256xf32>
    %93 = arith.mulf %91, %92 : vector<32x256xf32>
    %94 = vector.broadcast %75 : vector<1x256xf32> to vector<32x256xf32>
    %95 = arith.addf %93, %94 : vector<32x256xf32>
    %c0_39 = arith.constant 0 : index
    %c0_40 = arith.constant 0 : index
    %96 = vector.load %arg10[%c0_39, %c0_40] : memref<256x256xbf16, #tpu.memory_space<vmem>>, vector<256x256xbf16>
    %97 = vector.extract_strided_slice %9 {offsets = [6, 0], sizes = [1, 256], strides = [1, 1]} : vector<16x256xf32> to vector<1x256xf32>
    %c0_41 = arith.constant 0 : index
    %c0_42 = arith.constant 0 : index
    %98 = vector.load %arg11[%c0_41, %c0_42] : memref<128x256xbf16, #tpu.memory_space<vmem>>, vector<128x256xbf16>
    %99 = vector.extract_strided_slice %9 {offsets = [7, 0], sizes = [1, 256], strides = [1, 1]} : vector<16x256xf32> to vector<1x256xf32>
    %c0_43 = arith.constant 0 : index
    %c0_44 = arith.constant 0 : index
    %100 = vector.load %arg12[%c0_43, %c0_44] : memref<128x256xbf16, #tpu.memory_space<vmem>>, vector<128x256xbf16>
    %101 = vector.extract_strided_slice %9 {offsets = [8, 0], sizes = [1, 256], strides = [1, 1]} : vector<16x256xf32> to vector<1x256xf32>
    %c0_45 = arith.constant 0 : index
    %c0_46 = arith.constant 0 : index
    %c0_47 = arith.constant 0 : index
    %102 = vector.load %arg13[%c0_45, %c0_46, %c0_47] : memref<2x128x256xbf16, #tpu.memory_space<vmem>>, vector<2x128x256xbf16>
    %103 = vector.extract_strided_slice %9 {offsets = [9, 0], sizes = [1, 256], strides = [1, 1]} : vector<16x256xf32> to vector<1x256xf32>
    %104 = arith.truncf %95 : vector<32x256xf32> to vector<32x256xbf16>
    %cst_48 = arith.constant dense<0.000000e+00> : vector<32x256xf32>
    %105 = tpu.matmul %104, %96, %cst_48 {dimension_numbers = #tpu.dot_dimension_numbers<[1], [0], [0], [1], [0, 0, 1, 1], [], []>} : vector<32x256xbf16>, vector<256x256xbf16>, vector<32x256xf32> -> vector<32x256xf32>
    %106 = vector.broadcast %97 : vector<1x256xf32> to vector<32x256xf32>
    %107 = arith.addf %105, %106 : vector<32x256xf32>
    %cst_49 = arith.constant 0.0883883461 : f32
    %108 = vector.broadcast %cst_49 : f32 to vector<32x256xf32>
    %109 = arith.mulf %107, %108 : vector<32x256xf32>
    %cst_50 = arith.constant dense<0.000000e+00> : vector<32x256xf32>
    %110 = tpu.matmul %7, %98, %cst_50 {dimension_numbers = #tpu.dot_dimension_numbers<[1], [0], [0], [1], [0, 0, 1, 1], [], []>} : vector<32x128xbf16>, vector<128x256xbf16>, vector<32x256xf32> -> vector<32x256xf32>
    %111 = vector.broadcast %99 : vector<1x256xf32> to vector<32x256xf32>
    %112 = arith.addf %110, %111 : vector<32x256xf32>
    %cst_51 = arith.constant dense<0.000000e+00> : vector<32x256xf32>
    %113 = tpu.matmul %7, %100, %cst_51 {dimension_numbers = #tpu.dot_dimension_numbers<[1], [0], [0], [1], [0, 0, 1, 1], [], []>} : vector<32x128xbf16>, vector<128x256xbf16>, vector<32x256xf32> -> vector<32x256xf32>
    %114 = vector.broadcast %101 : vector<1x256xf32> to vector<32x256xf32>
    %115 = arith.addf %113, %114 : vector<32x256xf32>
    %116 = vector.shape_cast %109 : vector<32x256xf32> to vector<32x2x128xf32>
    %117 = tpu.transpose %116, [1, 0, 2] : vector<32x2x128xf32> -> vector<2x32x128xf32>
    %118 = vector.shape_cast %117 : vector<2x32x128xf32> to vector<4x16x128xf32>
    %119 = arith.truncf %118 : vector<4x16x128xf32> to vector<4x16x128xbf16>
    %120 = vector.shape_cast %112 : vector<32x256xf32> to vector<32x2x128xf32>
    %121 = tpu.transpose %120, [1, 0, 2] : vector<32x2x128xf32> -> vector<2x32x128xf32>
    %122 = vector.shape_cast %121 : vector<2x32x128xf32> to vector<4x16x128xf32>
    %123 = arith.truncf %122 : vector<4x16x128xf32> to vector<4x16x128xbf16>
    %124 = vector.shape_cast %115 : vector<32x256xf32> to vector<32x2x128xf32>
    %125 = tpu.transpose %124, [1, 0, 2] : vector<32x2x128xf32> -> vector<2x32x128xf32>
    %126 = vector.shape_cast %125 : vector<2x32x128xf32> to vector<4x16x128xf32>
    %127 = arith.truncf %126 : vector<4x16x128xf32> to vector<4x16x128xbf16>
    "tpu.trace_start"() <{level = 10 : i32, message = "gqd,gkd->gqk"}> : () -> ()
    %cst_52 = arith.constant dense<0.000000e+00> : vector<4x16x16xf32>
    %128 = tpu.matmul %119, %123, %cst_52 {dimension_numbers = #tpu.dot_dimension_numbers<[2], [2], [1], [1], [0, 0, 0, 1, 1, 1], [0], [0]>} : vector<4x16x128xbf16>, vector<4x16x128xbf16>, vector<4x16x16xf32> -> vector<4x16x16xf32>
    "tpu.trace_stop"() : () -> ()
    %129 = vector.shape_cast %128 : vector<4x16x16xf32> to vector<2x2x16x16xf32>
    %130 = vector.shape_cast %8 : vector<2x1x16xf32> to vector<1x2x1x16xf32>
    %131 = vector.broadcast %130 : vector<1x2x1x16xf32> to vector<2x2x16x16xf32>
    %132 = arith.addf %129, %131 : vector<2x2x16x16xf32>
    %133 = vector.shape_cast %132 : vector<2x2x16x16xf32> to vector<4x16x16xf32>
    %cst_53 = arith.constant dense<0xFF800000> : vector<4x16xf32>
    %134 = vector.multi_reduction <maximumf>, %133, %cst_53 [2] : vector<4x16x16xf32> to vector<4x16xf32>
    %135 = vector.shape_cast %134 : vector<4x16xf32> to vector<4x16x1xf32>
    %136 = vector.broadcast %135 : vector<4x16x1xf32> to vector<4x16x16xf32>
    %137 = arith.subf %133, %136 : vector<4x16x16xf32>
    %138 = math.exp %137 : vector<4x16x16xf32>
    %cst_54 = arith.constant dense<0.000000e+00> : vector<4x16xf32>
    %139 = vector.multi_reduction <add>, %138, %cst_54 [2] : vector<4x16x16xf32> to vector<4x16xf32>
    %140 = vector.shape_cast %139 : vector<4x16xf32> to vector<4x16x1xf32>
    %141 = tpu.reciprocal %140 {approx = true} : vector<4x16x1xf32> -> vector<4x16x1xf32>
    %142 = vector.broadcast %141 : vector<4x16x1xf32> to vector<4x16x16xf32>
    %143 = arith.mulf %138, %142 : vector<4x16x16xf32>
    %144 = arith.truncf %143 : vector<4x16x16xf32> to vector<4x16x16xbf16>
    "tpu.trace_start"() <{level = 10 : i32, message = "gqk,gkd->gqd"}> : () -> ()
    %cst_55 = arith.constant dense<0.000000e+00> : vector<4x16x128xf32>
    %145 = tpu.matmul %144, %127, %cst_55 {dimension_numbers = #tpu.dot_dimension_numbers<[2], [1], [1], [2], [0, 0, 0, 1, 1, 2], [0], [0]>} : vector<4x16x16xbf16>, vector<4x16x128xbf16>, vector<4x16x128xf32> -> vector<4x16x128xf32>
    "tpu.trace_stop"() : () -> ()
    %146 = vector.shape_cast %145 : vector<4x16x128xf32> to vector<2x2x16x128xf32>
    %147 = vector.extract_strided_slice %146 {offsets = [0, 0, 0, 0], sizes = [1, 2, 16, 128], strides = [1, 1, 1, 1]} : vector<2x2x16x128xf32> to vector<1x2x16x128xf32>
    %148 = vector.shape_cast %147 : vector<1x2x16x128xf32> to vector<2x16x128xf32>
    %149 = vector.shape_cast %148 : vector<2x16x128xf32> to vector<32x128xf32>
    %150 = vector.extract_strided_slice %102 {offsets = [0, 0, 0], sizes = [1, 128, 256], strides = [1, 1, 1]} : vector<2x128x256xbf16> to vector<1x128x256xbf16>
    %151 = vector.shape_cast %150 : vector<1x128x256xbf16> to vector<128x256xbf16>
    %152 = arith.truncf %149 : vector<32x128xf32> to vector<32x128xbf16>
    %cst_56 = arith.constant dense<0.000000e+00> : vector<32x256xf32>
    %153 = tpu.matmul %152, %151, %cst_56 {dimension_numbers = #tpu.dot_dimension_numbers<[1], [0], [0], [1], [0, 0, 1, 1], [], []>} : vector<32x128xbf16>, vector<128x256xbf16>, vector<32x256xf32> -> vector<32x256xf32>
    %154 = vector.broadcast %103 : vector<1x256xf32> to vector<32x256xf32>
    %155 = arith.addf %153, %154 : vector<32x256xf32>
    %156 = vector.extract_strided_slice %146 {offsets = [1, 0, 0, 0], sizes = [1, 2, 16, 128], strides = [1, 1, 1, 1]} : vector<2x2x16x128xf32> to vector<1x2x16x128xf32>
    %157 = vector.shape_cast %156 : vector<1x2x16x128xf32> to vector<2x16x128xf32>
    %158 = vector.shape_cast %157 : vector<2x16x128xf32> to vector<32x128xf32>
    %159 = arith.truncf %158 : vector<32x128xf32> to vector<32x128xbf16>
    %160 = vector.extract_strided_slice %102 {offsets = [1, 0, 0], sizes = [1, 128, 256], strides = [1, 1, 1]} : vector<2x128x256xbf16> to vector<1x128x256xbf16>
    %161 = vector.shape_cast %160 : vector<1x128x256xbf16> to vector<128x256xbf16>
    %cst_57 = arith.constant dense<0.000000e+00> : vector<32x256xf32>
    %162 = tpu.matmul %159, %161, %cst_57 {dimension_numbers = #tpu.dot_dimension_numbers<[1], [0], [0], [1], [0, 0, 1, 1], [], []>} : vector<32x128xbf16>, vector<128x256xbf16>, vector<32x256xf32> -> vector<32x256xf32>
    %163 = arith.addf %155, %162 : vector<32x256xf32>
    %164 = arith.addf %95, %163 : vector<32x256xf32>
    %165 = vector.extract_strided_slice %9 {offsets = [10, 0], sizes = [1, 256], strides = [1, 1]} : vector<16x256xf32> to vector<1x256xf32>
    %166 = vector.extract_strided_slice %9 {offsets = [11, 0], sizes = [1, 256], strides = [1, 1]} : vector<16x256xf32> to vector<1x256xf32>
    %cst_58 = arith.constant dense<0.000000e+00> : vector<32xf32>
    %167 = vector.multi_reduction <add>, %164, %cst_58 [1] : vector<32x256xf32> to vector<32xf32>
    %168 = vector.shape_cast %167 : vector<32xf32> to vector<32x1xf32>
    %cst_59 = arith.constant 2.560000e+02 : f32
    %169 = vector.broadcast %cst_59 : f32 to vector<32x1xf32>
    %170 = arith.divf %168, %169 : vector<32x1xf32>
    %171 = vector.broadcast %170 : vector<32x1xf32> to vector<32x256xf32>
    %172 = arith.subf %164, %171 : vector<32x256xf32>
    %173 = arith.mulf %172, %172 : vector<32x256xf32>
    %cst_60 = arith.constant dense<0.000000e+00> : vector<32xf32>
    %174 = vector.multi_reduction <add>, %173, %cst_60 [1] : vector<32x256xf32> to vector<32xf32>
    %175 = vector.shape_cast %174 : vector<32xf32> to vector<32x1xf32>
    %cst_61 = arith.constant 2.560000e+02 : f32
    %176 = vector.broadcast %cst_61 : f32 to vector<32x1xf32>
    %177 = arith.divf %175, %176 : vector<32x1xf32>
    %cst_62 = arith.constant 9.99999997E-7 : f32
    %178 = vector.broadcast %cst_62 : f32 to vector<32x1xf32>
    %179 = arith.addf %177, %178 : vector<32x1xf32>
    %180 = math.rsqrt %179 : vector<32x1xf32>
    %181 = vector.broadcast %180 : vector<32x1xf32> to vector<32x256xf32>
    %182 = arith.mulf %172, %181 : vector<32x256xf32>
    %183 = vector.broadcast %165 : vector<1x256xf32> to vector<32x256xf32>
    %184 = arith.mulf %182, %183 : vector<32x256xf32>
    %185 = vector.broadcast %166 : vector<1x256xf32> to vector<32x256xf32>
    %186 = arith.addf %184, %185 : vector<32x256xf32>
    %c0_63 = arith.constant 0 : index
    %c0_64 = arith.constant 0 : index
    %187 = vector.load %arg14[%c0_63, %c0_64] : memref<256x1024xbf16, #tpu.memory_space<vmem>>, vector<256x1024xbf16>
    %c0_65 = arith.constant 0 : index
    %c0_66 = arith.constant 0 : index
    %188 = vector.load %arg17[%c0_65, %c0_66] : memref<1x1024xf32, #tpu.memory_space<vmem>>, vector<1x1024xf32>
    %189 = arith.truncf %186 : vector<32x256xf32> to vector<32x256xbf16>
    %cst_67 = arith.constant dense<0.000000e+00> : vector<32x1024xf32>
    %190 = tpu.matmul %189, %187, %cst_67 {dimension_numbers = #tpu.dot_dimension_numbers<[1], [0], [0], [1], [0, 0, 1, 1], [], []>} : vector<32x256xbf16>, vector<256x1024xbf16>, vector<32x1024xf32> -> vector<32x1024xf32>
    %191 = vector.broadcast %188 : vector<1x1024xf32> to vector<32x1024xf32>
    %192 = arith.addf %190, %191 : vector<32x1024xf32>
    %cst_68 = arith.constant 0.000000e+00 : f32
    %193 = vector.broadcast %cst_68 : f32 to vector<32x1024xf32>
    %194 = arith.maximumf %192, %193 : vector<32x1024xf32>
    %c0_69 = arith.constant 0 : index
    %c0_70 = arith.constant 0 : index
    %195 = vector.load %arg15[%c0_69, %c0_70] : memref<1024x256xbf16, #tpu.memory_space<vmem>>, vector<1024x256xbf16>
    %196 = vector.extract_strided_slice %9 {offsets = [12, 0], sizes = [1, 256], strides = [1, 1]} : vector<16x256xf32> to vector<1x256xf32>
    %197 = arith.truncf %194 : vector<32x1024xf32> to vector<32x1024xbf16>
    %cst_71 = arith.constant dense<0.000000e+00> : vector<32x256xf32>
    %198 = tpu.matmul %197, %195, %cst_71 {dimension_numbers = #tpu.dot_dimension_numbers<[1], [0], [0], [1], [0, 0, 1, 1], [], []>} : vector<32x1024xbf16>, vector<1024x256xbf16>, vector<32x256xf32> -> vector<32x256xf32>
    %199 = vector.broadcast %196 : vector<1x256xf32> to vector<32x256xf32>
    %200 = arith.addf %198, %199 : vector<32x256xf32>
    %201 = arith.addf %186, %200 : vector<32x256xf32>
    %202 = vector.extract_strided_slice %9 {offsets = [13, 0], sizes = [1, 256], strides = [1, 1]} : vector<16x256xf32> to vector<1x256xf32>
    %203 = vector.extract_strided_slice %9 {offsets = [14, 0], sizes = [1, 256], strides = [1, 1]} : vector<16x256xf32> to vector<1x256xf32>
    %cst_72 = arith.constant dense<0.000000e+00> : vector<32xf32>
    %204 = vector.multi_reduction <add>, %201, %cst_72 [1] : vector<32x256xf32> to vector<32xf32>
    %205 = vector.shape_cast %204 : vector<32xf32> to vector<32x1xf32>
    %cst_73 = arith.constant 2.560000e+02 : f32
    %206 = vector.broadcast %cst_73 : f32 to vector<32x1xf32>
    %207 = arith.divf %205, %206 : vector<32x1xf32>
    %208 = vector.broadcast %207 : vector<32x1xf32> to vector<32x256xf32>
    %209 = arith.subf %201, %208 : vector<32x256xf32>
    %210 = arith.mulf %209, %209 : vector<32x256xf32>
    %cst_74 = arith.constant dense<0.000000e+00> : vector<32xf32>
    %211 = vector.multi_reduction <add>, %210, %cst_74 [1] : vector<32x256xf32> to vector<32xf32>
    %212 = vector.shape_cast %211 : vector<32xf32> to vector<32x1xf32>
    %cst_75 = arith.constant 2.560000e+02 : f32
    %213 = vector.broadcast %cst_75 : f32 to vector<32x1xf32>
    %214 = arith.divf %212, %213 : vector<32x1xf32>
    %cst_76 = arith.constant 9.99999997E-7 : f32
    %215 = vector.broadcast %cst_76 : f32 to vector<32x1xf32>
    %216 = arith.addf %214, %215 : vector<32x1xf32>
    %217 = math.rsqrt %216 : vector<32x1xf32>
    %218 = vector.broadcast %217 : vector<32x1xf32> to vector<32x256xf32>
    %219 = arith.mulf %209, %218 : vector<32x256xf32>
    %220 = vector.broadcast %202 : vector<1x256xf32> to vector<32x256xf32>
    %221 = arith.mulf %219, %220 : vector<32x256xf32>
    %222 = vector.broadcast %203 : vector<1x256xf32> to vector<32x256xf32>
    %223 = arith.addf %221, %222 : vector<32x256xf32>
    %224 = vector.shape_cast %223 : vector<32x256xf32> to vector<2x16x256xf32>
    %c0_77 = arith.constant 0 : index
    %c0_78 = arith.constant 0 : index
    %c0_79 = arith.constant 0 : index
    %225 = vector.load %arg18[%c0_77, %c0_78, %c0_79] : memref<2x16x256xf32, #tpu.memory_space<vmem>>, vector<2x16x256xf32>
    tpu.vector_store %arg18[%c0_77, %c0_78, %c0_79], %224 {strides = array<i32>} : memref<2x16x256xf32, #tpu.memory_space<vmem>>, vector<2x16x256xf32>,
    return
  }
  func.func @transform_0(%arg0: i32) -> (i32, i32, i32) {
    %c0_i32 = arith.constant 0 : i32
    %c0_i32_0 = arith.constant 0 : i32
    %c0_i32_1 = arith.constant 0 : i32
    return %arg0, %c0_i32, %c0_i32_0 : i32, i32, i32
  }
  func.func @transform_1(%arg0: i32) -> (i32, i32, i32) {
    %c0_i32 = arith.constant 0 : i32
    %c0_i32_0 = arith.constant 0 : i32
    %c0_i32_1 = arith.constant 0 : i32
    return %arg0, %c0_i32, %c0_i32_0 : i32, i32, i32
  }
  func.func @transform_2(%arg0: i32) -> (i32, i32, i32) {
    %c0_i32 = arith.constant 0 : i32
    %c0_i32_0 = arith.constant 0 : i32
    %c0_i32_1 = arith.constant 0 : i32
    return %arg0, %c0_i32, %c0_i32_0 : i32, i32, i32
  }
  func.func @transform_3(%arg0: i32) -> (i32, i32, i32) {
    %c0_i32 = arith.constant 0 : i32
    %c0_i32_0 = arith.constant 0 : i32
    %c0_i32_1 = arith.constant 0 : i32
    return %arg0, %c0_i32, %c0_i32_0 : i32, i32, i32
  }
  func.func @transform_4(%arg0: i32) -> (i32, i32, i32) {
    %c0_i32 = arith.constant 0 : i32
    %c0_i32_0 = arith.constant 0 : i32
    %c0_i32_1 = arith.constant 0 : i32
    return %arg0, %c0_i32, %c0_i32_0 : i32, i32, i32
  }
  func.func @transform_5(%arg0: i32) -> (i32, i32) {
    %c0_i32 = arith.constant 0 : i32
    %c0_i32_0 = arith.constant 0 : i32
    %c0_i32_1 = arith.constant 0 : i32
    return %c0_i32, %c0_i32_0 : i32, i32
  }
  func.func @transform_6(%arg0: i32) -> (i32, i32) {
    %c0_i32 = arith.constant 0 : i32
    %c0_i32_0 = arith.constant 0 : i32
    %c0_i32_1 = arith.constant 0 : i32
    return %c0_i32, %c0_i32_0 : i32, i32
  }
  func.func @transform_7(%arg0: i32) -> (i32, i32) {
    %c0_i32 = arith.constant 0 : i32
    %c0_i32_0 = arith.constant 0 : i32
    %c0_i32_1 = arith.constant 0 : i32
    return %c0_i32, %c0_i32_0 : i32, i32
  }
  func.func @transform_8(%arg0: i32) -> (i32, i32, i32) {
    %c0_i32 = arith.constant 0 : i32
    %c0_i32_0 = arith.constant 0 : i32
    %c0_i32_1 = arith.constant 0 : i32
    %c0_i32_2 = arith.constant 0 : i32
    return %c0_i32, %c0_i32_0, %c0_i32_1 : i32, i32, i32
  }
  func.func @transform_9(%arg0: i32) -> (i32, i32) {
    %c0_i32 = arith.constant 0 : i32
    %c0_i32_0 = arith.constant 0 : i32
    %c0_i32_1 = arith.constant 0 : i32
    return %c0_i32, %c0_i32_0 : i32, i32
  }
  func.func @transform_10(%arg0: i32) -> (i32, i32) {
    %c0_i32 = arith.constant 0 : i32
    %c0_i32_0 = arith.constant 0 : i32
    %c0_i32_1 = arith.constant 0 : i32
    return %c0_i32, %c0_i32_0 : i32, i32
  }
  func.func @transform_11(%arg0: i32) -> (i32, i32) {
    %c0_i32 = arith.constant 0 : i32
    %c0_i32_0 = arith.constant 0 : i32
    %c0_i32_1 = arith.constant 0 : i32
    return %c0_i32, %c0_i32_0 : i32, i32
  }
  func.func @transform_12(%arg0: i32) -> (i32, i32, i32) {
    %c0_i32 = arith.constant 0 : i32
    %c0_i32_0 = arith.constant 0 : i32
    %c0_i32_1 = arith.constant 0 : i32
    %c0_i32_2 = arith.constant 0 : i32
    return %c0_i32, %c0_i32_0, %c0_i32_1 : i32, i32, i32
  }
  func.func @transform_13(%arg0: i32) -> (i32, i32) {
    %c0_i32 = arith.constant 0 : i32
    %c0_i32_0 = arith.constant 0 : i32
    %c0_i32_1 = arith.constant 0 : i32
    return %c0_i32, %c0_i32_0 : i32, i32
  }
  func.func @transform_14(%arg0: i32) -> (i32, i32) {
    %c0_i32 = arith.constant 0 : i32
    %c0_i32_0 = arith.constant 0 : i32
    %c0_i32_1 = arith.constant 0 : i32
    return %c0_i32, %c0_i32_0 : i32, i32
  }
  func.func @transform_15(%arg0: i32) -> (i32, i32) {
    %c0_i32 = arith.constant 0 : i32
    %c0_i32_0 = arith.constant 0 : i32
    %c0_i32_1 = arith.constant 0 : i32
    return %c0_i32, %c0_i32_0 : i32, i32
  }
  func.func @transform_16(%arg0: i32) -> (i32, i32) {
    %c0_i32 = arith.constant 0 : i32
    %c0_i32_0 = arith.constant 0 : i32
    %c0_i32_1 = arith.constant 0 : i32
    return %c0_i32, %c0_i32_0 : i32, i32
  }
  func.func @transform_17(%arg0: i32) -> (i32, i32, i32) {
    %c0_i32 = arith.constant 0 : i32
    %c0_i32_0 = arith.constant 0 : i32
    %c0_i32_1 = arith.constant 0 : i32
    return %arg0, %c0_i32, %c0_i32_0 : i32, i32, i32
  }
}

</mosaic_0001>

<bundles_post_ra>
// kernel: tpu_custom_call.1
= control target key start
LH: loop header
LB: loop body
LE: loop exit
PB: predicated region body
PF: predicated region fallthrough
CT: control target
= control target key end

     0   :  { %s12931_s0 = inlined_call_operand.hbm [shape: f32[4,16,256], index: 0, kind: input, shape index: {}]   ;;  %s12932_s1 = inlined_call_operand.hbm [shape: bf16[4,16,128], index: 1, kind: input, shape index: {}]   ;;  %s12933_s2 = inlined_call_operand.hbm [shape: bf16[4,16,128], index: 2, kind: input, shape index: {}]   ;;  %s12934_s3 = inlined_call_operand.hbm [shape: bf16[4,16,128], index: 3, kind: input, shape index: {}]   ;;  %s12935_s4 = inlined_call_operand.vmem [shape: f32[4,1,16], index: 4, kind: input, shape index: {}]   ;;  %s12936_s5 = inlined_call_operand.hbm [shape: bf16[256,256], index: 5, kind: input, shape index: {}]   ;;  %s12937_s6 = inlined_call_operand.hbm [shape: bf16[128,256], index: 6, kind: input, shape index: {}]   ;;  %s12938_s7 = inlined_call_operand.hbm [shape: bf16[128,256], index: 7, kind: input, shape index: {}]   ;;  %s12939_s8 = inlined_call_operand.hbm [shape: bf16[2,128,256], index: 8, kind: input, shape index: {}]   ;;  %s12940_s9 = inlined_call_operand.hbm [shape: bf16[256,256], index: 9, kind: input, shape index: {}]   ;;  %s12941_s10 = inlined_call_operand.hbm [shape: bf16[128,256], index: 10, kind: input, shape index: {}]   ;;  %s12942_s11 = inlined_call_operand.hbm [shape: bf16[128,256], index: 11, kind: input, shape index: {}]   ;;  %s12943_s12 = inlined_call_operand.hbm [shape: bf16[2,128,256], index: 12, kind: input, shape index: {}]   ;;  %s12944_s13 = inlined_call_operand.hbm [shape: bf16[256,1024], index: 13, kind: input, shape index: {}]   ;;  %s12945_s14 = inlined_call_operand.hbm [shape: bf16[1024,256], index: 14, kind: input, shape index: {}]   ;;  %s12946_s15 = inlined_call_operand.vmem [shape: f32[16,256], index: 15, kind: input, shape index: {}]   ;;  %s12947_s16 = inlined_call_operand.vmem [shape: f32[1,1024], index: 16, kind: input, shape index: {}]   ;;  %s12948_s17 = inlined_call_operand.hbm [shape: f32[4,16,256], index: 17, kind: output, shape index: {}]  }
   0x1   :  { %12984 = sst [smem:[#allocation43_spill]] %s12931_s0 }
   0x2   :  { %12985 = sst [smem:[#allocation44_spill]] %s12932_s1 }
   0x3   :  { %12986 = sst [smem:[#allocation45_spill]] %s12933_s2 }
   0x4   :  { %12987 = sst [smem:[#allocation46_spill]] %s12934_s3 }
   0x5   :  { %12988 = sst [smem:[#allocation47_spill]] %s12935_s4 }
   0x6   :  { %12989 = sst [smem:[#allocation48_spill]] %s12936_s5 }
   0x7   :  { %12990 = sst [smem:[#allocation49_spill]] %s12937_s6 }
   0x8   :  { %12991 = sst [smem:[#allocation50_spill]] %s12938_s7 }
   0x9   :  { %12992 = sst [smem:[#allocation51_spill]] %s12939_s8 }
   0xa   :  { %12993 = sst [smem:[#allocation52_spill]] %s12940_s9 }
   0xb   :  { %12994 = sst [smem:[#allocation53_spill]] %s12941_s10 }
   0xc   :  { %12995 = sst [smem:[#allocation54_spill]] %s12942_s11 }
   0xd   :  { %12996 = sst [smem:[#allocation55_spill]] %s12943_s12 }
   0xe   :  { %12997 = sst [smem:[#allocation56_spill]] %s12946_s15 }
   0xf   :  { %12998 = sst [smem:[#allocation57_spill]] %s12947_s16 }
  0x10   :  { %12999 = sst [smem:[#allocation58_spill]] %s12948_s17 }
  0x11   :  { %22 = vsyncpa [#allocation3], 0 }
  0x12   :  { %24 = vsyncpa [#allocation3 + $0x1], 0 }
  0x13   :  { %25 = vsyncpa [#allocation6], 0 }
  0x14   :  { %27 = vsyncpa [#allocation6 + $0x1], 0 }
  0x15   :  { %28 = vsyncpa [#allocation9], 0 }
  0x16   :  { %30 = vsyncpa [#allocation9 + $0x1], 0 }
  0x17   :  { %31 = vsyncpa [#allocation12], 0 }
  0x18   :  { %32 = vsyncpa [#allocation15], 0 }
  0x19   :  { %33 = vsyncpa [#allocation18], 0 }
  0x1a   :  { %34 = vsyncpa [#allocation21], 0 }
  0x1b   :  { %35 = vsyncpa [#allocation24], 0 }
  0x1c   :  { %36 = vsyncpa [#allocation4], 0 }
  0x1d   :  { %38 = vsyncpa [#allocation4 + $0x1], 0  ;;  %s11199_s24 = smov 0   ;;  %s11201_s25 = smov 0  }
  0x1e   :  { %s11203_s26 = smov 0   ;;  %s11205_s27 = smov 0  }
  0x1f LB: > { %13000 = sst [smem:[#allocation36_spill]] %s11065_s24  ;;  %s11079_s28 = smov [#allocation10]   ;;  %s11077_s27 = sphi %s11205_s27, %s13064_s27   ;;  %s11073_s26 = sphi %s11203_s26, %s13066_s26   ;;  %s11069_s25 = sphi %s11201_s25, %s13068_s25   ;;  %s11065_s24 = sphi %s11199_s24, %s13067_s24  }
  0x20   : > { %13001 = sst [smem:[#allocation37_spill]] %s11073_s26  ;;  %s469_s29 = sshll.u32 %s11079_s28, 4  ;;  %s11225_s29 = int_to_ptr.vmem [resolvable:$true] %s469_s29 }
  0x21   : > { %s11220_s0 = sadd.s32 4294967295, %s11077_s27   ;;  %p9049_p0 = scmp.ge.s32.totalorder %s11077_s27, 1 }
  0x22   : > { %p12956_p1 = scmp.eq.s32.totalorder %s11220_s0, 0  ;;  %p457_p2 = scmp.lt.s32.totalorder %s11077_s27, 3 }
  0x23   : > { %s11080_s18 = smov [#allocation11]   ;;  %s11081_s20 = smov [#allocation14]  }
  0x24   : > { %p11227_p3 = pnand %p9049_p0, %p457_p2  ;;  %s482_s19 = sshll.u32 %s11080_s18, 4  ;;  %s11240_s19 = int_to_ptr.vmem [resolvable:$true] %s482_s19 }
  0x25   : > { %s508_s21 = sshll.u32 %s11081_s20, 4  ;;  %s13005_s5 = sld [smem:[#allocation48_spill]]  ;;  %s11242_s21 = int_to_ptr.vmem [resolvable:$true] %s508_s21 }
  0x26   : > { %s13002_s30 = scalar_select %p11227_p3, 1, 0 }
  0x27   : > { %p9864_p5 = pneg %p11227_p3 }
  0x28   : > { %13003 = sst [smem:[#allocation38_spill]] %s13002_s30 }
  0x29   : > { %p11236_p6 = pnand %p9864_p5, %p12956_p1 }
  0x2b   : > { %s13004_s1 = scalar_select %p11236_p6, 1, 0 }
  0x2c   : > { %s10579_s28 = scalar_lea.hbm %s13005_s5, 4096  ;;  %p11252_p8 = pneg %p11236_p6 }
  0x2d   : > { %p10580_p7 = scmp.ne.s32.totalorder %s13005_s5, %s10579_s28  ;;  %p10586_p11 = scmp.lt.u32.totalorder %s10579_s28, %s13005_s5 }
  0x2e   : > { %s13006_s18 = scalar_select %p11252_p8, 1, 0 }
  0x2f   : > { %p10582_p9 = pnand %p11252_p8, %p10580_p7 }
  0x31   : > { %p10583_p10 = pneg %p10582_p9 }
  0x33   : > { %p10588_p12 = pnand %p10586_p11, %p10583_p10 }
  0x35   : > { %10591 = shalt.err (!%p10588_p12)
}
  0x36   : > { %s10592_s16 = scalar_lea.vmem %s11225_s29, 4096  ;;  %p10600_p5 = scmp.lt.s32.totalorder %s11225_s29, %s11225_s29 }
  0x37   : > { %p10593_p13 = scmp.ne.s32.totalorder %s11225_s29, %s10592_s16  ;;  %p10601_p4 = scmp.lt.s32.totalorder %s10592_s16, %s10592_s16 }
  0x39   : > { %p10595_p0 = pnand %p10593_p13, %p11252_p8  ;;  %p10602_p7 = por %p10601_p4, %p10600_p5 }
  0x3b   : > { %p10596_p2 = pneg %p10595_p0 }
  0x3d   : > { %p10603_p9 = pnand %p10602_p7, %p10596_p2 }
  0x3f   : > { %10606 = shalt.err (!%p10603_p9)
}
  0x40   : > { %s12958_s17 = smov 128   ;;  %s12960_s4 = smov 8  }
  0x41   : > { %9867 = dma.hbm_to_vmem [thread:$0]  (!%p11236_p6), %s13005_s5, 4096, %s11225_s29, [#allocation9], %s12958_s17, %s12958_s17, %s12960_s4  }
  0x42   : > { %s13007_s6 = sld [smem:[#allocation49_spill]] }
  0x48   : > { %s10607_s16 = scalar_lea.hbm %s13007_s6, 2048 }
  0x49   : > { %p10608_p4 = scmp.ne.s32.totalorder %s13007_s6, %s10607_s16  ;;  %p10614_p12 = scmp.lt.u32.totalorder %s10607_s16, %s13007_s6 }
  0x4b   : > { %p10610_p10 = pnand %p10608_p4, %p11252_p8 }
  0x4d   : > { %p10611_p11 = pneg %p10610_p10 }
  0x4f   : > { %p10616_p13 = pnand %p10614_p12, %p10611_p11 }
  0x51   : > { %10619 = shalt.err (!%p10616_p13)
}
  0x52   : > { %s10620_s29 = scalar_lea.vmem %s11240_s19, 2048  ;;  %p10628_p7 = scmp.lt.s32.totalorder %s11240_s19, %s11240_s19 }
  0x53   : > { %p10621_p0 = scmp.ne.s32.totalorder %s11240_s19, %s10620_s29  ;;  %p10629_p9 = scmp.lt.s32.totalorder %s10620_s29, %s10620_s29 }
  0x55   : > { %p10623_p2 = pnand %p10621_p0, %p11252_p8  ;;  %p10630_p4 = por %p10629_p9, %p10628_p7 }
  0x57   : > { %p10624_p5 = pneg %p10623_p2 }
  0x59   : > { %p10631_p10 = pnand %p10630_p4, %p10624_p5 }
  0x5b   : > { %10634 = shalt.err (!%p10631_p10)
}
  0x5c   : > { %9870 = dma.hbm_to_vmem [thread:$0]  (!%p11236_p6), %s13007_s6, 2048, %s11240_s19, [#allocation12], %s12958_s17, %s12958_s17, %s12960_s4  }
  0x5d   : > { %s13008_s8 = sld [smem:[#allocation51_spill]] }
  0x63   : > { %s10635_s22 = scalar_lea.hbm %s13008_s8, 4096 }
  0x64   : > { %p10636_p11 = scmp.ne.s32.totalorder %s13008_s8, %s10635_s22  ;;  %p10642_p0 = scmp.lt.u32.totalorder %s10635_s22, %s13008_s8 }
  0x66   : > { %p10638_p12 = pnand %p10636_p11, %p11252_p8 }
  0x68   : > { %p10639_p13 = pneg %p10638_p12 }
  0x6a   : > { %p10644_p2 = pnand %p10642_p0, %p10639_p13 }
  0x6c   : > { %10647 = shalt.err (!%p10644_p2)
}
  0x6d   : > { %s10648_s19 = scalar_lea.vmem %s11242_s21, 4096  ;;  %p10656_p4 = scmp.lt.s32.totalorder %s11242_s21, %s11242_s21 }
  0x6e   : > { %p10649_p5 = scmp.ne.s32.totalorder %s11242_s21, %s10648_s19  ;;  %p10657_p10 = scmp.lt.s32.totalorder %s10648_s19, %s10648_s19 }
  0x70   : > { %p10651_p7 = pnand %p10649_p5, %p11252_p8  ;;  %p10658_p11 = por %p10657_p10, %p10656_p4 }
  0x72   : > { %p10652_p9 = pneg %p10651_p7 }
  0x74   : > { %p10659_p12 = pnand %p10658_p11, %p10652_p9 }
  0x76   : > { %10662 = shalt.err (!%p10659_p12)
}
  0x77   : > { %9876 = dma.hbm_to_vmem [thread:$0]  (!%p11236_p6), %s13008_s8, 4096, %s11242_s21, [#allocation15], %s12958_s17, %s12958_s17, %s12960_s4  }
  0x78   : > { %s11084_s3 = smov [#allocation17]   ;;  %s11085_s30 = smov [#allocation20]  }
  0x79   : > { %s534_s15 = sshll.u32 %s11084_s3, 4  ;;  %s560_s22 = sshll.u32 %s11085_s30, 4  ;;  %s535_s15 = int_to_ptr.vmem [resolvable:$true] %s534_s15  ;;  %s561_s22 = int_to_ptr.vmem [resolvable:$true] %s560_s22 }
  0x7a   : > { %s13009_s10 = sld [smem:[#allocation53_spill]] }
  0x80   : > { %s10663_s20 = scalar_lea.hbm %s13009_s10, 2048 }
  0x81   : > { %p10664_p13 = scmp.ne.s32.totalorder %s13009_s10, %s10663_s20  ;;  %p10670_p5 = scmp.lt.u32.totalorder %s10663_s20, %s13009_s10 }
  0x83   : > { %p10666_p0 = pnand %p10664_p13, %p11252_p8 }
  0x85   : > { %p10667_p2 = pneg %p10666_p0 }
  0x87   : > { %p10672_p7 = pnand %p10670_p5, %p10667_p2 }
  0x89   : > { %10675 = shalt.err (!%p10672_p7)
}
  0x8a   : > { %s10676_s21 = scalar_lea.vmem %s535_s15, 2048  ;;  %p10684_p11 = scmp.lt.s32.totalorder %s535_s15, %s535_s15 }
  0x8b   : > { %p10677_p9 = scmp.ne.s32.totalorder %s535_s15, %s10676_s21  ;;  %p10685_p12 = scmp.lt.s32.totalorder %s10676_s21, %s10676_s21 }
  0x8d   : > { %p10679_p4 = pnand %p10677_p9, %p11252_p8  ;;  %p10686_p1 = por %p10685_p12, %p10684_p11 }
  0x8f   : > { %p10680_p10 = pneg %p10679_p4 }
  0x91   : > { %p10687_p3 = pnand %p10686_p1, %p10680_p10 }
  0x93   : > { %10690 = shalt.err (!%p10687_p3)
}
  0x94   : > { %9882 = dma.hbm_to_vmem [thread:$0]  (!%p11236_p6), %s13009_s10, 2048, %s535_s15, [#allocation18], %s12958_s17, %s12958_s17, %s12960_s4  }
  0x95   : > { %s13010_s12 = sld [smem:[#allocation55_spill]] }
  0x9b   : > { %s10691_s23 = scalar_lea.hbm %s13010_s12, 4096 }
  0x9c   : > { %p10692_p1 = scmp.ne.s32.totalorder %s13010_s12, %s10691_s23  ;;  %p10698_p0 = scmp.lt.u32.totalorder %s10691_s23, %s13010_s12 }
  0x9e   : > { %p10694_p3 = pnand %p10692_p1, %p11252_p8 }
  0xa0   : > { %p10695_p13 = pneg %p10694_p3 }
  0xa2   : > { %p10700_p2 = pnand %p10698_p0, %p10695_p13 }
  0xa4   : > { %10703 = shalt.err (!%p10700_p2)
}
  0xa5   : > { %s10704_s29 = scalar_lea.vmem %s561_s22, 4096  ;;  %p10712_p4 = scmp.lt.s32.totalorder %s561_s22, %s561_s22 }
  0xa6   : > { %p10705_p5 = scmp.ne.s32.totalorder %s561_s22, %s10704_s29  ;;  %p10713_p10 = scmp.lt.s32.totalorder %s10704_s29, %s10704_s29 }
  0xa8   : > { %p10707_p7 = pnand %p10705_p5, %p11252_p8  ;;  %p10714_p11 = por %p10713_p10, %p10712_p4 }
  0xaa   : > { %p10708_p9 = pneg %p10707_p7 }
  0xac   : > { %p10715_p12 = pnand %p10714_p11, %p10708_p9 }
  0xae   : > { %10718 = shalt.err (!%p10715_p12)
}
  0xaf   : > { %9888 = dma.hbm_to_vmem [thread:$0]  (!%p11236_p6), %s13010_s12, 4096, %s561_s22, [#allocation21], %s12958_s17, %s12958_s17, %s12960_s4  }
  0xb0   : > { %s9048_s5 = sadd.s32 4294967294, %s11077_s27   ;;  %s11372_s2 = sadd.s32 1, %s11077_s27  }
  0xb1   : > { %13011 = sst [smem:[#allocation39_spill]] %s11372_s2  ;;  %s51_s3 = sadd.s32 1, %s11073_s26 }
  0xb2   : > { %s48_s30 = ssub.s32 %s11077_s27, %s11372_s2  ;;  %p58_p1 = scmp.ne.s32.totalorder %s11073_s26, %s11069_s25 }
  0xb3   : > { %p49_p3 = scmp.eq.s32.totalorder %s48_s30, 0  ;;  %p59_p13 = scmp.eq.s32.totalorder %s11077_s27, 0 }
  0xb4   : > { %p64_p0 = scmp.ne.s32.totalorder %s11069_s25, %s11065_s24  ;;  %p444_p2 = scmp.eq.s32.totalorder %s11220_s0, 1 }
  0xb5   : > { %s11384_s23 = scalar_select %p49_p3, %s11073_s26, %s51_s3  }
  0xb6   : > { %p60_p5 = por %p59_p13, %p58_p1  ;;  %p13013_p7 = scmp.eq.s32.totalorder %s11220_s0, 0 }
  0xb7   : > { %13012 = sst [smem:[#allocation40_spill]] %s11384_s23  ;;  %p11392_p4 = por %p444_p2, %p58_p1 }
  0xb8   : > { %p11388_p9 = por %p13013_p7, %p64_p0  ;;  %p450_p10 = scmp.eq.s32.totalorder %s9048_s5, 1 }
  0xb9   : > { %s13015_s28 = scalar_select %p11392_p4, 1, 0 }
  0xba   : > { %s13014_s22 = scalar_select %p11388_p9, 1, 0 }
  0xbb   : > { %13016 = sst [smem:[#allocation41_spill]] %s13015_s28  ;;  %p9922_p11 = scmp.lt.s32.totalorder %s11077_s27, 2 }
  0xbc   : > { %s11398_s20 = sand.u32 1, %s11073_s26   ;;  %p11400_p12 = por %p450_p10, %p64_p0 }
  0xbd   : > { %p11405_p3 = pnand %p9922_p11, %p60_p5  ;;  %s11410_s15 = sshll.u32 %s11398_s20, 4 }
  0xbe   : > { %s13017_s16 = scalar_select %p11400_p12, 1, 0 }
  0xbf   : > { %s13019_s29 = scalar_select %p11405_p3, 1, 0 }
  0xc0   : > { %13018 = sst [smem:[#allocation42_spill]] %s13017_s16  ;;  %s11413_s21 = sshll.u32 %s11077_s27, 8 }
  0xc1   : > { %s13020_s30 = sld [smem:[#allocation44_spill]]  ;;  %s632_s4 = scalar_lea.vmem [#allocation5], %s11410_s15 }
  0xc2   : > { %s640_s19 = sshll.u32 %s632_s4, 4  ;;  %s13021_s6 = sand.u32 1, %s11077_s27   ;;  %s11422_s19 = int_to_ptr.vmem [resolvable:$true] %s640_s19 }
  0xc3   : > { %s11426_s8 = scalar_lea.sflag [#allocation6], %s13021_s6  ;;  %p11432_p13 = pneg %p11405_p3 }
  0xc5   : > { %s13022_s12 = scalar_select %p11432_p13, 1, 0 }
  0xc7   : > { %s11419_s17 = scalar_lea.hbm %s13020_s30, %s11413_s21  ;;  %s10724_s4 = scalar_lea.hbm %s13020_s30, 512 }
  0xc8   : > { %s10719_s10 = scalar_lea.hbm %s11419_s17, 256  ;;  %p10725_p5 = scmp.lt.u32.totalorder %s11419_s17, %s13020_s30 }
  0xc9   : > { %p10720_p1 = scmp.ne.s32.totalorder %s11419_s17, %s10719_s10  ;;  %p10726_p7 = scmp.lt.u32.totalorder %s10724_s4, %s10719_s10 }
  0xca   : > { %p10728_p11 = scmp.lt.u32.totalorder %s10719_s10, %s11419_s17 }
  0xcb   : > { %p10722_p0 = pnand %p11432_p13, %p10720_p1  ;;  %p10727_p10 = por %p10726_p7, %p10725_p5 }
  0xcd   : > { %p10723_p2 = pneg %p10722_p0  ;;  %p10729_p12 = por %p10728_p11, %p10727_p10 }
  0xcf   : > { %p10730_p4 = pnand %p10729_p12, %p10723_p2 }
  0xd1   : > { %10733 = shalt.err (!%p10730_p4)
}
  0xd2   : > { %s10734_s6 = scalar_lea.vmem %s11422_s19, 256  ;;  %s11086_s5 = smov [#allocation5]  }
  0xd3   : > { %p10735_p1 = scmp.ne.s32.totalorder %s11422_s19, %s10734_s6  ;;  %s10739_s3 = sshll.u32 %s11086_s5, 4  ;;  %s10740_s3 = int_to_ptr.vmem [resolvable:$false] %s10739_s3 }
  0xd4   : > { %s10741_s26 = scalar_lea.vmem %s10740_s3, 512  ;;  %p10742_p6 = scmp.lt.s32.totalorder %s11422_s19, %s10740_s3 }
  0xd5   : > { %p10737_p0 = pnand %p10735_p1, %p11432_p13  ;;  %p10743_p8 = scmp.lt.s32.totalorder %s10741_s26, %s10734_s6 }
  0xd7   : > { %p10738_p9 = pneg %p10737_p0  ;;  %p10744_p5 = por %p10743_p8, %p10742_p6 }
  0xd9   : > { %p10745_p7 = pnand %p10744_p5, %p10738_p9 }
  0xdb   : > { %10748 = shalt.err (!%p10745_p7)
}
  0xdc   : > { %s12978_s10 = smov 64   ;;  %s12980_s23 = smov 4  }
  0xdd   : > { %9901 = dma.hbm_to_vmem [thread:$0]  (!%p11405_p3), %s11419_s17, 256, %s11422_s19, %s11426_s8, %s12978_s10, %s12978_s10, %s12980_s23  }
  0xde   : > { %s11089_s4 = smov [#allocation13]   ;;  %s11090_s30 = smov [#allocation16]  }
  0xdf   : > { %s495_s5 = sshll.u32 %s11089_s4, 4  ;;  %s521_s3 = sshll.u32 %s11090_s30, 4  ;;  %s496_s5 = int_to_ptr.vmem [resolvable:$true] %s495_s5  ;;  %s11459_s3 = int_to_ptr.vmem [resolvable:$true] %s521_s3 }
  0xe0   : > { %s13023_s7 = sld [smem:[#allocation50_spill]]  ;;  %p13024_p8 = scmp.ne.s32.totalorder %s13006_s18, 0 }
  0xe6   : > { %s10749_s2 = scalar_lea.hbm %s13023_s7, 2048 }
  0xe7   : > { %p10750_p6 = scmp.ne.s32.totalorder %s13023_s7, %s10749_s2  ;;  %p10756_p12 = scmp.lt.u32.totalorder %s10749_s2, %s13023_s7 }
  0xe9   : > { %p10752_p9 = pnand %p10750_p6, %p13024_p8 }
  0xeb   : > { %p10753_p4 = pneg %p10752_p9 }
  0xed   : > { %p10758_p2 = pnand %p10756_p12, %p10753_p4 }
  0xef   : > { %10761 = shalt.err (!%p10758_p2)
}
  0xf0   : > { %s10762_s19 = scalar_lea.vmem %s496_s5, 2048  ;;  %p10770_p0 = scmp.lt.s32.totalorder %s496_s5, %s496_s5 }
  0xf1   : > { %p10763_p10 = scmp.ne.s32.totalorder %s496_s5, %s10762_s19  ;;  %p10771_p5 = scmp.lt.s32.totalorder %s10762_s19, %s10762_s19 }
  0xf3   : > { %p10765_p11 = pnand %p10763_p10, %p13024_p8  ;;  %p10772_p7 = por %p10771_p5, %p10770_p0 }
  0xf5   : > { %p10766_p1 = pneg %p10765_p11 }
  0xf7   : > { %p10773_p3 = pnand %p10772_p7, %p10766_p1 }
  0xf9   : > { %10776 = shalt.err (!%p10773_p3)
}
  0xfa   : > { %p13025_p6 = scmp.ne.s32.totalorder %s13004_s1, 0  ;;  %s13026_s24 = smov 8  }
  0xfb   : > { %s13027_s16 = smov 128   ;;  %s13028_s9 = sld [smem:[#allocation52_spill]] }
  0xfc   : > { %9873 = dma.hbm_to_vmem [thread:$0]  (!%p13025_p6), %s13023_s7, 2048, %s496_s5, [#allocation12], %s13027_s16, %s13027_s16, %s13026_s24  }
 0x101   : > { %s10777_s6 = scalar_lea.hbm %s13028_s9, 4096 }
 0x102   : > { %p10778_p9 = scmp.ne.s32.totalorder %s13028_s9, %s10777_s6  ;;  %p10784_p12 = scmp.lt.u32.totalorder %s10777_s6, %s13028_s9 }
 0x104   : > { %p10780_p3 = pnand %p10778_p9, %p13024_p8 }
 0x106   : > { %p10781_p4 = pneg %p10780_p3 }
 0x108   : > { %p10786_p2 = pnand %p10784_p12, %p10781_p4 }
 0x10a   : > { %10789 = shalt.err (!%p10786_p2)
}
 0x10b   : > { %s10790_s5 = scalar_lea.vmem %s11459_s3, 4096  ;;  %p10798_p0 = scmp.lt.s32.totalorder %s11459_s3, %s11459_s3 }
 0x10c   : > { %p10791_p10 = scmp.ne.s32.totalorder %s11459_s3, %s10790_s5  ;;  %p10799_p5 = scmp.lt.s32.totalorder %s10790_s5, %s10790_s5 }
 0x10e   : > { %p10793_p11 = pnand %p10791_p10, %p13024_p8  ;;  %p10800_p7 = por %p10799_p5, %p10798_p0 }
 0x110   : > { %p10794_p1 = pneg %p10793_p11 }
 0x112   : > { %p10801_p9 = pnand %p10800_p7, %p10794_p1 }
 0x114   : > { %10804 = shalt.err (!%p10801_p9)
}
 0x115   : > { %9879 = dma.hbm_to_vmem [thread:$0]  (!%p13025_p6), %s13028_s9, 4096, %s11459_s3, [#allocation15], %s13027_s16, %s13027_s16, %s13026_s24  }
 0x116   : > { %s11091_s2 = smov [#allocation19]   ;;  %s11092_s4 = smov [#allocation22]  }
 0x117   : > { %s547_s30 = sshll.u32 %s11091_s2, 4  ;;  %s573_s6 = sshll.u32 %s11092_s4, 4  ;;  %s548_s30 = int_to_ptr.vmem [resolvable:$true] %s547_s30  ;;  %s11508_s6 = int_to_ptr.vmem [resolvable:$true] %s573_s6 }
 0x118   : > { %s13029_s11 = sld [smem:[#allocation54_spill]] }
 0x11e   : > { %s10805_s19 = scalar_lea.hbm %s13029_s11, 2048 }
 0x11f   : > { %p10806_p3 = scmp.ne.s32.totalorder %s13029_s11, %s10805_s19  ;;  %p10812_p2 = scmp.lt.u32.totalorder %s10805_s19, %s13029_s11 }
 0x121   : > { %p10808_p4 = pnand %p10806_p3, %p13024_p8 }
 0x123   : > { %p10809_p12 = pneg %p10808_p4 }
 0x125   : > { %p10814_p10 = pnand %p10812_p2, %p10809_p12 }
 0x127   : > { %10817 = shalt.err (!%p10814_p10)
}
 0x128   : > { %s10818_s28 = scalar_lea.vmem %s548_s30, 2048  ;;  %p10826_p5 = scmp.lt.s32.totalorder %s548_s30, %s548_s30 }
 0x129   : > { %p10819_p11 = scmp.ne.s32.totalorder %s548_s30, %s10818_s28  ;;  %p10827_p7 = scmp.lt.s32.totalorder %s10818_s28, %s10818_s28 }
 0x12b   : > { %p10821_p1 = pnand %p10819_p11, %p13024_p8  ;;  %p10828_p9 = por %p10827_p7, %p10826_p5 }
 0x12d   : > { %p10822_p0 = pneg %p10821_p1 }
 0x12f   : > { %p10829_p13 = pnand %p10828_p9, %p10822_p0 }
 0x131   : > { %10832 = shalt.err (!%p10829_p13)
}
 0x132   : > { %9885 = dma.hbm_to_vmem [thread:$0]  (!%p13025_p6), %s13029_s11, 2048, %s548_s30, [#allocation18], %s13027_s16, %s13027_s16, %s13026_s24  }
 0x133   : > { %s10833_s17 = scalar_lea.hbm %s12944_s13, 16384 }
 0x134   : > { %p10834_p3 = scmp.ne.s32.totalorder %s12944_s13, %s10833_s17  ;;  %p10840_p12 = scmp.lt.u32.totalorder %s10833_s17, %s12944_s13 }
 0x136   : > { %p10836_p13 = pnand %p10834_p3, %p13024_p8 }
 0x138   : > { %p10837_p4 = pneg %p10836_p13 }
 0x13a   : > { %p10842_p2 = pnand %p10840_p12, %p10837_p4 }
 0x13c   : > { %10845 = shalt.err (!%p10842_p2)
}
 0x13d   : > { %s10846_s30 = scalar_lea.vmem %s11508_s6, 16384  ;;  %p10854_p0 = scmp.lt.s32.totalorder %s11508_s6, %s11508_s6 }
 0x13e   : > { %p10847_p10 = scmp.ne.s32.totalorder %s11508_s6, %s10846_s30  ;;  %p10855_p5 = scmp.lt.s32.totalorder %s10846_s30, %s10846_s30 }
 0x140   : > { %p10849_p11 = pnand %p10847_p10, %p13024_p8  ;;  %p10856_p7 = por %p10855_p5, %p10854_p0 }
 0x142   : > { %p10850_p1 = pneg %p10849_p11 }
 0x144   : > { %p10857_p9 = pnand %p10856_p7, %p10850_p1 }
 0x146   : > { %10860 = shalt.err (!%p10857_p9)
}
 0x147   : > { %s11093_s28 = smov 512   ;;  %s11094_s23 = smov 32  }
 0x148   : > { %9891 = dma.hbm_to_vmem [thread:$0]  (!%p13025_p6), %s12944_s13, 16384, %s11508_s6, [#allocation21], %s11093_s28, %s11093_s28, %s11094_s23  }
 0x149   : > { %s11095_s26 = smov [#allocation23]   ;;  %s9061_s19 = sshll.u32 %s11398_s20, 6 }
 0x14a   : > { %s586_s17 = sshll.u32 %s11095_s26, 4  ;;  %s10861_s3 = scalar_lea.hbm %s12945_s14, 16384  ;;  %s587_s17 = int_to_ptr.vmem [resolvable:$true] %s586_s17 }
 0x14b   : > { %p10862_p3 = scmp.ne.s32.totalorder %s12945_s14, %s10861_s3  ;;  %p10868_p12 = scmp.lt.u32.totalorder %s10861_s3, %s12945_s14 }
 0x14d   : > { %p10864_p13 = pnand %p10862_p3, %p13024_p8 }
 0x14f   : > { %p10865_p4 = pneg %p10864_p13 }
 0x151   : > { %p10870_p2 = pnand %p10868_p12, %p10865_p4 }
 0x153   : > { %10873 = shalt.err (!%p10870_p2)
}
 0x154   : > { %s10874_s6 = scalar_lea.vmem %s587_s17, 16384  ;;  %p10882_p0 = scmp.lt.s32.totalorder %s587_s17, %s587_s17 }
 0x155   : > { %p10875_p10 = scmp.ne.s32.totalorder %s587_s17, %s10874_s6  ;;  %p10883_p5 = scmp.lt.s32.totalorder %s10874_s6, %s10874_s6 }
 0x157   : > { %p10877_p11 = pnand %p10875_p10, %p13024_p8  ;;  %p10884_p7 = por %p10883_p5, %p10882_p0 }
 0x159   : > { %p10878_p1 = pneg %p10877_p11 }
 0x15b   : > { %p10885_p9 = pnand %p10884_p7, %p10878_p1 }
 0x15d   : > { %10888 = shalt.err (!%p10885_p9)
}
 0x15e   : > { %9894 = dma.hbm_to_vmem [thread:$0]  (!%p13025_p6), %s12945_s14, 16384, %s587_s17, [#allocation24], %s13027_s16, %s13027_s16, %s13026_s24  }
 0x15f   : > { %s9613_s11 = sshll.u32 %s11077_s27, 10  ;;  %s610_s18 = scalar_lea.vmem [#allocation2], %s9061_s19 }
 0x160   : > { %s618_s28 = sshll.u32 %s610_s18, 4  ;;  %s13030_s4 = sld [smem:[#allocation43_spill]]  ;;  %s11582_s28 = int_to_ptr.vmem [resolvable:$true] %s618_s28 }
 0x161   : > { %s607_s1 = scalar_lea.sflag [#allocation3], %s11398_s20  ;;  %p13031_p3 = scmp.ne.s32.totalorder %s13022_s12, 0 }
 0x166   : > { %s11580_s26 = scalar_lea.hbm %s13030_s4, %s9613_s11  ;;  %s10894_s17 = scalar_lea.hbm %s13030_s4, 2048 }
 0x167   : > { %s10889_s5 = scalar_lea.hbm %s11580_s26, 1024  ;;  %p10895_p4 = scmp.lt.u32.totalorder %s11580_s26, %s13030_s4 }
 0x168   : > { %p10890_p8 = scmp.ne.s32.totalorder %s11580_s26, %s10889_s5  ;;  %p10896_p12 = scmp.lt.u32.totalorder %s10894_s17, %s10889_s5 }
 0x169   : > { %p10898_p10 = scmp.lt.u32.totalorder %s10889_s5, %s11580_s26 }
 0x16a   : > { %p10892_p13 = pnand %p10890_p8, %p13031_p3  ;;  %p10897_p2 = por %p10896_p12, %p10895_p4 }
 0x16c   : > { %p10893_p6 = pneg %p10892_p13  ;;  %p10899_p11 = por %p10898_p10, %p10897_p2 }
 0x16e   : > { %p10900_p1 = pnand %p10899_p11, %p10893_p6 }
 0x170   : > { %10903 = shalt.err (!%p10900_p1)
}
 0x171   : > { %s10904_s3 = scalar_lea.vmem %s11582_s28, 1024  ;;  %s11096_s30 = smov [#allocation2]  }
 0x172   : > { %p10905_p0 = scmp.ne.s32.totalorder %s11582_s28, %s10904_s3  ;;  %s10909_s6 = sshll.u32 %s11096_s30, 4  ;;  %s10910_s6 = int_to_ptr.vmem [resolvable:$false] %s10909_s6 }
 0x173   : > { %s10911_s7 = scalar_lea.vmem %s10910_s6, 2048  ;;  %p10912_p9 = scmp.lt.s32.totalorder %s11582_s28, %s10910_s6 }
 0x174   : > { %p10907_p5 = pnand %p10905_p0, %p13031_p3  ;;  %p10913_p8 = scmp.lt.s32.totalorder %s10911_s7, %s10904_s3 }
 0x176   : > { %p10908_p7 = pneg %p10907_p5  ;;  %p10914_p13 = por %p10913_p8, %p10912_p9 }
 0x178   : > { %p10915_p4 = pnand %p10914_p13, %p10908_p7 }
 0x17a   : > { %10918 = shalt.err (!%p10915_p4)
}
 0x17b   : > { %s11097_s9 = smov 256   ;;  %s11098_s11 = smov 16  }
 0x17c   : > { %p13032_p6 = scmp.ne.s32.totalorder %s13019_s29, 0  ;;  %s13033_s2 = sld [smem:[#allocation45_spill]] }
 0x17d   : > { %s654_s24 = scalar_lea.vmem [#allocation7], %s11410_s15  ;;  %s13034_s10 = sld [smem:[#allocation46_spill]] }
 0x17e   : > { %9898 = dma.hbm_to_vmem [thread:$0]  (!%p13032_p6), %s11580_s26, 1024, %s11582_s28, %s607_s1, %s11097_s9, %s11097_s9, %s11098_s11  }
 0x17f   : > { %s662_s16 = sshll.u32 %s654_s24, 4  ;;  %s11615_s16 = int_to_ptr.vmem [resolvable:$true] %s662_s16 }
 0x182   : > { %s11612_s5 = scalar_lea.hbm %s13033_s2, %s11413_s21  ;;  %s10924_s1 = scalar_lea.hbm %s13033_s2, 512 }
 0x183   : > { %s11621_s3 = scalar_lea.hbm %s13034_s10, %s11413_s21  ;;  %s10919_s20 = scalar_lea.hbm %s11612_s5, 256 }
 0x184   : > { %p10920_p12 = scmp.ne.s32.totalorder %s11612_s5, %s10919_s20  ;;  %p10925_p11 = scmp.lt.u32.totalorder %s11612_s5, %s13033_s2 }
 0x185   : > { %p10926_p1 = scmp.lt.u32.totalorder %s10924_s1, %s10919_s20  ;;  %p10928_p5 = scmp.lt.u32.totalorder %s10919_s20, %s11612_s5 }
 0x186   : > { %p10922_p2 = pnand %p10920_p12, %p13031_p3 }
 0x187   : > { %p10927_p0 = por %p10926_p1, %p10925_p11 }
 0x188   : > { %p10923_p10 = pneg %p10922_p2 }
 0x189   : > { %p10929_p7 = por %p10928_p5, %p10927_p0 }
 0x18b   : > { %p10930_p9 = pnand %p10929_p7, %p10923_p10 }
 0x18d   : > { %10933 = shalt.err (!%p10930_p9)
}
 0x18e   : > { %s10934_s21 = scalar_lea.vmem %s11615_s16, 256  ;;  %s11099_s7 = smov [#allocation7]  }
 0x18f   : > { %p10935_p8 = scmp.ne.s32.totalorder %s11615_s16, %s10934_s21  ;;  %s10939_s9 = sshll.u32 %s11099_s7, 4  ;;  %s10940_s9 = int_to_ptr.vmem [resolvable:$false] %s10939_s9 }
 0x190   : > { %s10941_s11 = scalar_lea.vmem %s10940_s9, 512  ;;  %p10942_p12 = scmp.lt.s32.totalorder %s11615_s16, %s10940_s9 }
 0x191   : > { %p10937_p13 = pnand %p10935_p8, %p13031_p3  ;;  %p10943_p2 = scmp.lt.s32.totalorder %s10941_s11, %s10934_s21 }
 0x193   : > { %p10938_p4 = pneg %p10937_p13  ;;  %p10944_p11 = por %p10943_p2, %p10942_p12 }
 0x195   : > { %p10945_p1 = pnand %p10944_p11, %p10938_p4 }
 0x197   : > { %10948 = shalt.err (!%p10945_p1)
}
 0x198   : > { %s13035_s18 = smov 4   ;;  %s13036_s23 = smov 64  }
 0x199   : > { %9904 = dma.hbm_to_vmem [thread:$0]  (!%p13032_p6), %s11612_s5, 256, %s11615_s16, %s11426_s8, %s13036_s23, %s13036_s23, %s13035_s18  }
 0x19a   : > { %s676_s24 = scalar_lea.vmem [#allocation8], %s11410_s15  ;;  %s13037_s19 = sand.u32 1, %s11077_s27  }
 0x19b   : > { %s684_s17 = sshll.u32 %s676_s24, 4  ;;  %s11653_s20 = scalar_lea.sflag [#allocation9], %s13037_s19  ;;  %s11649_s17 = int_to_ptr.vmem [resolvable:$true] %s684_s17 }
 0x19c   : > { %s10949_s28 = scalar_lea.hbm %s11621_s3, 256  ;;  %s10954_s30 = scalar_lea.hbm %s13034_s10, 512 }
 0x19d   : > { %p10950_p10 = scmp.ne.s32.totalorder %s11621_s3, %s10949_s28  ;;  %p10955_p7 = scmp.lt.u32.totalorder %s11621_s3, %s13034_s10 }
 0x19e   : > { %p10956_p9 = scmp.lt.u32.totalorder %s10954_s30, %s10949_s28  ;;  %p10958_p13 = scmp.lt.u32.totalorder %s10949_s28, %s11621_s3 }
 0x19f   : > { %p10952_p0 = pnand %p10950_p10, %p13031_p3 }
 0x1a0   : > { %p10957_p8 = por %p10956_p9, %p10955_p7 }
 0x1a1   : > { %p10953_p5 = pneg %p10952_p0 }
 0x1a2   : > { %p10959_p4 = por %p10958_p13, %p10957_p8 }
 0x1a4   : > { %p10960_p12 = pnand %p10959_p4, %p10953_p5 }
 0x1a6   : > { %10963 = shalt.err (!%p10960_p12)
}
 0x1a7   : > { %s10964_s8 = scalar_lea.vmem %s11649_s17, 256  ;;  %s11100_s15 = smov [#allocation8]  }
 0x1a8   : > { %p10965_p2 = scmp.ne.s32.totalorder %s11649_s17, %s10964_s8  ;;  %s10969_s5 = sshll.u32 %s11100_s15, 4  ;;  %s10970_s5 = int_to_ptr.vmem [resolvable:$false] %s10969_s5 }
 0x1a9   : > { %s10971_s16 = scalar_lea.vmem %s10970_s5, 512  ;;  %p10972_p10 = scmp.lt.s32.totalorder %s11649_s17, %s10970_s5 }
 0x1aa   : > { %p10967_p11 = pnand %p10965_p2, %p13031_p3  ;;  %p10973_p0 = scmp.lt.s32.totalorder %s10971_s16, %s10964_s8 }
 0x1ac   : > { %p10968_p1 = pneg %p10967_p11  ;;  %p10974_p7 = por %p10973_p0, %p10972_p10 }
 0x1ae   : > { %p10975_p9 = pnand %p10974_p7, %p10968_p1 }
 0x1b0   : > { %10978 = shalt.err (!%p10975_p9)
}
 0x1b1   : > { %9907 = dma.hbm_to_vmem [thread:$0]  (!%p13032_p6), %s11621_s3, 256, %s11649_s17, %s11653_s20, %s13036_s23, %s13036_s23, %s13035_s18  }
 0x1b2   : > { %s13038_s12 = sld [smem:[#allocation38_spill]] }
 0x1b8   : > { %p13039_p3 = scmp.ne.s32.totalorder %s13038_s12, 0 }
 0x1b9   : > { %s11683_s7 = sand.u32 (!%p13039_p3), 1, %s11069_s25   ;;  %p13040_p5 = scmp.ne.s32.totalorder (!%p13039_p3), %s13014_s22, 0 }
 0x1ba   : > { %704 = sbr.rel (%p13039_p3) target bundleno = 4721 (0x1271), region = 88  ;;  %s9078_s9 = sshll.u32 (!%p13039_p3), %s11683_s7, 6 }
 0x1bb   : > { %s707_s11 = scalar_lea.sflag (!%p13039_p3), [#allocation3], %s11683_s7  ;;  %s11689_s29 = scalar_lea.vmem (!%p13039_p3), [#allocation2], %s9078_s9 }
 0x1c1   : > { %11024 = dma.done.wait (%p13040_p5), %s707_s11, 1024  }
 0x1c2   : > { %11026 = vsyncadd (%p13040_p5), %s707_s11, 4294966272  ;;  %s715_s3 = sand.u32 1, %s11220_s0   ;;  %s11697_s18 = sshll.u32 %s11683_s7, 4 }
 0x1c3   : > { %s716_s23 = scalar_lea.sflag [#allocation6], %s715_s3  ;;  %s719_s24 = scalar_lea.vmem [#allocation5], %s11697_s18 }
 0x1c4   : > { %11028 = dma.done.wait (%p13040_p5), %s716_s23, 512  }
 0x1c5   : > { %11030 = vsyncadd (%p13040_p5), %s716_s23, 4294966784  ;;  %s728_s17 = scalar_lea.vmem [#allocation7], %s11697_s18  ;;  %s734_s19 = scalar_lea.sflag [#allocation9], %s715_s3 }
 0x1c6   : > { %s737_s20 = scalar_lea.vmem [#allocation8], %s11697_s18 }
 0x1c7   : > { %11032 = dma.done.wait (%p13040_p5), %s734_s19, 256  }
 0x1c8   : > { %11034 = vsyncadd (%p13040_p5), %s734_s19, 4294967040  ;;  %p13041_p6 = scmp.eq.s32.totalorder %s11220_s0, 0 }
 0x1ca   : > { %11036 = dma.done.wait (%p13041_p6), [#allocation9], 4096   ;;  %p13042_p8 = pmov %p13041_p6 }
 0x1cb   : > { %p13043_p13 = pmov %p13041_p6 }
 0x1cc   : > { %11038 = vsyncadd (%p13042_p8), [#allocation9], 4294963200 }
 0x1cd   : > { %11040 = dma.done.wait (%p13043_p13), [#allocation12], 4096   ;;  %p13044_p4 = pmov %p13041_p6 }
 0x1cf   : > { %11042 = vsyncadd (%p13044_p4), [#allocation12], 4294963200  ;;  %p13045_p12 = pmov %p13044_p4 }
 0x1d0   : > { %p13046_p2 = pmov %p13044_p4 }
 0x1d1   : > { %11044 = dma.done.wait (%p13045_p12), [#allocation15], 8192  }
 0x1d2   : > { %11046 = vsyncadd (%p13046_p2), [#allocation15], 4294959104  ;;  %p13047_p11 = pmov %p13046_p2 }
 0x1d3   : > { %p13048_p1 = pmov %p13046_p2 }
 0x1d4   : > { %11048 = dma.done.wait (%p13047_p11), [#allocation18], 4096  }
 0x1d5   : > { %11050 = vsyncadd (%p13048_p1), [#allocation18], 4294963200  ;;  %p13049_p10 = pmov %p13048_p1 }
 0x1d6   : > { %p13050_p0 = pmov %p13048_p1 }
 0x1d7   : > { %11052 = dma.done.wait (%p13049_p10), [#allocation21], 20480  }
 0x1d8   : > { %11054 = vsyncadd (%p13050_p0), [#allocation21], 4294946816  ;;  %p13051_p7 = pmov %p13050_p0 }
 0x1d9   : > { %p13052_p9 = pmov %p13050_p0 }
 0x1da   : > { %11056 = dma.done.wait (%p13051_p7), [#allocation24], 16384  }
 0x1db   : > { %11058 = vsyncadd (%p13052_p9), [#allocation24], 4294950912  ;;  %v11101_v0 = vmov 0   ;;  %v9991_v1 = vld [vmem:[#allocation10 + $0x4] ss:$8 sps:$4 sm:$0xff]   ;;  %v861_v15 = vld [vmem:[%s11689_s29 + $0x18] sm:$0xff] }
 0x1dc   : > { %1498 = vmatprep.mubr.bf16.mxu1 %v11101_v0  ;;  %v9993_v2 = vld [vmem:[#allocation10] ss:$8 sps:$4 sm:$0xff]   ;;  %1152 = vmatprep.subr.bf16.mxu0 %v9991_v1  ;;  %v9994_v3 = vld [vmem:[#allocation10 + $0x14] ss:$8 sps:$4 sm:$0xff]   ;;  %v9996_v4 = vld [vmem:[#allocation10 + $0x10] ss:$8 sps:$4 sm:$0xff]  }
 0x1dd   : > { %1153 = vmatpush1.bf16.msra.mxu0 %v9993_v2  ;;  %v9997_v5 = vld [vmem:[#allocation10 + $0x24] ss:$8 sps:$4 sm:$0xff]   ;;  %v9999_v6 = vld [vmem:[#allocation10 + $0x20] ss:$8 sps:$4 sm:$0xff]   ;;  %v10000_v7 = vld [vmem:[#allocation10 + $0x34] ss:$8 sps:$4 sm:$0xff]  }
 0x1de   : > { %1154 = vmatprep.subr.bf16.mxu0 %v9994_v3  ;;  %v10002_v8 = vld [vmem:[#allocation10 + $0x30] ss:$8 sps:$4 sm:$0xff]   ;;  %v10003_v9 = vld [vmem:[#allocation10 + $0x44] ss:$8 sps:$4 sm:$0xff]   ;;  %v10005_v10 = vld [vmem:[#allocation10 + $0x40] ss:$8 sps:$4 sm:$0xff]  }
 0x1df   : > { %v10006_v11 = vld [vmem:[#allocation10 + $0x54] ss:$8 sps:$4 sm:$0xff]   ;;  %v10008_v12 = vld [vmem:[#allocation10 + $0x50] ss:$8 sps:$4 sm:$0xff]   ;;  %v10009_v13 = vld [vmem:[#allocation10 + $0x64] ss:$8 sps:$4 sm:$0xff]  }
 0x1e0   : > { %v859_v14 = vld [vmem:[%s11689_s29 + $0x8] sm:$0xff]  ;;  %v10012_v18 = vld [vmem:[#allocation10 + $0x74] ss:$8 sps:$4 sm:$0xff]   ;;  %v10014_v19 = vld [vmem:[#allocation10 + $0x70] ss:$8 sps:$4 sm:$0xff]   ;;  %v11102_v63 = vmov 0.0  }
 0x1e1   : > { %1155 = vmatpush1.bf16.msra.mxu0 %v9996_v4  ;;  %v981_v16 = vpack.c.bf16 %v861_v15, %v859_v14  ;;  %v10011_v17 = vld [vmem:[#allocation10 + $0x60] ss:$8 sps:$4 sm:$0xff]   ;;  %v10015_v20 = vld [vmem:[#allocation10 + $0x84] ss:$8 sps:$4 sm:$0xff]   ;;  %v10018_v22 = vld [vmem:[#allocation10 + $0x94] ss:$8 sps:$4 sm:$0xff]  }
 0x1e2   : > { %1156 = vmatprep.subr.bf16.mxu0 %v9997_v5  ;;  %v10017_v21 = vld [vmem:[#allocation10 + $0x80] ss:$8 sps:$4 sm:$0xff]   ;;  %v10020_v23 = vld [vmem:[#allocation10 + $0x90] ss:$8 sps:$4 sm:$0xff]   ;;  %v10021_v24 = vld [vmem:[#allocation10 + $0xa4] ss:$8 sps:$4 sm:$0xff]  }
 0x1e3   : > { %1184 = vmatprep.mubr.bf16.mxu0 %v981_v16  ;;  %v10023_v25 = vld [vmem:[#allocation10 + $0xa0] ss:$8 sps:$4 sm:$0xff]   ;;  %v10024_v26 = vld [vmem:[#allocation10 + $0xb4] ss:$8 sps:$4 sm:$0xff]   ;;  %v10026_v27 = vld [vmem:[#allocation10 + $0xb0] ss:$8 sps:$4 sm:$0xff]  }
 0x1e4   : > { %v10027_v28 = vld [vmem:[#allocation10 + $0xc4] ss:$8 sps:$4 sm:$0xff]   ;;  %v10029_v29 = vld [vmem:[#allocation10 + $0xc0] ss:$8 sps:$4 sm:$0xff]   ;;  %v10030_v30 = vld [vmem:[#allocation10 + $0xd4] ss:$8 sps:$4 sm:$0xff]  }
 0x1e5   : > { %1157 = vmatpush1.bf16.msra.mxu0 %v9999_v6  ;;  %v10032_v31 = vld [vmem:[#allocation10 + $0xd0] ss:$8 sps:$4 sm:$0xff]   ;;  %v10033_v32 = vld [vmem:[#allocation10 + $0xe4] ss:$8 sps:$4 sm:$0xff]   ;;  %v10035_v33 = vld [vmem:[#allocation10 + $0xe0] ss:$8 sps:$4 sm:$0xff]  }
 0x1e6   : > { %1158 = vmatprep.subr.bf16.mxu0 %v10000_v7  ;;  %v10036_v34 = vld [vmem:[#allocation10 + $0xf4] ss:$8 sps:$4 sm:$0xff]   ;;  %v10038_v35 = vld [vmem:[#allocation10 + $0xf0] ss:$8 sps:$4 sm:$0xff]   ;;  %v858_v36 = vld [vmem:[%s11689_s29] sm:$0xff]  ;;  %vm11103_vm0 = vmmov 0  }
 0x1e7   : > { %v860_v37 = vld [vmem:[%s11689_s29 + $0x10] sm:$0xff]  ;;  %v10041_v38 = vld [vmem:[#allocation11 + $0x4] ss:$8 sps:$4 sm:$0xff]   ;;  %v865_v40 = vld [vmem:[%s11689_s29 + $0x38] sm:$0xff]  ;;  %s13053_s26 = sld [smem:[#allocation56_spill]]  ;;  %vm3087_vm1 = vcmask 130048  }
 0x1e8   : > { %v863_v39 = vld [vmem:[%s11689_s29 + $0x28] sm:$0xff]  ;;  %v980_v42 = vpack.c.bf16 %v860_v37, %v858_v36  ;;  %v10044_v43 = vld [vmem:[#allocation11 + $0x14] ss:$8 sps:$4 sm:$0xff]   ;;  %v10042_v45 = vld [vmem:[#allocation11 + $0x10] ss:$8 sps:$4 sm:$0xff]   ;;  %s9093_s3 = sshll.u32 %s11220_s0, 1 }
 0x1e9   : > { %1159 = vmatpush1.bf16.msra.mxu0 %v10002_v8  ;;  %v10039_v41 = vld [vmem:[#allocation11] ss:$8 sps:$4 sm:$0xff]   ;;  %v983_v44 = vpack.c.bf16 %v865_v40, %v863_v39  ;;  %v864_v47 = vld [vmem:[%s11689_s29 + $0x30] sm:$0xff]  ;;  %v10047_v48 = vld [vmem:[#allocation11 + $0x24] ss:$8 sps:$4 sm:$0xff]   ;;  %p852_p3 = scmp.lt.s32.totalorder %s9093_s3, 3 }
 0x1ea   : > { %1160 = vmatprep.subr.bf16.mxu0 %v10003_v9  ;;  %v862_v46 = vld [vmem:[%s11689_s29 + $0x20] sm:$0xff]  ;;  %v10050_v50 = vld [vmem:[#allocation11 + $0x34] ss:$8 sps:$4 sm:$0xff]   ;;  %v10048_v52 = vld [vmem:[#allocation11 + $0x30] ss:$8 sps:$4 sm:$0xff]   ;;  %s13056_s6 = sld [smem:[#allocation57_spill]] }
 0x1eb   : > { %v10045_v49 = vld [vmem:[#allocation11 + $0x20] ss:$8 sps:$4 sm:$0xff]   ;;  %v982_v51 = vpack.c.bf16 %v864_v47, %v862_v46  ;;  %v10053_v53 = vld [vmem:[#allocation11 + $0x44] ss:$8 sps:$4 sm:$0xff]   ;;  %v10056_v55 = vld [vmem:[#allocation11 + $0x54] ss:$8 sps:$4 sm:$0xff]  }
 0x1ec   : > { %v10051_v54 = vld [vmem:[#allocation11 + $0x40] ss:$8 sps:$4 sm:$0xff]   ;;  %v10054_v56 = vld [vmem:[#allocation11 + $0x50] ss:$8 sps:$4 sm:$0xff]   ;;  %v10059_v57 = vld [vmem:[#allocation11 + $0x64] ss:$8 sps:$4 sm:$0xff]  }
 0x1ed   : > { %1161 = vmatpush1.bf16.msra.mxu0 %v10005_v10  ;;  %v10057_v58 = vld [vmem:[#allocation11 + $0x60] ss:$8 sps:$4 sm:$0xff]   ;;  %v10062_v59 = vld [vmem:[#allocation11 + $0x74] ss:$8 sps:$4 sm:$0xff]   ;;  %v10060_v60 = vld [vmem:[#allocation11 + $0x70] ss:$8 sps:$4 sm:$0xff]   ;;  %s13054_s1 = smov %s13053_s26 }
 0x1ee   : > { %1162 = vmatprep.subr.bf16.mxu0 %v10006_v11  ;;  %v10063_v61 = vld [vmem:[%s719_s24] sm:$0xff]   ;;  %v10064_v62 = vld [vmem:[%s719_s24 + $0x8] sm:$0xff]   ;;  %s13070_s3 = smov (!%p852_p3, %s9093_s3), 3  ;;  %s13055_s24 = sld [smem:[#allocation47_spill]] }
 0x1ef   : > { %v10065_v1 = vld [vmem:[#allocation13 + $0x4] ss:$8 sps:$4 sm:$0xff]   ;;  %v10067_v2 = vld [vmem:[#allocation13] ss:$8 sps:$4 sm:$0xff]   ;;  %v10068_v3 = vld [vmem:[#allocation13 + $0x14] ss:$8 sps:$4 sm:$0xff]  }
 0x1f0   : > { %1466 = vmatprep.subr.bf16.mxu1 %v10065_v1  ;;  %v10070_v4 = vld [vmem:[#allocation13 + $0x10] ss:$8 sps:$4 sm:$0xff]   ;;  %v10071_v5 = vld [vmem:[#allocation13 + $0x24] ss:$8 sps:$4 sm:$0xff]   ;;  %v10073_v6 = vld [vmem:[#allocation13 + $0x20] ss:$8 sps:$4 sm:$0xff]  }
 0x1f1   : > { %1163 = vmatpush1.bf16.msra.mxu0 %v10008_v12  ;;  %1467 = vmatpush1.bf16.msra.mxu1 %v10067_v2  ;;  %v10074_v7 = vld [vmem:[#allocation13 + $0x34] ss:$8 sps:$4 sm:$0xff]   ;;  %v10076_v8 = vld [vmem:[#allocation13 + $0x30] ss:$8 sps:$4 sm:$0xff]   ;;  %v10077_v9 = vld [vmem:[#allocation13 + $0x44] ss:$8 sps:$4 sm:$0xff]  }
 0x1f2   : > { %1164 = vmatprep.subr.bf16.mxu0 %v10009_v13  ;;  %1468 = vmatprep.subr.bf16.mxu1 %v10068_v3  ;;  %v10079_v10 = vld [vmem:[#allocation13 + $0x40] ss:$8 sps:$4 sm:$0xff]   ;;  %v10080_v11 = vld [vmem:[#allocation13 + $0x54] ss:$8 sps:$4 sm:$0xff]   ;;  %v10082_v12 = vld [vmem:[#allocation13 + $0x50] ss:$8 sps:$4 sm:$0xff]  }
 0x1f3   : > { %v10083_v13 = vld [vmem:[#allocation13 + $0x64] ss:$8 sps:$4 sm:$0xff]   ;;  %v10085_v14 = vld [vmem:[#allocation13 + $0x60] ss:$8 sps:$4 sm:$0xff]   ;;  %v10086_v15 = vld [vmem:[#allocation13 + $0x74] ss:$8 sps:$4 sm:$0xff]  }
 0x1f4   : > { %v10088_v16 = vld [vmem:[#allocation13 + $0x70] ss:$8 sps:$4 sm:$0xff]   ;;  %s846_s16 = scalar_lea.vmem [#allocation25], %s9078_s9  ;;  %s9621_s12 = sshll.u32 %s11220_s0, 10 }
 0x1f5   : > { %1165 = vmatpush1.bf16.msra.mxu0 %v10011_v17  ;;  %1469 = vmatpush1.bf16.msra.mxu1 %v10070_v4  ;;  %v10089_v17 = vld [vmem:[%s728_s17] sm:$0xff]   ;;  %s8805_s11 = sshll.u32 %s846_s16, 4  ;;  %s13058_s18 = sld [smem:[#allocation58_spill]]  ;;  %s12887_s11 = int_to_ptr.vmem [resolvable:$true] %s8805_s11 }
 0x1f6   : > { %1166 = vmatprep.subr.bf16.mxu0 %v10012_v18  ;;  %1470 = vmatprep.subr.bf16.mxu1 %v10071_v5  ;;  %v10090_v18 = vld [vmem:[%s728_s17 + $0x8] sm:$0xff]   ;;  %s854_s17 = scalar_lea.vmem %s13055_s24, %s13070_s3  ;;  %s8791_s0 = scalar_lea.sflag [#allocation4], %s11683_s7 }
 0x1f7   : > { %s10979_s24 = scalar_lea.vmem %s12887_s11, 1024 }
 0x1f8   : > { %p10980_p5 = scmp.ne.s32.totalorder %s12887_s11, %s10979_s24 }
 0x1f9   : > { %1167 = vmatpush1.bf16.msra.mxu0 %v10014_v19  ;;  %1471 = vmatpush1.bf16.msra.mxu1 %v10073_v6  ;;  %v984_v19 = vlaneseq }
 0x1fa   : > { %1168 = vmatprep.subr.bf16.mxu0 %v10015_v20  ;;  %1472 = vmatprep.subr.bf16.mxu1 %v10074_v7 }
 0x1fb   : > { %v11760_v20 = vshrl.u32 %v984_v19, 7  ;;  %s12885_s23 = scalar_lea.hbm %s13058_s18, %s9621_s12 }
 0x1fd   : > { %1169 = vmatpush1.bf16.msra.mxu0 %v10017_v21  ;;  %1473 = vmatpush1.bf16.msra.mxu1 %v10076_v8  ;;  %v11763_v21 = vsub.s32 0, %v11760_v20 }
 0x1fe   : > { %1170 = vmatprep.subr.bf16.mxu0 %v10018_v22  ;;  %1474 = vmatprep.subr.bf16.mxu1 %v10077_v9  ;;  %v11104_v22 = vmov 1983009808  }
 0x201   : > { %1171 = vmatpush1.bf16.msra.mxu0 %v10020_v23  ;;  %1475 = vmatpush1.bf16.msra.mxu1 %v10079_v10  ;;  %v1521_v23 = vunpack.c.l.s4 %v11104_v22 }
 0x202   : > { %1172 = vmatprep.subr.bf16.mxu0 %v10021_v24  ;;  %1476 = vmatprep.subr.bf16.mxu1 %v10080_v11  ;;  %v11768_v24 = vld [vmem:[%s13053_s26] sm:$0xff] }
 0x205   : > { %1173 = vmatpush1.bf16.msra.mxu0 %v10023_v25  ;;  %1477 = vmatpush1.bf16.msra.mxu1 %v10082_v12  ;;  %v11773_v25 = vld [vmem:[%s13054_s1 + $0x8] sm:$0xff] }
 0x206   : > { %1174 = vmatprep.subr.bf16.mxu0 %v10024_v26  ;;  %1478 = vmatprep.subr.bf16.mxu1 %v10083_v13  ;;  %v11777_v26 = vrot.slane %v11768_v24, %v11763_v21 }
 0x209   : > { %1175 = vmatpush1.bf16.msra.mxu0 %v10026_v27  ;;  %1479 = vmatpush1.bf16.msra.mxu1 %v10085_v14  ;;  %v1522_v27 = vunpack.c.0.s8 %v1521_v23 }
 0x20a   : > { %1176 = vmatprep.subr.bf16.mxu0 %v10027_v28  ;;  %1480 = vmatprep.subr.bf16.mxu1 %v10086_v15  ;;  %v11781_v28 = vrot.slane %v11773_v25, %v11763_v21 }
 0x20d   : > { %1177 = vmatpush1.bf16.msra.mxu0 %v10029_v29  ;;  %1481 = vmatpush1.bf16.msra.mxu1 %v10088_v16  ;;  %v11105_v29 = vmov 1934713408  }
 0x20e   : > { %1178 = vmatprep.subr.bf16.mxu0 %v10030_v30  ;;  %9660 = vmatprep.subr.bf16.mxu1 %v11102_v63  ;;  %v1552_v30 = vunpack.c.l.s4 %v11105_v29 }
 0x210   : > { %1499 = vmatmul.mubr.bf16.vlgmr.msra.gmra.mrb[0].mxu1 %v10089_v17  ;;  %v1553_v36 = vunpack.c.0.s8 %v1552_v30 }
 0x211   : > { %1179 = vmatpush1.bf16.msra.mxu0 %v10032_v31  ;;  %1508 = vmatprep.mubr.bf16.mxu1 %v11101_v0 }
 0x212   : > { %1180 = vmatprep.subr.bf16.mxu0 %v10033_v32 }
 0x215   : > { %1181 = vmatpush1.bf16.msra.mxu0 %v10035_v33  ;;  %v11785_v33 = vsub.s32 %v1522_v27, %v11760_v20 }
 0x216   : > { %1182 = vmatprep.subr.bf16.mxu0 %v10036_v34 }
 0x218   : > { %1509 = vmatmul.mubr.bf16.gmra.mrb[4].mxu1 %v10090_v18 }
 0x219   : > { %1183 = vmatpush1.bf16.msra.mxu0 %v10038_v35  ;;  %9662 = vmatprep.mubr.msk.bf16.mxu1 %vm11103_vm0, %v11102_v63 }
 0x21a   : > { %1313 = vmatprep.subr.bf16.mxu0 %v10041_v38 }
 0x21c   : > { %1185 = vmatmul.mubr.bf16.vlgmr.msra.gmra.mrb[0].mxu0 %v980_v42 }
 0x21d   : > { %1314 = vmatpush1.bf16.msra.mxu0 %v10039_v41  ;;  %1194 = vmatprep.mubr.bf16.mxu0 %v983_v44 }
 0x21e   : > { %1315 = vmatprep.subr.bf16.mxu0 %v10044_v43 }
 0x221   : > { %1316 = vmatpush1.bf16.msra.mxu0 %v10042_v45 }
 0x222   : > { %1317 = vmatprep.subr.bf16.mxu0 %v10047_v48  ;;  %v11795_v48 = vsub.s32 %v1553_v36, %v11760_v20 }
 0x224   : > { %1195 = vmatmul.mubr.bf16.gmra.mrb[4].mxu0 %v982_v51 }
 0x225   : > { %1318 = vmatpush1.bf16.msra.mxu0 %v10045_v49  ;;  %1345 = vmatprep.mubr.bf16.mxu0 %v11101_v0 }
 0x226   : > { %1319 = vmatprep.subr.bf16.mxu0 %v10050_v50 }
 0x229   : > { %1320 = vmatpush1.bf16.msra.mxu0 %v10048_v52 }
 0x22a   : > { %1321 = vmatprep.subr.bf16.mxu0 %v10053_v53 }
 0x22d   : > { %1322 = vmatpush1.bf16.msra.mxu0 %v10051_v54 }
 0x22e   : > { %1323 = vmatprep.subr.bf16.mxu0 %v10056_v55 }
 0x231   : > { %1324 = vmatpush1.bf16.msra.mxu0 %v10054_v56 }
 0x232   : > { %1325 = vmatprep.subr.bf16.mxu0 %v10059_v57 }
 0x235   : > { %1326 = vmatpush1.bf16.msra.mxu0 %v10057_v58 }
 0x236   : > { %1327 = vmatprep.subr.bf16.mxu0 %v10062_v59 }
 0x239   : > { %1328 = vmatpush1.bf16.msra.mxu0 %v10060_v60 }
 0x23a   : > { %9654 = vmatprep.subr.bf16.mxu0 %v11102_v63 }
 0x23c   : > { %1346 = vmatmul.mubr.bf16.vlgmr.msra.gmra.mrb[8].mxu0 %v10063_v61 }
 0x23d   : > { %1355 = vmatprep.mubr.bf16.mxu0 %v11101_v0 }
 0x244   : > { %1356 = vmatmul.mubr.bf16.gmra.mrb[12].mxu0 %v10064_v62  ;;  %v11806_v62 = vsub.s32 1, %v11760_v20 }
 0x245   : > { %9656 = vmatprep.mubr.msk.bf16.mxu0 %vm11103_vm0, %v11102_v63 }
 0x2ef   : > { %v1186_v31 = vpop.f32.mrb[0].mxu0 }
 0x2f0   : > { %v1187_v32 = vadd.f32 %v1186_v31, %v11777_v26  ;;  %v1188_v34 = vpop.f32.mrb[1].mxu0 }
 0x2f1   : > { %v1189_v35 = vadd.f32 %v1188_v34, %v11781_v28  ;;  %v1190_v37 = vpop.f32.mrb[2].mxu0 }
 0x2f2   : > { %v1205_v38 = vmul.f32 0.088388346, %v1187_v32  ;;  %v1191_v39 = vadd.f32 %v1190_v37, %v11777_v26  ;;  %v1192_v40 = vpop.f32.mrb[3].mxu0 }
 0x2f3   : > { %v1206_v41 = vmul.f32 0.088388346, %v1189_v35  ;;  %v1193_v42 = vadd.f32 %v1192_v40, %v11781_v28 }
 0x2f4   : > { %v1519_v43 = vcombine.high %v1205_v38, %v11102_v63  ;;  %v1526_v44 = vrot.slane %v1205_v38, %v11785_v33  ;;  %v1207_v45 = vmul.f32 0.088388346, %v1191_v39 }
 0x2f5   : > { %v1534_v46 = vcombine.high %v1206_v41, %v11102_v63  ;;  %v1541_v47 = vrot.slane %v1206_v41, %v11785_v33  ;;  %v1208_v49 = vmul.f32 0.088388346, %v1193_v42 }
 0x2f6   : > { %v1533_v50 = vrot.slane %v1519_v43, %v11785_v33  ;;  %v1585_v51 = vcombine.high %v1207_v45, %v11102_v63  ;;  %v1592_v52 = vrot.slane %v1207_v45, %v11785_v33  ;;  %v11826_v43 = vrot.slane %v11768_v24, %v11806_v62 }
 0x2f7   : > { %v1548_v53 = vrot.slane %v1534_v46, %v11785_v33  ;;  %v1549_v54 = vcombine.low %v1526_v44, %v1541_v47  ;;  %v1550_v55 = vcombine.high %v1526_v44, %v1541_v47  ;;  %v1600_v56 = vcombine.high %v1208_v49, %v11102_v63  ;;  %v1196_v57 = vpop.f32.mrb[4].mxu0 }
 0x2f8   : > { %v1599_v58 = vrot.slane %v1585_v51, %v11785_v33  ;;  %v1607_v59 = vrot.slane %v1208_v49, %v11785_v33  ;;  %v1197_v60 = vadd.f32 %v1196_v57, %v11777_v26  ;;  %v1198_v61 = vpop.f32.mrb[5].mxu0  ;;  %v11830_v44 = vrot.slane %v11773_v25, %v11806_v62 }
 0x2f9   : > { %v1557_v1 = vrot.slane %v1549_v54, %v11795_v48  ;;  %v1564_v2 = vrot.slane %v1550_v55, %v11795_v48  ;;  %v1565_v3 = vcombine.low %v1533_v50, %v1548_v53  ;;  %v1566_v4 = vcombine.high %v1533_v50, %v1548_v53  ;;  %v1200_v5 = vpop.f32.mrb[6].mxu0 }
 0x2fa   : > { %v1614_v6 = vrot.slane %v1600_v56, %v11785_v33  ;;  %v1615_v7 = vcombine.low %v1592_v52, %v1607_v59  ;;  %v1616_v8 = vcombine.high %v1592_v52, %v1607_v59  ;;  %v1209_v9 = vmul.f32 0.088388346, %v1197_v60  ;;  %v1202_v10 = vpop.f32.mrb[7].mxu0 }
 0x2fb   : > { %v1573_v11 = vrot.slane %v1565_v3, %v11795_v48  ;;  %v1580_v12 = vrot.slane %v1566_v4, %v11795_v48  ;;  %v1783_v13 = vcombine.low %v1557_v1, %v1564_v2  ;;  %v9162_v14 = vcombine.high %v1557_v1, %v1564_v2 }
 0x2fc   : > { %v1623_v15 = vrot.slane %v1615_v7, %v11795_v48  ;;  %v1630_v16 = vrot.slane %v1616_v8, %v11795_v48  ;;  %v1631_v17 = vcombine.low %v1599_v58, %v1614_v6  ;;  %v1632_v18 = vcombine.high %v1599_v58, %v1614_v6 }
 0x2fd   : > { %v1790_v19 = vrot.slane %v1783_v13, %v11785_v33  ;;  %v1798_v22 = vrot.slane %v9162_v14, %v11785_v33  ;;  %v1799_v23 = vcombine.low %v1573_v11, %v1580_v12  ;;  %v9163_v27 = vcombine.high %v1573_v11, %v1580_v12 }
 0x2fe   : > { %v1639_v29 = vrot.slane %v1631_v17, %v11795_v48  ;;  %v1646_v30 = vrot.slane %v1632_v18, %v11795_v48  ;;  %v1833_v31 = vcombine.low %v1623_v15, %v1630_v16  ;;  %v9164_v32 = vcombine.high %v1623_v15, %v1630_v16 }
 0x2ff   : > { %v1806_v34 = vrot.slane %v1799_v23, %v11785_v33  ;;  %v1814_v35 = vrot.slane %v9163_v27, %v11785_v33  ;;  %v1815_v36 = vcombine.low %v1790_v19, %v1798_v22  ;;  %v1651_v37 = vcombine.high %v1209_v9, %v11102_v63 }
 0x300   : > { %v1840_v38 = vrot.slane %v1833_v31, %v11785_v33  ;;  %v1848_v39 = vrot.slane %v9164_v32, %v11785_v33  ;;  %v1849_v40 = vcombine.low %v1639_v29, %v1646_v30  ;;  %v9165_v41 = vcombine.high %v1639_v29, %v1646_v30 }
 0x301   : > { %v1823_v42 = vcombine.low %v1806_v34, %v1814_v35  ;;  %v1199_v49 = vadd.f32 %v1198_v61, %v11781_v28  ;;  %v11836_v50 = vrot.slane %v1815_v36, %v11795_v48  ;;  %v1201_v51 = vadd.f32 %v1200_v5, %v11777_v26 }
 0x302   : > { %v1856_v45 = vrot.slane %v1849_v40, %v11785_v33  ;;  %v1864_v46 = vrot.slane %v9165_v41, %v11785_v33  ;;  %v1865_v47 = vcombine.low %v1840_v38, %v1848_v39  ;;  %v1203_v52 = vadd.f32 %v1202_v10, %v11781_v28 }
 0x303   : > { %v11841_v53 = vrot.slane %v1823_v42, %v11795_v48  ;;  %v1658_v55 = vrot.slane %v1209_v9, %v11785_v33  ;;  %v1665_v56 = vrot.slane %v1651_v37, %v11785_v33  ;;  %v1210_v57 = vmul.f32 0.088388346, %v1199_v49 }
 0x304   : > { %v1873_v54 = vcombine.low %v1856_v45, %v1864_v46  ;;  %v1211_v58 = vmul.f32 0.088388346, %v1201_v51  ;;  %v1212_v59 = vmul.f32 0.088388346, %v1203_v52  ;;  %v11850_v26 = vrot.slane %v1865_v47, %v11795_v48 }
 0x305   : > { %v1831_v60 = vcombine.low %v11836_v50, %v11841_v53  ;;  %v1832_v61 = vcombine.high %v11836_v50, %v11841_v53  ;;  %v1666_v28 = vcombine.high %v1210_v57, %v11102_v63  ;;  %v1673_v1 = vrot.slane %v1210_v57, %v11785_v33  ;;  %v1500_v50 = vpop.f32.mrb[0].mxu1 }
 0x306   : > { %v11855_v2 = vrot.slane %v1873_v54, %v11795_v48  ;;  %v1717_v3 = vcombine.high %v1211_v58, %v11102_v63  ;;  %v1724_v4 = vrot.slane %v1211_v58, %v11785_v33  ;;  %v1732_v5 = vcombine.high %v1212_v59, %v11102_v63 }
 0x307   : > { %v1739_v6 = vrot.slane %v1212_v59, %v11785_v33  ;;  %v1680_v7 = vrot.slane %v1666_v28, %v11785_v33  ;;  %v1681_v8 = vcombine.low %v1658_v55, %v1673_v1  ;;  %v1682_v9 = vcombine.high %v1658_v55, %v1673_v1 }
 0x308   : > { %v1881_v10 = vcombine.low %v11850_v26, %v11855_v2  ;;  %v1731_v11 = vrot.slane %v1717_v3, %v11785_v33  ;;  %v1746_v12 = vrot.slane %v1732_v5, %v11785_v33  ;;  %v12007_v53 = vsub.s32 2, %v11760_v20 }
 0x309   : > { %v1747_v13 = vcombine.low %v1724_v4, %v1739_v6  ;;  %v1748_v14 = vcombine.high %v1724_v4, %v1739_v6  ;;  %v1689_v15 = vrot.slane %v1681_v8, %v11795_v48  ;;  %v1696_v16 = vrot.slane %v1682_v9, %v11795_v48 }
 0x30a   : > { %v1697_v17 = vcombine.low %v1665_v56, %v1680_v7  ;;  %v1698_v18 = vcombine.high %v1665_v56, %v1680_v7  ;;  %v1763_v23 = vcombine.low %v1731_v11, %v1746_v12  ;;  %v1764_v27 = vcombine.high %v1731_v11, %v1746_v12 }
 0x30b   : > { %v1755_v19 = vrot.slane %v1747_v13, %v11795_v48  ;;  %v1762_v22 = vrot.slane %v1748_v14, %v11795_v48  ;;  %v1883_v31 = vcombine.low %v1689_v15, %v1696_v16  ;;  %v9166_v32 = vcombine.high %v1689_v15, %v1696_v16 }
 0x30c   : > { %v1705_v29 = vrot.slane %v1697_v17, %v11795_v48  ;;  %v1712_v30 = vrot.slane %v1698_v18, %v11795_v48  ;;  %v1771_v34 = vrot.slane %v1763_v23, %v11795_v48  ;;  %v1778_v35 = vrot.slane %v1764_v27, %v11795_v48 }
 0x30d   : > { %v1933_v36 = vcombine.low %v1755_v19, %v1762_v22  ;;  %v9168_v37 = vcombine.high %v1755_v19, %v1762_v22  ;;  %v1890_v38 = vrot.slane %v1883_v31, %v11785_v33  ;;  %v1898_v39 = vrot.slane %v9166_v32, %v11785_v33 }
 0x30e   : > { %v1899_v40 = vcombine.low %v1705_v29, %v1712_v30  ;;  %v9167_v41 = vcombine.high %v1705_v29, %v1712_v30  ;;  %v1949_v46 = vcombine.low %v1771_v34, %v1778_v35  ;;  %v9169_v47 = vcombine.high %v1771_v34, %v1778_v35 }
 0x30f   : > { %v1940_v42 = vrot.slane %v1933_v36, %v11785_v33  ;;  %v1948_v45 = vrot.slane %v9168_v37, %v11785_v33  ;;  %v1347_v49 = vpop.f32.mrb[8].mxu0  ;;  %v1915_v54 = vcombine.low %v1890_v38, %v1898_v39  ;;  %v11906_v16 = vpack.c.bf16 %v1881_v10, %v1831_v60 }
 0x310   : > { %v1906_v51 = vrot.slane %v1899_v40, %v11785_v33  ;;  %v1914_v52 = vrot.slane %v9167_v41, %v11785_v33  ;;  %v1348_v55 = vadd.f32 %v1347_v49, %v11826_v43  ;;  %v1349_v56 = vpop.f32.mrb[9].mxu0  ;;  %v11882_v57 = vrot.slane %v1949_v46, %v11785_v33 }
 0x311   : > { %v11885_v58 = vrot.slane %v9169_v47, %v11785_v33  ;;  %v1965_v59 = vcombine.low %v1940_v42, %v1948_v45  ;;  %v1350_v28 = vadd.f32 %v1349_v56, %v11830_v44  ;;  %v1351_v1 = vpop.f32.mrb[10].mxu0  ;;  %v11889_v3 = vrot.slane %v1915_v54, %v11795_v48 }
 0x312   : > { %v1923_v4 = vcombine.low %v1906_v51, %v1914_v52  ;;  %v1987_v5 = vcombine.high %v1348_v55, %v11102_v63  ;;  %v1994_v6 = vrot.slane %v1348_v55, %v11785_v33  ;;  %v1353_v7 = vpop.f32.mrb[11].mxu0  ;;  %v1352_v14 = vadd.f32 %v1351_v1, %v11826_v43 }
 0x313   : > { %v11894_v8 = vrot.slane %v1965_v59, %v11795_v48  ;;  %v1973_v9 = vcombine.low %v11882_v57, %v11885_v58  ;;  %v2002_v11 = vcombine.high %v1350_v28, %v11102_v63  ;;  %v2009_v12 = vrot.slane %v1350_v28, %v11785_v33 }
 0x314   : > { %v2001_v13 = vrot.slane %v1987_v5, %v11785_v33  ;;  %v1354_v15 = vadd.f32 %v1353_v7, %v11830_v44  ;;  %v11910_v22 = vrot.slane %v1923_v4, %v11795_v48  ;;  %v2053_v23 = vcombine.high %v1352_v14, %v11102_v63 }
 0x315   : > { %v2016_v17 = vrot.slane %v2002_v11, %v11785_v33  ;;  %v2017_v18 = vcombine.low %v1994_v6, %v2009_v12  ;;  %v2018_v19 = vcombine.high %v1994_v6, %v2009_v12  ;;  %v2060_v27 = vrot.slane %v1352_v14, %v11785_v33 }
 0x316   : > { %v2068_v29 = vcombine.high %v1354_v15, %v11102_v63  ;;  %v2075_v30 = vrot.slane %v1354_v15, %v11785_v33  ;;  %v2067_v35 = vrot.slane %v2053_v23, %v11785_v33 }
 0x317   : > { %v2025_v31 = vrot.slane %v2017_v18, %v11795_v48  ;;  %v2032_v60 = vrot.slane %v2018_v19, %v11795_v48  ;;  %v2033_v10 = vcombine.low %v2001_v13, %v2016_v17  ;;  %v2034_v32 = vcombine.high %v2001_v13, %v2016_v17  ;;  %v1357_v34 = vpop.f32.mrb[12].mxu0 }
 0x318   : > { %v2082_v36 = vrot.slane %v2068_v29, %v11785_v33  ;;  %v2083_v37 = vcombine.low %v2060_v27, %v2075_v30  ;;  %v2084_v38 = vcombine.high %v2060_v27, %v2075_v30  ;;  %v1359_v39 = vpop.f32.mrb[13].mxu0  ;;  %v1358_v13 = vadd.f32 %v1357_v34, %v11826_v43 }
 0x319   : > { %v2041_v40 = vrot.slane %v2033_v10, %v11795_v48  ;;  %v2048_v41 = vrot.slane %v2034_v32, %v11795_v48  ;;  %v2251_v42 = vcombine.low %v2025_v31, %v2032_v60  ;;  %v9170_v45 = vcombine.high %v2025_v31, %v2032_v60  ;;  %v1361_v46 = vpop.f32.mrb[14].mxu0 }
 0x31a   : > { %v2091_v47 = vrot.slane %v2083_v37, %v11795_v48  ;;  %v2098_v49 = vrot.slane %v2084_v38, %v11795_v48  ;;  %v2099_v51 = vcombine.low %v2067_v35, %v2082_v36  ;;  %v2100_v52 = vcombine.high %v2067_v35, %v2082_v36  ;;  %v1363_v54 = vpop.f32.mrb[15].mxu0 }
 0x31b   : > { %v2258_v55 = vrot.slane %v2251_v42, %v11785_v33  ;;  %v2266_v56 = vrot.slane %v9170_v45, %v11785_v33  ;;  %v2267_v59 = vcombine.low %v2041_v40, %v2048_v41  ;;  %v9171_v28 = vcombine.high %v2041_v40, %v2048_v41 }
 0x31c   : > { %v2107_v1 = vrot.slane %v2099_v51, %v11795_v48  ;;  %v2114_v4 = vrot.slane %v2100_v52, %v11795_v48  ;;  %v2301_v5 = vcombine.low %v2091_v47, %v2098_v49  ;;  %v9172_v6 = vcombine.high %v2091_v47, %v2098_v49 }
 0x31d   : > { %v2274_v7 = vrot.slane %v2267_v59, %v11785_v33  ;;  %v2282_v11 = vrot.slane %v9171_v28, %v11785_v33  ;;  %v2283_v12 = vcombine.low %v2258_v55, %v2266_v56  ;;  %v2119_v19 = vcombine.high %v1358_v13, %v11102_v63 }
 0x31e   : > { %v2308_v14 = vrot.slane %v2301_v5, %v11785_v33  ;;  %v2316_v15 = vrot.slane %v9172_v6, %v11785_v33  ;;  %v2317_v17 = vcombine.low %v2107_v1, %v2114_v4  ;;  %v9173_v18 = vcombine.high %v2107_v1, %v2114_v4 }
 0x31f   : > { %v2126_v23 = vrot.slane %v1358_v13, %v11785_v33  ;;  %v1360_v27 = vadd.f32 %v1359_v39, %v11830_v44  ;;  %v1362_v29 = vadd.f32 %v1361_v46, %v11826_v43  ;;  %v1364_v10 = vadd.f32 %v1363_v54, %v11830_v44 }
 0x320   : > { %v2324_v30 = vrot.slane %v2317_v17, %v11785_v33  ;;  %v2332_v31 = vrot.slane %v9173_v18, %v11785_v33  ;;  %v2333_v60 = vcombine.low %v2308_v14, %v2316_v15  ;;  %v2133_v32 = vrot.slane %v2119_v19, %v11785_v33 }
 0x321   : > { %v2134_v34 = vcombine.high %v1360_v27, %v11102_v63  ;;  %v2141_v35 = vrot.slane %v1360_v27, %v11785_v33  ;;  %v2185_v36 = vcombine.high %v1362_v29, %v11102_v63  ;;  %v2192_v37 = vrot.slane %v1362_v29, %v11785_v33 }
 0x322   : > { %v2200_v38 = vcombine.high %v1364_v10, %v11102_v63  ;;  %v2207_v43 = vrot.slane %v1364_v10, %v11785_v33  ;;  %v11948_v39 = vrot.slane %v2283_v12, %v11795_v48  ;;  %v2291_v49 = vcombine.low %v2274_v7, %v2282_v11 }
 0x323   : > { %v2148_v40 = vrot.slane %v2134_v34, %v11785_v33  ;;  %v2149_v44 = vcombine.low %v2126_v23, %v2141_v35  ;;  %v2150_v41 = vcombine.high %v2126_v23, %v2141_v35  ;;  %v2199_v42 = vrot.slane %v2185_v36, %v11785_v33 }
 0x324   : > { %v2214_v45 = vrot.slane %v2200_v38, %v11785_v33  ;;  %v2215_v46 = vcombine.low %v2192_v37, %v2207_v43  ;;  %v2216_v47 = vcombine.high %v2192_v37, %v2207_v43  ;;  %v2298_v36 = vrot.slane %v2291_v49, %v11795_v48 }
 0x325   : > { %v2157_v51 = vrot.slane %v2149_v44, %v11795_v48  ;;  %v2164_v52 = vrot.slane %v2150_v41, %v11795_v48  ;;  %v2165_v54 = vcombine.low %v2133_v32, %v2148_v40  ;;  %v2166_v55 = vcombine.high %v2133_v32, %v2148_v40 }
 0x326   : > { %v2223_v56 = vrot.slane %v2215_v46, %v11795_v48  ;;  %v2230_v59 = vrot.slane %v2216_v47, %v11795_v48  ;;  %v2231_v28 = vcombine.low %v2199_v42, %v2214_v45  ;;  %v2232_v1 = vcombine.high %v2199_v42, %v2214_v45 }
 0x327   : > { %v2173_v4 = vrot.slane %v2165_v54, %v11795_v48  ;;  %v2180_v5 = vrot.slane %v2166_v55, %v11795_v48  ;;  %v2351_v6 = vcombine.low %v2157_v51, %v2164_v52  ;;  %v9174_v12 = vcombine.high %v2157_v51, %v2164_v52 }
 0x328   : > { %v2239_v7 = vrot.slane %v2231_v28, %v11795_v48  ;;  %v2246_v11 = vrot.slane %v2232_v1, %v11795_v48  ;;  %v2401_v13 = vcombine.low %v2223_v56, %v2230_v59  ;;  %v9176_v14 = vcombine.high %v2223_v56, %v2230_v59 }
 0x329   : > { %v2358_v15 = vrot.slane %v2351_v6, %v11785_v33  ;;  %v2366_v17 = vrot.slane %v9174_v12, %v11785_v33  ;;  %v2367_v18 = vcombine.low %v2173_v4, %v2180_v5  ;;  %v9175_v19 = vcombine.high %v2173_v4, %v2180_v5 }
 0x32a   : > { %v2408_v23 = vrot.slane %v2401_v13, %v11785_v33  ;;  %v2416_v27 = vrot.slane %v9176_v14, %v11785_v33  ;;  %v2417_v29 = vcombine.low %v2239_v7, %v2246_v11  ;;  %v9177_v10 = vcombine.high %v2239_v7, %v2246_v11  ;;  %v1502_v7 = vpop.f32.mrb[1].mxu1 }
 0x32b   : > { %v2374_v32 = vrot.slane %v2367_v18, %v11785_v33  ;;  %v2382_v34 = vrot.slane %v9175_v19, %v11785_v33  ;;  %v2383_v35 = vcombine.low %v2358_v15, %v2366_v17  ;;  %v2340_v40 = vrot.slane %v2333_v60, %v11795_v48  ;;  %v1504_v11 = vpop.f32.mrb[2].mxu1 }
 0x32c   : > { %v2424_v37 = vrot.slane %v2417_v29, %v11785_v33  ;;  %v2432_v38 = vrot.slane %v9177_v10, %v11785_v33  ;;  %v2433_v43 = vcombine.low %v2408_v23, %v2416_v27  ;;  %v2299_v44 = vcombine.low %v11948_v39, %v2298_v36  ;;  %v1506_v17 = vpop.f32.mrb[3].mxu1 }
 0x32d   : > { %v2341_v41 = vcombine.low %v2324_v30, %v2332_v31  ;;  %v2390_v42 = vrot.slane %v2383_v35, %v11795_v48  ;;  %v2391_v45 = vcombine.low %v2374_v32, %v2382_v34  ;;  %v2300_v51 = vcombine.high %v11948_v39, %v2298_v36  ;;  %v1510_v19 = vpop.f32.mrb[4].mxu1 }
 0x32e   : > { %v2440_v46 = vrot.slane %v2433_v43, %v11795_v48  ;;  %v2441_v47 = vcombine.low %v2424_v37, %v2432_v38  ;;  %v1931_v49 = vcombine.low %v11889_v3, %v11910_v22  ;;  %v1980_v30 = vrot.slane %v1973_v9, %v11795_v48  ;;  %v1512_v10 = vpop.f32.mrb[5].mxu1 }
 0x32f   : > { %v2348_v52 = vrot.slane %v2341_v41, %v11795_v48  ;;  %v2398_v54 = vrot.slane %v2391_v45, %v11795_v48  ;;  %v1882_v31 = vcombine.high %v11850_v26, %v11855_v2  ;;  %v1932_v39 = vcombine.high %v11889_v3, %v11910_v22  ;;  %v1514_v37 = vpop.f32.mrb[6].mxu1 }
 0x330   : > { %v2448_v60 = vrot.slane %v2441_v47, %v11795_v48  ;;  %v1981_v28 = vcombine.low %v11894_v8, %v1980_v30  ;;  %v1982_v2 = vcombine.high %v11894_v8, %v1980_v30  ;;  %v12017_v22 = vrot.slane %v11773_v25, %v12007_v53  ;;  %v1516_v41 = vpop.f32.mrb[7].mxu1 }
 0x331   : > { %v2349_v55 = vcombine.low %v2340_v40, %v2348_v52  ;;  %v2399_v56 = vcombine.low %v2390_v42, %v2398_v54  ;;  %v2350_v59 = vcombine.high %v2340_v40, %v2348_v52  ;;  %v1985_v4 = vpack.c.bf16 %v1882_v31, %v1832_v61 }
 0x332   : > { %v2449_v1 = vcombine.low %v2440_v46, %v2448_v60  ;;  %v2400_v57 = vcombine.high %v2390_v42, %v2398_v54  ;;  %v2450_v58 = vcombine.high %v2440_v46, %v2448_v60  ;;  %v1984_v26 = vpack.c.bf16 %v1981_v28, %v1931_v49 }
 0x333   : > { %v2451_v9 = vpack.c.bf16 %v2349_v55, %v2299_v44  ;;  %v2453_v5 = vpack.c.bf16 %v2350_v59, %v2300_v51  ;;  %v1986_v3 = vpack.c.bf16 %v1982_v2, %v1932_v39  ;;  %v12011_v61 = vrot.slane %v11768_v24, %v12007_v53 }
 0x334   : > { %v2452_v6 = vpack.c.bf16 %v2449_v1, %v2399_v56  ;;  %v2454_v12 = vpack.c.bf16 %v2450_v58, %v2400_v57  ;;  %v1503_v14 = vadd.f32 %v1502_v7, %v12017_v22  ;;  %v1507_v18 = vadd.f32 %v1506_v17, %v12017_v22 }
 0x335   : > { %9655 = vmatpush3.bf16.xpose.msra.mxu0 %v2451_v9  ;;  %v1501_v8 = vadd.f32 %v1500_v50, %v12011_v61  ;;  %v1505_v15 = vadd.f32 %v1504_v11, %v12011_v61  ;;  %v1511_v35 = vadd.f32 %v1510_v19, %v12011_v61  ;;  %v1513_v36 = vadd.f32 %v1512_v10, %v12017_v22 }
 0x336   : > { %9666 = vmatprep.subr.bf16.mxu0 %v11102_v63  ;;  %9661 = vmatpush3.bf16.xpose.msra.mxu1 %v2452_v6  ;;  %v2470_v23 = vcombine.high %v1503_v14, %v11102_v63  ;;  %v2477_v27 = vrot.slane %v1503_v14, %v11785_v33  ;;  %v2536_v32 = vcombine.high %v1507_v18, %v11102_v63 }
 0x337   : > { %9672 = vmatprep.subr.bf16.mxu1 %v11102_v63  ;;  %v2462_v13 = vrot.slane %v1501_v8, %v11785_v33  ;;  %v2521_v25 = vcombine.high %v1505_v15, %v11102_v63  ;;  %v2528_v29 = vrot.slane %v1505_v15, %v11785_v33  ;;  %v2543_v34 = vrot.slane %v1507_v18, %v11785_v33 }
 0x338   : > { %v2484_v38 = vrot.slane %v2470_v23, %v11785_v33  ;;  %v2550_v42 = vrot.slane %v2536_v32, %v11785_v33  ;;  %v2587_v47 = vcombine.high %v1511_v35, %v11102_v63  ;;  %v2594_v11 = vrot.slane %v1511_v35, %v11785_v33 }
 0x339   : > { %v2485_v43 = vcombine.low %v2462_v13, %v2477_v27  ;;  %v2486_v40 = vcombine.high %v2462_v13, %v2477_v27  ;;  %v2535_v44 = vrot.slane %v2521_v25, %v11785_v33  ;;  %v2551_v45 = vcombine.low %v2528_v29, %v2543_v34 }
 0x33a   : > { %v2552_v46 = vcombine.high %v2528_v29, %v2543_v34  ;;  %v2601_v17 = vrot.slane %v2587_v47, %v11785_v33  ;;  %v2609_v18 = vrot.slane %v1513_v36, %v11785_v33  ;;  %v1515_v19 = vadd.f32 %v1514_v37, %v12011_v61 }
 0x33b   : > { %v2493_v51 = vrot.slane %v2485_v43, %v11795_v48  ;;  %v2500_v49 = vrot.slane %v2486_v40, %v11795_v48  ;;  %v2559_v30 = vrot.slane %v2551_v45, %v11795_v48  ;;  %v2567_v60 = vcombine.low %v2535_v44, %v2550_v42 }
 0x33c   : > { %9657 = vmatmul.mubr.bf16.vlgmr.msra.gmra.mrb[16].mxu0 %v11906_v16  ;;  %v2455_v16 = vcombine.high %v1501_v8, %v11102_v63  ;;  %v2566_v31 = vrot.slane %v2552_v46, %v11795_v48  ;;  %v2568_v39 = vcombine.high %v2535_v44, %v2550_v42  ;;  %v1517_v23 = vadd.f32 %v1516_v41, %v12017_v22 }
 0x33d   : > { %9667 = vmatpush3.bf16.xpose.msra.mxu0 %v2453_v5  ;;  %9668 = vmatprep.mubr.msk.bf16.mxu0 %vm11103_vm0, %v11102_v63  ;;  %v2719_v59 = vcombine.low %v2493_v51, %v2500_v49  ;;  %v9178_v28 = vcombine.high %v2493_v51, %v2500_v49  ;;  %v2575_v1 = vrot.slane %v2567_v60, %v11795_v48 }
 0x33e   : > { %9663 = vmatmul.mubr.bf16.vlgmr.msra.gmra.mrb[8].mxu1 %v1984_v26  ;;  %9678 = vmatprep.subr.bf16.mxu0 %v11102_v63  ;;  %v2469_v24 = vrot.slane %v2455_v16, %v11785_v33  ;;  %v2769_v57 = vcombine.low %v2559_v30, %v2566_v31  ;;  %v9180_v58 = vcombine.high %v2559_v30, %v2566_v31 }
 0x33f   : > { %9673 = vmatpush3.bf16.xpose.msra.mxu1 %v2454_v12  ;;  %9674 = vmatprep.mubr.msk.bf16.mxu1 %vm11103_vm0, %v11102_v63  ;;  %v2726_v9 = vrot.slane %v2719_v59, %v11785_v33  ;;  %v2734_v5 = vrot.slane %v9178_v28, %v11785_v33  ;;  %v2617_v34 = vcombine.low %v2594_v11, %v2609_v18 }
 0x340   : > { %9684 = vmatprep.subr.bf16.mxu1 %v11102_v63  ;;  %v2501_v52 = vcombine.low %v2469_v24, %v2484_v38  ;;  %v2502_v54 = vcombine.high %v2469_v24, %v2484_v38  ;;  %v2776_v6 = vrot.slane %v2769_v57, %v11785_v33  ;;  %v2784_v12 = vrot.slane %v9180_v58, %v11785_v33 }
 0x341   : > { %v2751_v7 = vcombine.low %v2726_v9, %v2734_v5  ;;  %v2602_v24 = vcombine.high %v1513_v36, %v11102_v63  ;;  %v2618_v35 = vcombine.high %v2594_v11, %v2609_v18  ;;  %v2653_v38 = vcombine.high %v1515_v19, %v11102_v63 }
 0x342   : > { %v2509_v55 = vrot.slane %v2501_v52, %v11795_v48  ;;  %v2516_v56 = vrot.slane %v2502_v54, %v11795_v48  ;;  %v2801_v15 = vcombine.low %v2776_v6, %v2784_v12  ;;  %v2660_v36 = vrot.slane %v1515_v19, %v11785_v33 }
 0x343   : > { %v12059_v27 = vrot.slane %v2751_v7, %v11795_v48  ;;  %v2616_v32 = vrot.slane %v2602_v24, %v11785_v33  ;;  %v2668_v61 = vcombine.high %v1517_v23, %v11102_v63  ;;  %v2675_v22 = vrot.slane %v1517_v23, %v11785_v33 }
 0x344   : > { %9669 = vmatmul.mubr.bf16.vlgmr.msra.gmra.mrb[20].mxu0 %v1985_v4  ;;  %v2582_v4 = vrot.slane %v2568_v39, %v11795_v48  ;;  %v2735_v26 = vcombine.low %v2509_v55, %v2516_v56  ;;  %v9179_v2 = vcombine.high %v2509_v55, %v2516_v56  ;;  %v12062_v29 = vrot.slane %v2801_v15, %v11795_v48 }
 0x345   : > { %9680 = vmatprep.mubr.msk.bf16.mxu0 %vm11103_vm0, %v11102_v63  ;;  %v2625_v43 = vrot.slane %v2617_v34, %v11795_v48  ;;  %v2632_v40 = vrot.slane %v2618_v35, %v11795_v48  ;;  %v2633_v44 = vcombine.low %v2601_v17, %v2616_v32  ;;  %v2634_v41 = vcombine.high %v2601_v17, %v2616_v32 }
 0x346   : > { %9675 = vmatmul.mubr.bf16.vlgmr.msra.gmra.mrb[12].mxu1 %v1986_v3  ;;  %v2785_v3 = vcombine.low %v2575_v1, %v2582_v4  ;;  %v9181_v50 = vcombine.high %v2575_v1, %v2582_v4  ;;  %v2742_v8 = vrot.slane %v2735_v26, %v11785_v33  ;;  %v2750_v16 = vrot.slane %v9179_v2, %v11785_v33 }
 0x347   : > { %9686 = vmatprep.mubr.msk.bf16.mxu1 %vm11103_vm0, %v11102_v63  ;;  %v2667_v42 = vrot.slane %v2653_v38, %v11785_v33  ;;  %v2682_v45 = vrot.slane %v2668_v61, %v11785_v33  ;;  %v2683_v46 = vcombine.low %v2660_v36, %v2675_v22  ;;  %v2684_v47 = vcombine.high %v2660_v36, %v2675_v22 }
 0x348   : > { %v2792_v13 = vrot.slane %v2785_v3, %v11785_v33  ;;  %v2800_v14 = vrot.slane %v9181_v50, %v11785_v33  ;;  %v2759_v25 = vcombine.low %v2742_v8, %v2750_v16  ;;  %v2641_v51 = vrot.slane %v2633_v44, %v11795_v48 }
 0x349   : > { %v2648_v49 = vrot.slane %v2634_v41, %v11795_v48  ;;  %v2819_v52 = vcombine.low %v2625_v43, %v2632_v40  ;;  %v9182_v54 = vcombine.high %v2625_v43, %v2632_v40  ;;  %v2691_v30 = vrot.slane %v2683_v46, %v11795_v48 }
 0x34a   : > { %v2809_v10 = vcombine.low %v2792_v13, %v2800_v14  ;;  %v2766_v37 = vrot.slane %v2759_v25, %v11795_v48  ;;  %v2698_v31 = vrot.slane %v2684_v47, %v11795_v48  ;;  %v2699_v60 = vcombine.low %v2667_v42, %v2682_v45 }
 0x34b   : > { %v2700_v39 = vcombine.high %v2667_v42, %v2682_v45  ;;  %v2826_v55 = vrot.slane %v2819_v52, %v11785_v33  ;;  %v2834_v56 = vrot.slane %v9182_v54, %v11785_v33  ;;  %v2835_v59 = vcombine.low %v2641_v51, %v2648_v49 }
 0x34c   : > { %v9183_v28 = vcombine.high %v2641_v51, %v2648_v49  ;;  %v2707_v1 = vrot.slane %v2699_v60, %v11795_v48  ;;  %v2869_v57 = vcombine.low %v2691_v30, %v2698_v31  ;;  %v9184_v58 = vcombine.high %v2691_v30, %v2698_v31 }
 0x34d   : > { %v2714_v4 = vrot.slane %v2700_v39, %v11795_v48  ;;  %v2842_v9 = vrot.slane %v2835_v59, %v11785_v33  ;;  %v2851_v26 = vcombine.low %v2826_v55, %v2834_v56  ;;  %v2767_v2 = vcombine.low %v12059_v27, %v2766_v37 }
 0x34e   : > { %v2850_v5 = vrot.slane %v9183_v28, %v11785_v33  ;;  %v2876_v6 = vrot.slane %v2869_v57, %v11785_v33  ;;  %v2884_v12 = vrot.slane %v9184_v58, %v11785_v33  ;;  %v2816_v8 = vrot.slane %v2809_v10, %v11795_v48 }
 0x34f   : > { %v2885_v3 = vcombine.low %v2707_v1, %v2714_v4  ;;  %v9185_v50 = vcombine.high %v2707_v1, %v2714_v4  ;;  %v2858_v16 = vrot.slane %v2851_v26, %v11795_v48  ;;  %v2768_v34 = vcombine.high %v12059_v27, %v2766_v37 }
 0x350   : > { %v2859_v7 = vcombine.low %v2842_v9, %v2850_v5  ;;  %v2901_v14 = vcombine.low %v2876_v6, %v2884_v12  ;;  %v2817_v15 = vcombine.low %v12062_v29, %v2816_v8  ;;  %v2818_v35 = vcombine.high %v12062_v29, %v2816_v8 }
 0x351   : > { %v2892_v11 = vrot.slane %v2885_v3, %v11785_v33  ;;  %v2900_v13 = vrot.slane %v9185_v50, %v11785_v33 }
 0x352   : > { %v2866_v17 = vrot.slane %v2859_v7, %v11795_v48  ;;  %v2908_v24 = vrot.slane %v2901_v14, %v11795_v48  ;;  %v2919_v19 = vpack.c.bf16 %v2817_v15, %v2767_v2  ;;  %v12099_v38 = vpack.c.bf16 %v2818_v35, %v2768_v34 }
 0x353   : > { %v2909_v18 = vcombine.low %v2892_v11, %v2900_v13 }
 0x354   : > { %v2867_v23 = vcombine.low %v2858_v16, %v2866_v17  ;;  %9679 = vmatpush3.bf16.msra.mxu0 %v2919_v19  ;;  %v2868_v36 = vcombine.high %v2858_v16, %v2866_v17 }
 0x355   : > { %v2916_v25 = vrot.slane %v2909_v18, %v11795_v48  ;;  %9690 = vmatprep.subr.bf16.mxu0 %v11102_v63 }
 0x357   : > { %v2917_v10 = vcombine.low %v2908_v24, %v2916_v25  ;;  %v2918_v61 = vcombine.high %v2908_v24, %v2916_v25 }
 0x359   : > { %v2920_v32 = vpack.c.bf16 %v2917_v10, %v2867_v23  ;;  %v12101_v22 = vpack.c.bf16 %v2918_v61, %v2868_v36 }
 0x35b   : > { %9685 = vmatpush3.bf16.msra.mxu1 %v2920_v32 }
 0x35c   : > { %9696 = vmatprep.subr.bf16.mxu1 %v11102_v63 }
 0x40f   : > { %v2957_v43 = vpop.f32.mrb[16].mxu0 }
 0x410   : > { %v9658_v40 = vpop.f32.mrb[17].mxu0  ;;  %v3088_v44 = vsel %vm3087_vm1, %v2957_v43, -inf }
 0x411   : > { %3089 = vmax.xlane.f32.xlu0 %v3088_v44  ;;  %v2960_v41 = vpop.f32.mrb[18].mxu0  ;;  %v2998_v42 = vpop.f32.mrb[8].mxu1 }
 0x412   : > { %v9659_v45 = vpop.f32.mrb[19].mxu0  ;;  %v9664_v46 = vpop.f32.mrb[9].mxu1  ;;  %v3094_v27 = vsel %vm3087_vm1, %v2998_v42, -inf  ;;  %v3091_v37 = vsel %vm3087_vm1, %v2960_v41, -inf }
 0x413   : > { %3095 = vmax.xlane.f32.xlu1 %v3094_v27  ;;  %v3001_v29 = vpop.f32.mrb[10].mxu1 }
 0x414   : > { %v9665_v47 = vpop.f32.mrb[11].mxu1  ;;  %v3097_v51 = vsel %vm3087_vm1, %v3001_v29, -inf }
 0x415   : > { %3092 = vmax.xlane.f32.xlu0 %v3091_v37 }
 0x417   : > { %v3039_v49 = vpop.f32.mrb[20].mxu0  ;;  %3098 = vmax.xlane.f32.xlu1 %v3097_v51 }
 0x418   : > { %v9670_v52 = vpop.f32.mrb[21].mxu0  ;;  %v3100_v54 = vsel %vm3087_vm1, %v3039_v49, -inf }
 0x419   : > { %3101 = vmax.xlane.f32.xlu0 %v3100_v54  ;;  %v3042_v30 = vpop.f32.mrb[22].mxu0  ;;  %v3080_v31 = vpop.f32.mrb[12].mxu1 }
 0x41a   : > { %v9671_v60 = vpop.f32.mrb[23].mxu0  ;;  %v9676_v39 = vpop.f32.mrb[13].mxu1  ;;  %v3106_v55 = vsel %vm3087_vm1, %v3080_v31, -inf  ;;  %v3103_v56 = vsel %vm3087_vm1, %v3042_v30, -inf }
 0x41b   : > { %v3083_v59 = vpop.f32.mrb[14].mxu1  ;;  %3104 = vmax.xlane.f32.xlu1 %v3103_v56 }
 0x41c   : > { %v9677_v28 = vpop.f32.mrb[15].mxu1  ;;  %v3109_v1 = vsel %vm3087_vm1, %v3083_v59, -inf }
 0x41d   : > { %3107 = vmax.xlane.f32.xlu0 %v3106_v55 }
 0x41f   : > { %3110 = vmax.xlane.f32.xlu1 %v3109_v1 }
 0x49e   : > { %v3090_v4 = vpop.xlane.xlu0 %3089 }
 0x49f   : > { %v3112_v57 = vsub.f32 %v2957_v43, %v3090_v4  ;;  %v10093_v4 = vld [vmem:[#allocation14 + $0x4] ss:$8 sps:$4 sm:$0xff]  }
 0x4a0   : > { %v3096_v58 = vpop.xlane.xlu1 %3095 }
 0x4a1   : > { %v3120_v9 = vmul.f32 1.442695, %v3112_v57  ;;  %v3114_v5 = vsub.f32 %v2998_v42, %v3096_v58 }
 0x4a2   : > { %v3093_v26 = vpop.xlane.xlu0 %3092 }
 0x4a3   : > { %10477 = vpow2.f32 %v3120_v9  ;;  %v3113_v2 = vsub.f32 %v2960_v41, %v3093_v26  ;;  %v3124_v6 = vmul.f32 1.442695, %v3114_v5 }
 0x4a4   : > { %v3099_v12 = vpop.xlane.xlu1 %3098 }
 0x4a5   : > { %v3122_v3 = vmul.f32 1.442695, %v3113_v2  ;;  %10479 = vpow2.f32 %v3124_v6  ;;  %v3115_v50 = vsub.f32 %v3001_v29, %v3099_v12 }
 0x4a6   : > { %v3102_v8 = vpop.xlane.xlu0 %3101 }
 0x4a7   : > { %10481 = vpow2.f32 %v3122_v3  ;;  %v3116_v16 = vsub.f32 %v3039_v49, %v3102_v8  ;;  %v3126_v7 = vmul.f32 1.442695, %v3115_v50  ;;  %v10091_v50 = vld [vmem:[#allocation14] ss:$8 sps:$4 sm:$0xff]  }
 0x4a8   : > { %v3105_v11 = vpop.xlane.xlu1 %3104 }
 0x4a9   : > { %v3128_v13 = vmul.f32 1.442695, %v3116_v16  ;;  %10483 = vpow2.f32 %v3126_v7  ;;  %v3117_v14 = vsub.f32 %v3042_v30, %v3105_v11  ;;  %v10096_v16 = vld [vmem:[#allocation14 + $0x14] ss:$8 sps:$4 sm:$0xff]  }
 0x4aa   : > { %v3108_v15 = vpop.xlane.xlu0 %3107 }
 0x4ab   : > { %10485 = vpow2.f32 %v3128_v13  ;;  %v3118_v17 = vsub.f32 %v3080_v31, %v3108_v15  ;;  %v3130_v24 = vmul.f32 1.442695, %v3117_v14  ;;  %v10094_v14 = vld [vmem:[#allocation14 + $0x10] ss:$8 sps:$4 sm:$0xff]   ;;  %v10099_v15 = vld [vmem:[#allocation14 + $0x24] ss:$8 sps:$4 sm:$0xff]  }
 0x4ac   : > { %v3111_v18 = vpop.xlane.xlu1 %3110 }
 0x4ad   : > { %v10478_v19 = vpop.eup %10477  ;;  %v3132_v23 = vmul.f32 1.442695, %v3118_v17  ;;  %10487 = vpow2.f32 %v3130_v24  ;;  %v3119_v25 = vsub.f32 %v3083_v59, %v3111_v18  ;;  %v10102_v17 = vld [vmem:[#allocation14 + $0x34] ss:$8 sps:$4 sm:$0xff]   ;;  %v10100_v24 = vld [vmem:[#allocation14 + $0x30] ss:$8 sps:$4 sm:$0xff]  }
 0x4ae   : > { %v3136_v10 = vsel %vm3087_vm1, %v10478_v19, 0.0  ;;  %v10105_v18 = vld [vmem:[#allocation14 + $0x44] ss:$8 sps:$4 sm:$0xff]  }
 0x4af   : > { %v10480_v32 = vpop.eup %10479  ;;  %10489 = vpow2.f32 %v3132_v23  ;;  %3137 = vadd.xlane.f32.xlu0 %v3136_v10  ;;  %v3134_v34 = vmul.f32 1.442695, %v3119_v25  ;;  %v10108_v23 = vld [vmem:[#allocation14 + $0x54] ss:$8 sps:$4 sm:$0xff]   ;;  %v10106_v25 = vld [vmem:[#allocation14 + $0x50] ss:$8 sps:$4 sm:$0xff]  }
 0x4b0   : > { %v3142_v35 = vsel %vm3087_vm1, %v10480_v32, 0.0  ;;  %v10111_v10 = vld [vmem:[#allocation14 + $0x64] ss:$8 sps:$4 sm:$0xff]  }
 0x4b1   : > { %v10482_v36 = vpop.eup %10481  ;;  %10491 = vpow2.f32 %v3134_v34  ;;  %v10112_v34 = vld [vmem:[#allocation14 + $0x70] ss:$8 sps:$4 sm:$0xff]  }
 0x4b2   : > { %v3139_v61 = vsel %vm3087_vm1, %v10482_v36, 0.0 }
 0x4b3   : > { %v10484_v43 = vpop.eup %10483  ;;  %3140 = vadd.xlane.f32.xlu1 %v3139_v61  ;;  %3143 = vadd.xlane.f32.xlu0 %v3142_v35  ;;  %v10114_v35 = vld [vmem:[#allocation14 + $0x74] ss:$8 sps:$4 sm:$0xff]  }
 0x4b4   : > { %v3145_v40 = vsel %vm3087_vm1, %v10484_v43, 0.0 }
 0x4b5   : > { %v10486_v44 = vpop.eup %10485 }
 0x4b6   : > { %v3148_v41 = vsel %vm3087_vm1, %v10486_v44, 0.0 }
 0x4b7   : > { %v10488_v42 = vpop.eup %10487  ;;  %3149 = vadd.xlane.f32.xlu0 %v3148_v41  ;;  %3146 = vadd.xlane.f32.xlu1 %v3145_v40 }
 0x4b8   : > { %v3151_v45 = vsel %vm3087_vm1, %v10488_v42, 0.0 }
 0x4b9   : > { %v10490_v46 = vpop.eup %10489 }
 0x4ba   : > { %v3154_v27 = vsel %vm3087_vm1, %v10490_v46, 0.0 }
 0x4bb   : > { %v10492_v29 = vpop.eup %10491  ;;  %3155 = vadd.xlane.f32.xlu0 %v3154_v27  ;;  %3152 = vadd.xlane.f32.xlu1 %v3151_v45  ;;  %v10120_v45 = vld [vmem:[#allocation14 + $0x94] ss:$8 sps:$4 sm:$0xff]   ;;  %v10118_v27 = vld [vmem:[#allocation14 + $0x90] ss:$8 sps:$4 sm:$0xff]  }
 0x4bc   : > { %v3157_v37 = vsel %vm3087_vm1, %v10492_v29, 0.0 }
 0x4bf   : > { %3158 = vadd.xlane.f32.xlu1 %v3157_v37 }
 0x53c   : > { %v3138_v47 = vpop.xlane.xlu0 %3137 }
 0x53d   : > { %10493 = vrcp.f32 %v3138_v47  ;;  %v10123_v47 = vld [vmem:[#allocation14 + $0xa4] ss:$8 sps:$4 sm:$0xff]  }
 0x540   : > { %v3141_v51 = vpop.xlane.xlu1 %3140  ;;  %v3144_v49 = vpop.xlane.xlu0 %3143 }
 0x541   : > { %10495 = vrcp.f32 %v3141_v51 }
 0x542   : > { %10497 = vrcp.f32 %v3144_v49 }
 0x544   : > { %v3150_v52 = vpop.xlane.xlu0 %3149  ;;  %v3147_v54 = vpop.xlane.xlu1 %3146 }
 0x545   : > { %10499 = vrcp.f32 %v3147_v54  ;;  %v10121_v54 = vld [vmem:[#allocation14 + $0xa0] ss:$8 sps:$4 sm:$0xff]  }
 0x546   : > { %10501 = vrcp.f32 %v3150_v52 }
 0x547   : > { %v10494_v60 = vpop.eup %10493 }
 0x548   : > { %v3156_v30 = vpop.xlane.xlu0 %3155  ;;  %v3153_v31 = vpop.xlane.xlu1 %3152  ;;  %v3168_v55 = vmul.f32 %v10494_v60, %v10478_v19  ;;  %v10103_v19 = vld [vmem:[#allocation14 + $0x40] ss:$8 sps:$4 sm:$0xff]   ;;  %v10126_v60 = vld [vmem:[#allocation14 + $0xb4] ss:$8 sps:$4 sm:$0xff]  }
 0x549   : > { %10503 = vrcp.f32 %v3153_v31 }
 0x54a   : > { %10505 = vrcp.f32 %v3156_v30 }
 0x54b   : > { %v10496_v39 = vpop.eup %10495 }
 0x54c   : > { %v3169_v56 = vmul.f32 %v10496_v39, %v10482_v36  ;;  %v3159_v59 = vpop.xlane.xlu1 %3158  ;;  %v10498_v28 = vpop.eup %10497  ;;  %v10117_v36 = vld [vmem:[#allocation14 + $0x84] ss:$8 sps:$4 sm:$0xff]  }
 0x54d   : > { %10507 = vrcp.f32 %v3159_v59  ;;  %v3170_v58 = vmul.f32 %v10498_v28, %v10480_v32  ;;  %v10109_v32 = vld [vmem:[#allocation14 + $0x60] ss:$8 sps:$4 sm:$0xff]   ;;  %v10124_v59 = vld [vmem:[#allocation14 + $0xb0] ss:$8 sps:$4 sm:$0xff]  }
 0x54e   : > { %v3176_v1 = vpack.c.bf16 %v3169_v56, %v3168_v55 }
 0x54f   : > { %v10500_v57 = vpop.eup %10499 }
 0x550   : > { %9681 = vmatmul.mubr.msk.bf16.vlgmr.msra.gmra.mrb[24].mxu0 %vm3087_vm1, %v3176_v1  ;;  %v3171_v9 = vmul.f32 %v10500_v57, %v10484_v43  ;;  %v10502_v5 = vpop.eup %10501 }
 0x551   : > { %9691 = vmatpush3.bf16.msra.mxu0 %v12099_v38  ;;  %9692 = vmatprep.mubr.msk.bf16.mxu0 %vm11103_vm0, %v11102_v63  ;;  %v3172_v12 = vmul.f32 %v10502_v5, %v10486_v44  ;;  %v10115_v44 = vld [vmem:[#allocation14 + $0x80] ss:$8 sps:$4 sm:$0xff]   ;;  %v10132_v5 = vld [vmem:[#allocation14 + $0xd4] ss:$8 sps:$4 sm:$0xff]  }
 0x552   : > { %3446 = vmatprep.subr.bf16.mxu0 %v10093_v4  ;;  %v3177_v26 = vpack.c.bf16 %v3171_v9, %v3170_v58  ;;  %v10129_v4 = vld [vmem:[#allocation14 + $0xc4] ss:$8 sps:$4 sm:$0xff]   ;;  %v10127_v9 = vld [vmem:[#allocation14 + $0xc0] ss:$8 sps:$4 sm:$0xff]  }
 0x553   : > { %v10504_v2 = vpop.eup %10503 }
 0x554   : > { %v10506_v6 = vpop.eup %10505  ;;  %v3173_v3 = vmul.f32 %v10504_v2, %v10488_v42  ;;  %9687 = vmatmul.mubr.msk.bf16.vlgmr.msra.gmra.mrb[16].mxu1 %vm3087_vm1, %v3177_v26  ;;  %v10130_v26 = vld [vmem:[#allocation14 + $0xd0] ss:$8 sps:$4 sm:$0xff]   ;;  %v10135_v2 = vld [vmem:[#allocation14 + $0xe4] ss:$8 sps:$4 sm:$0xff]  }
 0x555   : > { %9697 = vmatpush3.bf16.msra.mxu1 %v12101_v22  ;;  %9698 = vmatprep.mubr.msk.bf16.mxu1 %vm11103_vm0, %v11102_v63  ;;  %v3174_v7 = vmul.f32 %v10506_v6, %v10490_v46  ;;  %v10097_v22 = vld [vmem:[#allocation14 + $0x20] ss:$8 sps:$4 sm:$0xff]  }
 0x556   : > { %v3178_v38 = vpack.c.bf16 %v3173_v3, %v3172_v12  ;;  %v10133_v6 = vld [vmem:[#allocation14 + $0xe0] ss:$8 sps:$4 sm:$0xff]   ;;  %v10138_v12 = vld [vmem:[#allocation14 + $0xf4] ss:$8 sps:$4 sm:$0xff]   ;;  %v10136_v3 = vld [vmem:[#allocation14 + $0xf0] ss:$8 sps:$4 sm:$0xff]  }
 0x557   : > { %v10508_v8 = vpop.eup %10507 }
 0x558   : > { %v3175_v11 = vmul.f32 %v10508_v8, %v10492_v29  ;;  %9693 = vmatmul.mubr.msk.bf16.vlgmr.msra.gmra.mrb[28].mxu0 %vm3087_vm1, %v3178_v38  ;;  %v12140_v8 = vld [vmem:[%s13054_s1] sm:$0xff] }
 0x559   : > { %3447 = vmatpush1.bf16.msra.mxu0 %v10091_v50  ;;  %3478 = vmatprep.mubr.bf16.mxu0 %v11101_v0  ;;  %v12135_v50 = vsub.s32 3, %v11760_v20 }
 0x55a   : > { %v3179_v13 = vpack.c.bf16 %v3175_v11, %v3174_v7  ;;  %3448 = vmatprep.subr.bf16.mxu0 %v10096_v16  ;;  %v12147_v16 = vld [vmem:[%s13054_s1 + $0x8] sm:$0xff] }
 0x55b   : > { %v3361_v38 = vrot.slane %v12140_v8, %v12135_v50  ;;  %v3365_v7 = vrot.slane %v12147_v16, %v12135_v50 }
 0x55c   : > { %9699 = vmatmul.mubr.msk.bf16.vlgmr.msra.gmra.mrb[20].mxu1 %vm3087_vm1, %v3179_v13 }
 0x55d   : > { %3449 = vmatpush1.bf16.msra.mxu0 %v10094_v14  ;;  %4349 = vmatprep.mubr.bf16.mxu1 %v11101_v0 }
 0x55e   : > { %3450 = vmatprep.subr.bf16.mxu0 %v10099_v15 }
 0x561   : > { %3451 = vmatpush1.bf16.msra.mxu0 %v10097_v22 }
 0x562   : > { %3452 = vmatprep.subr.bf16.mxu0 %v10102_v17  ;;  %v10567_v17 = vld [vmem:[%s11689_s29] sm:$0xff] }
 0x565   : > { %3453 = vmatpush1.bf16.msra.mxu0 %v10100_v24 }
 0x566   : > { %3454 = vmatprep.subr.bf16.mxu0 %v10105_v18 }
 0x569   : > { %3455 = vmatpush1.bf16.msra.mxu0 %v10103_v19 }
 0x56a   : > { %3456 = vmatprep.subr.bf16.mxu0 %v10108_v23  ;;  %v10568_v23 = vld [vmem:[%s11689_s29 + $0x8] sm:$0xff] }
 0x56d   : > { %3457 = vmatpush1.bf16.msra.mxu0 %v10106_v25 }
 0x56e   : > { %3458 = vmatprep.subr.bf16.mxu0 %v10111_v10 }
 0x571   : > { %3459 = vmatpush1.bf16.msra.mxu0 %v10109_v32  ;;  %v10569_v32 = vld [vmem:[%s11689_s29 + $0x10] sm:$0xff] }
 0x572   : > { %3460 = vmatprep.subr.bf16.mxu0 %v10114_v35  ;;  %v10570_v35 = vld [vmem:[%s11689_s29 + $0x18] sm:$0xff] }
 0x575   : > { %3461 = vmatpush1.bf16.msra.mxu0 %v10112_v34 }
 0x576   : > { %3581 = vmatprep.subr.bf16.mxu0 %v10117_v36 }
 0x623   : > { %v3217_v61 = vpop.f32.mrb[24].mxu0 }
 0x624   : > { %v9682_v43 = vpop.f32.mrb[25].mxu0 }
 0x625   : > { %v3220_v40 = vpop.f32.mrb[26].mxu0 }
 0x626   : > { %v3356_v41 = vpack.c.bf16 %v3220_v40, %v3217_v61  ;;  %v9683_v42 = vpop.f32.mrb[27].mxu0 }
 0x627   : > { %v3261_v46 = vpop.f32.mrb[16].mxu1 }
 0x628   : > { %3479 = vmatmul.mubr.bf16.vlgmr.msra.gmra.mrb[32].mxu0 %v3356_v41  ;;  %v9688_v29 = vpop.f32.mrb[17].mxu1 }
 0x629   : > { %3582 = vmatpush1.bf16.msra.mxu0 %v10115_v44  ;;  %3488 = vmatprep.mubr.bf16.mxu0 %v11101_v0  ;;  %v3264_v37 = vpop.f32.mrb[18].mxu1 }
 0x62a   : > { %3583 = vmatprep.subr.bf16.mxu0 %v10120_v45  ;;  %v3357_v51 = vpack.c.bf16 %v3264_v37, %v3261_v46  ;;  %v9689_v49 = vpop.f32.mrb[19].mxu1  ;;  %v10571_v46 = vld [vmem:[%s11689_s29 + $0x20] sm:$0xff] }
 0x62b   : > { %v3305_v52 = vpop.f32.mrb[28].mxu0 }
 0x62c   : > { %v9694_v30 = vpop.f32.mrb[29].mxu0 }
 0x62d   : > { %3584 = vmatpush1.bf16.msra.mxu0 %v10118_v27  ;;  %v3308_v31 = vpop.f32.mrb[30].mxu0  ;;  %v10574_v30 = vld [vmem:[%s11689_s29 + $0x38] sm:$0xff] }
 0x62e   : > { %3585 = vmatprep.subr.bf16.mxu0 %v10123_v47  ;;  %v3499_v39 = vpack.c.bf16 %v3308_v31, %v3305_v52  ;;  %v9695_v55 = vpop.f32.mrb[31].mxu0  ;;  %v10572_v47 = vld [vmem:[%s11689_s29 + $0x28] sm:$0xff]  ;;  %v10573_v52 = vld [vmem:[%s11689_s29 + $0x30] sm:$0xff]  ;;  %s13057_s29 = sld [smem:[#allocation41_spill]] }
 0x62f   : > { %v3349_v56 = vpop.f32.mrb[20].mxu1  ;;  %v10139_v55 = vld [vmem:[#allocation16] ss:$8 sps:$4 sm:$0xff]  }
 0x630   : > { %3489 = vmatmul.mubr.bf16.gmra.mrb[36].mxu0 %v3357_v51  ;;  %v9700_v28 = vpop.f32.mrb[21].mxu1 }
 0x631   : > { %3586 = vmatpush1.bf16.msra.mxu0 %v10121_v54  ;;  %3613 = vmatprep.mubr.bf16.mxu0 %v11101_v0  ;;  %v3352_v1 = vpop.f32.mrb[22].mxu1  ;;  %v10142_v28 = vld [vmem:[#allocation16 + $0x10] ss:$8 sps:$4 sm:$0xff]  }
 0x632   : > { %3587 = vmatprep.subr.bf16.mxu0 %v10126_v60  ;;  %v3500_v57 = vpack.c.bf16 %v3352_v1, %v3349_v56  ;;  %v9701_v58 = vpop.f32.mrb[23].mxu1  ;;  %v10141_v56 = vld [vmem:[#allocation16 + $0x4] ss:$8 sps:$4 sm:$0xff]  }
 0x633   : > { %v10147_v1 = vld [vmem:[#allocation16 + $0x24] ss:$8 sps:$4 sm:$0xff]   ;;  %v10148_v58 = vld [vmem:[#allocation16 + $0x30] ss:$8 sps:$4 sm:$0xff]  }
 0x634   : > { %p13059_p6 = scmp.ne.s32.totalorder %s13057_s29, 0 }
 0x635   : > { %3588 = vmatpush1.bf16.msra.mxu0 %v10124_v59  ;;  %v10144_v59 = vld [vmem:[#allocation16 + $0x14] ss:$8 sps:$4 sm:$0xff]  }
 0x636   : > { %3589 = vmatprep.subr.bf16.mxu0 %v10129_v4  ;;  %v10145_v4 = vld [vmem:[#allocation16 + $0x20] ss:$8 sps:$4 sm:$0xff]   ;;  %p10981_p8 = pnand %p10980_p5, %p13059_p6 }
 0x638   : > { %p10982_p13 = pneg %p10981_p8 }
 0x639   : > { %3590 = vmatpush1.bf16.msra.mxu0 %v10127_v9  ;;  %v10153_v9 = vld [vmem:[#allocation16 + $0x44] ss:$8 sps:$4 sm:$0xff]  }
 0x63a   : > { %3591 = vmatprep.subr.bf16.mxu0 %v10132_v5  ;;  %v10151_v5 = vld [vmem:[#allocation16 + $0x40] ss:$8 sps:$4 sm:$0xff]  }
 0x63d   : > { %3592 = vmatpush1.bf16.msra.mxu0 %v10130_v26  ;;  %v10156_v26 = vld [vmem:[#allocation16 + $0x54] ss:$8 sps:$4 sm:$0xff]  }
 0x63e   : > { %3593 = vmatprep.subr.bf16.mxu0 %v10135_v2  ;;  %v10154_v2 = vld [vmem:[#allocation16 + $0x50] ss:$8 sps:$4 sm:$0xff]  }
 0x641   : > { %3594 = vmatpush1.bf16.msra.mxu0 %v10133_v6  ;;  %v10159_v6 = vld [vmem:[#allocation16 + $0x64] ss:$8 sps:$4 sm:$0xff]  }
 0x642   : > { %3595 = vmatprep.subr.bf16.mxu0 %v10138_v12  ;;  %v10157_v12 = vld [vmem:[#allocation16 + $0x60] ss:$8 sps:$4 sm:$0xff]  }
 0x645   : > { %3596 = vmatpush1.bf16.msra.mxu0 %v10136_v3  ;;  %v10162_v3 = vld [vmem:[#allocation16 + $0x74] ss:$8 sps:$4 sm:$0xff]  }
 0x646   : > { %4015 = vmatprep.subr.bf16.mxu0 %v10141_v56  ;;  %v10180_v56 = vld [vmem:[#allocation16 + $0xd4] ss:$8 sps:$4 sm:$0xff]  }
 0x648   : > { %3614 = vmatmul.mubr.bf16.vlgmr.msra.gmra.mrb[32].mxu0 %v3499_v39 }
 0x649   : > { %3623 = vmatprep.mubr.bf16.mxu0 %v11101_v0  ;;  %4016 = vmatpush1.bf16.msra.mxu0 %v10139_v55  ;;  %v10175_v55 = vld [vmem:[#allocation16 + $0xc0] ss:$8 sps:$4 sm:$0xff]  }
 0x64a   : > { %4017 = vmatprep.subr.bf16.mxu0 %v10144_v59  ;;  %v10178_v59 = vld [vmem:[#allocation16 + $0xd0] ss:$8 sps:$4 sm:$0xff]  }
 0x64d   : > { %4018 = vmatpush1.bf16.msra.mxu0 %v10142_v28  ;;  %v10183_v28 = vld [vmem:[#allocation16 + $0xe4] ss:$8 sps:$4 sm:$0xff]  }
 0x64e   : > { %4019 = vmatprep.subr.bf16.mxu0 %v10147_v1  ;;  %v10181_v1 = vld [vmem:[#allocation16 + $0xe0] ss:$8 sps:$4 sm:$0xff]  }
 0x650   : > { %3624 = vmatmul.mubr.bf16.gmra.mrb[36].mxu0 %v3500_v57  ;;  %v10150_v57 = vld [vmem:[#allocation16 + $0x34] ss:$8 sps:$4 sm:$0xff]  }
 0x651   : > { %4020 = vmatpush1.bf16.msra.mxu0 %v10145_v4  ;;  %v10186_v4 = vld [vmem:[#allocation16 + $0xf4] ss:$8 sps:$4 sm:$0xff]  }
 0x652   : > { %4021 = vmatprep.subr.bf16.mxu0 %v10150_v57  ;;  %v10184_v57 = vld [vmem:[#allocation16 + $0xf0] ss:$8 sps:$4 sm:$0xff]  }
 0x655   : > { %4022 = vmatpush1.bf16.msra.mxu0 %v10148_v58  ;;  %v10189_v58 = vld [vmem:[#allocation17 + $0x4] ss:$8 sps:$4 sm:$0xff]  }
 0x656   : > { %4023 = vmatprep.subr.bf16.mxu0 %v10153_v9 }
 0x659   : > { %4024 = vmatpush1.bf16.msra.mxu0 %v10151_v5 }
 0x65a   : > { %4025 = vmatprep.subr.bf16.mxu0 %v10156_v26 }
 0x65d   : > { %4026 = vmatpush1.bf16.msra.mxu0 %v10154_v2 }
 0x65e   : > { %4027 = vmatprep.subr.bf16.mxu0 %v10159_v6 }
 0x661   : > { %4028 = vmatpush1.bf16.msra.mxu0 %v10157_v12 }
 0x662   : > { %4029 = vmatprep.subr.bf16.mxu0 %v10162_v3 }
 0x71b   : > { %v3615_v11 = vpop.f32.mrb[32].mxu0 }
 0x71c   : > { %v9750_v13 = vadd.f32 %v3615_v11, %v3361_v38  ;;  %v3617_v14 = vpop.f32.mrb[33].mxu0  ;;  %v10163_v11 = vld [vmem:[#allocation16 + $0x80] ss:$8 sps:$4 sm:$0xff]  }
 0x71d   : > { %v9751_v15 = vadd.f32 %v3617_v14, %v3365_v7  ;;  %v3619_v22 = vpop.f32.mrb[34].mxu0  ;;  %v10166_v14 = vld [vmem:[#allocation16 + $0x90] ss:$8 sps:$4 sm:$0xff]  }
 0x71e   : > { %v12152_v24 = vadd.f32 %v10567_v17, %v9750_v13  ;;  %v9752_v18 = vadd.f32 %v3619_v22, %v3361_v38  ;;  %v3621_v19 = vpop.f32.mrb[35].mxu0  ;;  %v10168_v13 = vld [vmem:[#allocation16 + $0x94] ss:$8 sps:$4 sm:$0xff]  }
 0x71f   : > { %v12155_v25 = vadd.f32 %v10568_v23, %v9751_v15  ;;  %v9753_v10 = vadd.f32 %v3621_v19, %v3365_v7 }
 0x720   : > { %v12158_v34 = vadd.f32 %v10569_v32, %v9752_v18 }
 0x721   : > { %v12161_v36 = vadd.f32 %v10570_v35, %v9753_v10  ;;  %v3650_v61 = vadd.f32 %v12155_v25, %v12152_v24 }
 0x723   : > { %3651 = vadd.xlane.f32.xlu0 %v3650_v61  ;;  %v3625_v43 = vpop.f32.mrb[36].mxu0  ;;  %v3653_v40 = vadd.f32 %v12161_v36, %v12158_v34 }
 0x724   : > { %v9754_v44 = vadd.f32 %v3625_v43, %v3361_v38  ;;  %v3627_v41 = vpop.f32.mrb[37].mxu0 }
 0x725   : > { %v9755_v42 = vadd.f32 %v3627_v41, %v3365_v7  ;;  %3654 = vadd.xlane.f32.xlu1 %v3653_v40  ;;  %v3629_v45 = vpop.f32.mrb[38].mxu0 }
 0x726   : > { %v12168_v27 = vadd.f32 %v10571_v46, %v9754_v44  ;;  %v9756_v29 = vadd.f32 %v3629_v45, %v3361_v38  ;;  %v3631_v37 = vpop.f32.mrb[39].mxu0  ;;  %v10160_v38 = vld [vmem:[#allocation16 + $0x70] ss:$8 sps:$4 sm:$0xff]  }
 0x727   : > { %v12171_v51 = vadd.f32 %v10572_v47, %v9755_v42  ;;  %v9757_v49 = vadd.f32 %v3631_v37, %v3365_v7  ;;  %v10165_v7 = vld [vmem:[#allocation16 + $0x84] ss:$8 sps:$4 sm:$0xff]   ;;  %4030 = vmatpush1.bf16.msra.mxu0 %v10160_v38 }
 0x728   : > { %v12174_v54 = vadd.f32 %v10573_v52, %v9756_v29  ;;  %4031 = vmatprep.subr.bf16.mxu0 %v10165_v7  ;;  %v12224_v7 = vsub.s32 4, %v11760_v20 }
 0x729   : > { %v12177_v31 = vadd.f32 %v10574_v30, %v9757_v49  ;;  %v3656_v60 = vadd.f32 %v12171_v51, %v12168_v27  ;;  %v10171_v30 = vld [vmem:[#allocation16 + $0xa4] ss:$8 sps:$4 sm:$0xff]  }
 0x72b   : > { %3657 = vadd.xlane.f32.xlu0 %v3656_v60  ;;  %v3659_v39 = vadd.f32 %v12177_v31, %v12174_v54  ;;  %4032 = vmatpush1.bf16.msra.mxu0 %v10163_v11  ;;  %v10172_v60 = vld [vmem:[#allocation16 + $0xb0] ss:$8 sps:$4 sm:$0xff]  }
 0x72c   : > { %4033 = vmatprep.subr.bf16.mxu0 %v10168_v13 }
 0x72d   : > { %3660 = vadd.xlane.f32.xlu1 %v3659_v39  ;;  %v10177_v39 = vld [vmem:[#allocation16 + $0xc4] ss:$8 sps:$4 sm:$0xff]  }
 0x72f   : > { %4034 = vmatpush1.bf16.msra.mxu0 %v10166_v14 }
 0x730   : > { %4035 = vmatprep.subr.bf16.mxu0 %v10171_v30 }
 0x7b0   : > { %v3652_v15 = vpop.xlane.xlu0 %3651 }
 0x7b1   : > { %v3663_v22 = vmul.f32 0.00390625, %v3652_v15 }
 0x7b2   : > { %v3655_v17 = vpop.xlane.xlu1 %3654 }
 0x7b3   : > { %v12184_v18 = vsub.f32 %v12152_v24, %v3663_v22  ;;  %v12187_v19 = vsub.f32 %v12155_v25, %v3663_v22  ;;  %v3664_v23 = vmul.f32 0.00390625, %v3655_v17  ;;  %v12227_v22 = vsub.s32 5, %v11760_v20 }
 0x7b4   : > { %v3718_v17 = vrot.slane %v12140_v8, %v12224_v7 }
 0x7b5   : > { %v12190_v10 = vsub.f32 %v12158_v34, %v3664_v23  ;;  %v12193_v32 = vsub.f32 %v12161_v36, %v3664_v23  ;;  %v3675_v35 = vmul.f32 %v12184_v18, %v12184_v18  ;;  %v3676_v61 = vmul.f32 %v12187_v19, %v12187_v19 }
 0x7b6   : > { %v3722_v23 = vrot.slane %v12147_v16, %v12224_v7 }
 0x7b7   : > { %v3683_v43 = vadd.f32 %v3676_v61, %v3675_v35  ;;  %v3677_v24 = vmul.f32 %v12190_v10, %v12190_v10  ;;  %v3678_v25 = vmul.f32 %v12193_v32, %v12193_v32 }
 0x7b8   : > { %v3658_v40 = vpop.xlane.xlu0 %3657 }
 0x7b9   : > { %v3665_v44 = vmul.f32 0.00390625, %v3658_v40  ;;  %3684 = vadd.xlane.f32.xlu0 %v3683_v43  ;;  %v3686_v34 = vadd.f32 %v3678_v25, %v3677_v24  ;;  %v3738_v25 = vrot.slane %v12147_v16, %v12227_v22  ;;  %v3734_v40 = vrot.slane %v12140_v8, %v12227_v22 }
 0x7ba   : > { %v3661_v41 = vpop.xlane.xlu1 %3660 }
 0x7bb   : > { %v12204_v36 = vsub.f32 %v12168_v27, %v3665_v44  ;;  %v12207_v42 = vsub.f32 %v12171_v51, %v3665_v44  ;;  %v3666_v45 = vmul.f32 0.00390625, %v3661_v41  ;;  %3687 = vadd.xlane.f32.xlu1 %v3686_v34 }
 0x7bd   : > { %v12210_v46 = vsub.f32 %v12174_v54, %v3666_v45  ;;  %v12213_v29 = vsub.f32 %v12177_v31, %v3666_v45  ;;  %v3679_v37 = vmul.f32 %v12204_v36, %v12204_v36  ;;  %v3680_v47 = vmul.f32 %v12207_v42, %v12207_v42  ;;  %v10169_v54 = vld [vmem:[#allocation16 + $0xa0] ss:$8 sps:$4 sm:$0xff]   ;;  %v10174_v31 = vld [vmem:[#allocation16 + $0xb4] ss:$8 sps:$4 sm:$0xff]  }
 0x7be   : > { %4036 = vmatpush1.bf16.msra.mxu0 %v10169_v54  ;;  %v10187_v54 = vld [vmem:[#allocation17] ss:$8 sps:$4 sm:$0xff]  }
 0x7bf   : > { %v3689_v49 = vadd.f32 %v3680_v47, %v3679_v37  ;;  %v3681_v27 = vmul.f32 %v12210_v46, %v12210_v46  ;;  %v3682_v51 = vmul.f32 %v12213_v29, %v12213_v29  ;;  %4037 = vmatprep.subr.bf16.mxu0 %v10174_v31 }
 0x7c1   : > { %3690 = vadd.xlane.f32.xlu0 %v3689_v49  ;;  %v3692_v52 = vadd.f32 %v3682_v51, %v3681_v27 }
 0x7c2   : > { %4038 = vmatpush1.bf16.msra.mxu0 %v10172_v60  ;;  %v10192_v60 = vld [vmem:[#allocation17 + $0x14] ss:$8 sps:$4 sm:$0xff]  }
 0x7c3   : > { %3693 = vadd.xlane.f32.xlu1 %v3692_v52  ;;  %4039 = vmatprep.subr.bf16.mxu0 %v10177_v39 }
 0x7c6   : > { %4040 = vmatpush1.bf16.msra.mxu0 %v10175_v55 }
 0x7c7   : > { %4041 = vmatprep.subr.bf16.mxu0 %v10180_v56 }
 0x7ca   : > { %4042 = vmatpush1.bf16.msra.mxu0 %v10178_v59 }
 0x7cb   : > { %4043 = vmatprep.subr.bf16.mxu0 %v10183_v28  ;;  %v10190_v28 = vld [vmem:[#allocation17 + $0x10] ss:$8 sps:$4 sm:$0xff]  }
 0x7ce   : > { %4044 = vmatpush1.bf16.msra.mxu0 %v10181_v1 }
 0x7cf   : > { %4045 = vmatprep.subr.bf16.mxu0 %v10186_v4 }
 0x7d2   : > { %4046 = vmatpush1.bf16.msra.mxu0 %v10184_v57  ;;  %v10195_v57 = vld [vmem:[#allocation17 + $0x24] ss:$8 sps:$4 sm:$0xff]  }
 0x7d3   : > { %4176 = vmatprep.subr.bf16.mxu0 %v10189_v58 }
 0x846   : > { %v3685_v9 = vpop.xlane.xlu0 %3684 }
 0x847   : > { %v3695_v5 = vmul.f32 0.00390625, %v3685_v9 }
 0x848   : > { %v3688_v26 = vpop.xlane.xlu1 %3687 }
 0x849   : > { %v3699_v2 = vadd.f32 1e-06, %v3695_v5  ;;  %v3696_v6 = vmul.f32 0.00390625, %v3688_v26  ;;  %v10198_v26 = vld [vmem:[#allocation17 + $0x34] ss:$8 sps:$4 sm:$0xff]  }
 0x84b   : > { %10509 = vrsqrt.f32 %v3699_v2  ;;  %v3700_v12 = vadd.f32 1e-06, %v3696_v6  ;;  %v10196_v2 = vld [vmem:[#allocation17 + $0x30] ss:$8 sps:$4 sm:$0xff]   ;;  %v10201_v6 = vld [vmem:[#allocation17 + $0x44] ss:$8 sps:$4 sm:$0xff]  }
 0x84d   : > { %10511 = vrsqrt.f32 %v3700_v12  ;;  %v10199_v12 = vld [vmem:[#allocation17 + $0x40] ss:$8 sps:$4 sm:$0xff]  }
 0x84e   : > { %v3691_v3 = vpop.xlane.xlu0 %3690 }
 0x84f   : > { %v3697_v38 = vmul.f32 0.00390625, %v3691_v3  ;;  %v10204_v3 = vld [vmem:[#allocation17 + $0x54] ss:$8 sps:$4 sm:$0xff]  }
 0x850   : > { %v3694_v11 = vpop.xlane.xlu1 %3693 }
 0x851   : > { %v3701_v13 = vadd.f32 1e-06, %v3697_v38  ;;  %v3698_v14 = vmul.f32 0.00390625, %v3694_v11  ;;  %v10202_v38 = vld [vmem:[#allocation17 + $0x50] ss:$8 sps:$4 sm:$0xff]  }
 0x852   : > { %v10207_v11 = vld [vmem:[#allocation17 + $0x64] ss:$8 sps:$4 sm:$0xff]  }
 0x853   : > { %10513 = vrsqrt.f32 %v3701_v13  ;;  %v3702_v15 = vadd.f32 1e-06, %v3698_v14  ;;  %v10205_v13 = vld [vmem:[#allocation17 + $0x60] ss:$8 sps:$4 sm:$0xff]   ;;  %v10210_v14 = vld [vmem:[#allocation17 + $0x74] ss:$8 sps:$4 sm:$0xff]  }
 0x855   : > { %v10510_v35 = vpop.eup %10509  ;;  %10515 = vrsqrt.f32 %v3702_v15  ;;  %v10208_v15 = vld [vmem:[#allocation17 + $0x70] ss:$8 sps:$4 sm:$0xff]  }
 0x856   : > { %v3707_v61 = vmul.f32 %v10510_v35, %v12184_v18  ;;  %v3708_v43 = vmul.f32 %v10510_v35, %v12187_v19  ;;  %v10213_v35 = vld [vmem:[#allocation19] ss:$8 sps:$4 sm:$0xff]  }
 0x857   : > { %v10512_v24 = vpop.eup %10511 }
 0x858   : > { %v3723_v44 = vmul.f32 %v3718_v17, %v3707_v61  ;;  %v3709_v34 = vmul.f32 %v10512_v24, %v12190_v10  ;;  %v3710_v41 = vmul.f32 %v10512_v24, %v12193_v32  ;;  %v3724_v45 = vmul.f32 %v3722_v23, %v3708_v43  ;;  %v10215_v61 = vld [vmem:[#allocation19 + $0x4] ss:$8 sps:$4 sm:$0xff]   ;;  %v10218_v43 = vld [vmem:[#allocation19 + $0x14] ss:$8 sps:$4 sm:$0xff]   ;;  %v10216_v24 = vld [vmem:[#allocation19 + $0x10] ss:$8 sps:$4 sm:$0xff]  }
 0x859   : > { %4317 = vmatprep.subr.bf16.mxu1 %v10215_v61 }
 0x85a   : > { %v3725_v37 = vmul.f32 %v3718_v17, %v3709_v34  ;;  %v3726_v47 = vmul.f32 %v3722_v23, %v3710_v41  ;;  %v12241_v49 = vadd.f32 %v3738_v25, %v3724_v45  ;;  %v12245_v19 = vadd.f32 %v3734_v40, %v3723_v44  ;;  %4318 = vmatpush1.bf16.msra.mxu1 %v10213_v35  ;;  %v10222_v44 = vld [vmem:[#allocation19 + $0x30] ss:$8 sps:$4 sm:$0xff]   ;;  %v10224_v34 = vld [vmem:[#allocation19 + $0x34] ss:$8 sps:$4 sm:$0xff]   ;;  %v10225_v41 = vld [vmem:[#allocation19 + $0x40] ss:$8 sps:$4 sm:$0xff]  }
 0x85b   : > { %4319 = vmatprep.subr.bf16.mxu1 %v10218_v43  ;;  %v10227_v45 = vld [vmem:[#allocation19 + $0x44] ss:$8 sps:$4 sm:$0xff]  }
 0x85c   : > { %v12243_v18 = vadd.f32 %v3738_v25, %v3726_v47  ;;  %v12247_v27 = vadd.f32 %v3734_v40, %v3725_v37  ;;  %v10230_v37 = vld [vmem:[#allocation19 + $0x54] ss:$8 sps:$4 sm:$0xff]   ;;  %v10228_v47 = vld [vmem:[#allocation19 + $0x50] ss:$8 sps:$4 sm:$0xff]  }
 0x85d   : > { %v10514_v51 = vpop.eup %10513 }
 0x85e   : > { %v3844_v52 = vpack.c.bf16 %v12243_v18, %v12241_v49  ;;  %v3843_v10 = vpack.c.bf16 %v12247_v27, %v12245_v19  ;;  %v3712_v32 = vmul.f32 %v10514_v51, %v12207_v42  ;;  %v3711_v30 = vmul.f32 %v10514_v51, %v12204_v36  ;;  %4320 = vmatpush1.bf16.msra.mxu1 %v10216_v24  ;;  %v10233_v51 = vld [vmem:[#allocation19 + $0x64] ss:$8 sps:$4 sm:$0xff]  }
 0x85f   : > { %v10516_v31 = vpop.eup %10515 }
 0x860   : > { %4047 = vmatprep.mubr.bf16.mxu0 %v3844_v52  ;;  %v3714_v39 = vmul.f32 %v10516_v31, %v12213_v29  ;;  %v3728_v55 = vmul.f32 %v3722_v23, %v3712_v32  ;;  %v3713_v56 = vmul.f32 %v10516_v31, %v12210_v46  ;;  %v3727_v59 = vmul.f32 %v3718_v17, %v3711_v30  ;;  %v10193_v29 = vld [vmem:[#allocation17 + $0x20] ss:$8 sps:$4 sm:$0xff]  }
 0x861   : > { %4048 = vmatmul.mubr.bf16.vlgmr.msra.gmra.mrb[40].mxu0 %v3843_v10  ;;  %v10231_v52 = vld [vmem:[#allocation19 + $0x60] ss:$8 sps:$4 sm:$0xff]   ;;  %v10234_v10 = vld [vmem:[#allocation19 + $0x70] ss:$8 sps:$4 sm:$0xff]   ;;  %v12283_v32 = vsub.s32 6, %v11760_v20 }
 0x862   : > { %4177 = vmatpush1.bf16.msra.mxu0 %v10187_v54  ;;  %v3730_v1 = vmul.f32 %v3722_v23, %v3714_v39  ;;  %v3729_v4 = vmul.f32 %v3718_v17, %v3713_v56  ;;  %v12257_v58 = vadd.f32 %v3738_v25, %v3728_v55  ;;  %v12261_v36 = vadd.f32 %v3734_v40, %v3727_v59  ;;  %v10211_v17 = vld [vmem:[%s737_s20] sm:$0xff]   ;;  %v10212_v23 = vld [vmem:[%s737_s20 + $0x8] sm:$0xff]  }
 0x863   : > { %4178 = vmatprep.subr.bf16.mxu0 %v10192_v60  ;;  %v10236_v54 = vld [vmem:[#allocation19 + $0x74] ss:$8 sps:$4 sm:$0xff]   ;;  %v12287_v30 = vrot.slane %v12140_v8, %v12283_v32  ;;  %v12291_v31 = vrot.slane %v12147_v16, %v12283_v32 }
 0x864   : > { %v12259_v42 = vadd.f32 %v3738_v25, %v3730_v1  ;;  %v12263_v9 = vadd.f32 %v3734_v40, %v3729_v4  ;;  %v10219_v25 = vld [vmem:[#allocation19 + $0x20] ss:$8 sps:$4 sm:$0xff]   ;;  %v10221_v40 = vld [vmem:[#allocation19 + $0x24] ss:$8 sps:$4 sm:$0xff]  }
 0x865   : > { %4321 = vmatprep.subr.bf16.mxu1 %v10221_v40 }
 0x866   : > { %4179 = vmatpush1.bf16.msra.mxu0 %v10190_v28  ;;  %v3846_v46 = vpack.c.bf16 %v12259_v42, %v12257_v58  ;;  %v3845_v5 = vpack.c.bf16 %v12263_v9, %v12261_v36  ;;  %4322 = vmatpush1.bf16.msra.mxu1 %v10219_v25  ;;  %v12310_v25 = vsub.s32 7, %v11760_v20 }
 0x867   : > { %4180 = vmatprep.subr.bf16.mxu0 %v10195_v57  ;;  %4323 = vmatprep.subr.bf16.mxu1 %v10224_v34 }
 0x868   : > { %4057 = vmatprep.mubr.bf16.mxu0 %v3846_v46 }
 0x869   : > { %4058 = vmatmul.mubr.bf16.gmra.mrb[44].mxu0 %v3845_v5 }
 0x86a   : > { %4181 = vmatpush1.bf16.msra.mxu0 %v10193_v29  ;;  %4208 = vmatprep.mubr.bf16.mxu0 %v11101_v0 }
 0x86b   : > { %4182 = vmatprep.subr.bf16.mxu0 %v10198_v26  ;;  %4324 = vmatpush1.bf16.msra.mxu1 %v10222_v44 }
 0x86c   : > { %4325 = vmatprep.subr.bf16.mxu1 %v10227_v45 }
 0x86e   : > { %4183 = vmatpush1.bf16.msra.mxu0 %v10196_v2 }
 0x86f   : > { %4184 = vmatprep.subr.bf16.mxu0 %v10201_v6  ;;  %4326 = vmatpush1.bf16.msra.mxu1 %v10225_v41 }
 0x870   : > { %4327 = vmatprep.subr.bf16.mxu1 %v10230_v37 }
 0x872   : > { %4185 = vmatpush1.bf16.msra.mxu0 %v10199_v12 }
 0x873   : > { %4186 = vmatprep.subr.bf16.mxu0 %v10204_v3  ;;  %4328 = vmatpush1.bf16.msra.mxu1 %v10228_v47 }
 0x874   : > { %4329 = vmatprep.subr.bf16.mxu1 %v10233_v51 }
 0x876   : > { %4187 = vmatpush1.bf16.msra.mxu0 %v10202_v38 }
 0x877   : > { %4188 = vmatprep.subr.bf16.mxu0 %v10207_v11  ;;  %4330 = vmatpush1.bf16.msra.mxu1 %v10231_v52 }
 0x878   : > { %4331 = vmatprep.subr.bf16.mxu1 %v10236_v54 }
 0x87a   : > { %4189 = vmatpush1.bf16.msra.mxu0 %v10205_v13 }
 0x87b   : > { %4190 = vmatprep.subr.bf16.mxu0 %v10210_v14  ;;  %4332 = vmatpush1.bf16.msra.mxu1 %v10234_v10 }
 0x87c   : > { %9708 = vmatprep.subr.bf16.mxu1 %v11102_v63 }
 0x87e   : > { %4191 = vmatpush1.bf16.msra.mxu0 %v10208_v15  ;;  %4350 = vmatmul.mubr.bf16.vlgmr.msra.gmra.mrb[24].mxu1 %v10211_v17 }
 0x87f   : > { %9702 = vmatprep.subr.bf16.mxu0 %v11102_v63  ;;  %4359 = vmatprep.mubr.bf16.mxu1 %v11101_v0 }
 0x881   : > { %4209 = vmatmul.mubr.bf16.vlgmr.msra.gmra.mrb[48].mxu0 %v10211_v17 }
 0x882   : > { %4218 = vmatprep.mubr.bf16.mxu0 %v11101_v0 }
 0x886   : > { %4360 = vmatmul.mubr.bf16.gmra.mrb[28].mxu1 %v10212_v23 }
 0x887   : > { %9710 = vmatprep.mubr.msk.bf16.mxu1 %vm11103_vm0, %v11102_v63 }
 0x889   : > { %4219 = vmatmul.mubr.bf16.gmra.mrb[52].mxu0 %v10212_v23 }
 0x88a   : > { %9704 = vmatprep.mubr.msk.bf16.mxu0 %vm11103_vm0, %v11102_v63 }
 0x934   : > { %v4049_v60 = vpop.f32.mrb[40].mxu0 }
 0x935   : > { %v4050_v39 = vadd.f32 %v4049_v60, %v12287_v30  ;;  %v4051_v55 = vpop.f32.mrb[41].mxu0 }
 0x936   : > { %v4052_v56 = vadd.f32 %v4051_v55, %v12291_v31  ;;  %v4053_v59 = vpop.f32.mrb[42].mxu0 }
 0x937   : > { %v4068_v28 = vmul.f32 0.088388346, %v4050_v39  ;;  %v4054_v1 = vadd.f32 %v4053_v59, %v12287_v30  ;;  %v4055_v4 = vpop.f32.mrb[43].mxu0 }
 0x938   : > { %v4069_v57 = vmul.f32 0.088388346, %v4052_v56  ;;  %v4056_v46 = vadd.f32 %v4055_v4, %v12291_v31 }
 0x939   : > { %v4370_v29 = vcombine.high %v4068_v28, %v11102_v63  ;;  %v4377_v5 = vrot.slane %v4068_v28, %v11785_v33  ;;  %v4070_v26 = vmul.f32 0.088388346, %v4054_v1 }
 0x93a   : > { %v4385_v2 = vcombine.high %v4069_v57, %v11102_v63  ;;  %v4392_v6 = vrot.slane %v4069_v57, %v11785_v33  ;;  %v4071_v12 = vmul.f32 0.088388346, %v4056_v46 }
 0x93b   : > { %v4384_v3 = vrot.slane %v4370_v29, %v11785_v33  ;;  %v4436_v38 = vcombine.high %v4070_v26, %v11102_v63  ;;  %v4443_v11 = vrot.slane %v4070_v26, %v11785_v33 }
 0x93c   : > { %v4399_v13 = vrot.slane %v4385_v2, %v11785_v33  ;;  %v4400_v14 = vcombine.low %v4377_v5, %v4392_v6  ;;  %v4401_v15 = vcombine.high %v4377_v5, %v4392_v6  ;;  %v4451_v17 = vcombine.high %v4071_v12, %v11102_v63  ;;  %v4059_v23 = vpop.f32.mrb[44].mxu0 }
 0x93d   : > { %v4450_v35 = vrot.slane %v4436_v38, %v11785_v33  ;;  %v4458_v61 = vrot.slane %v4071_v12, %v11785_v33  ;;  %v4060_v43 = vadd.f32 %v4059_v23, %v12287_v30  ;;  %v4061_v24 = vpop.f32.mrb[45].mxu0  ;;  %v12330_v23 = vrot.slane %v12140_v8, %v12310_v25 }
 0x93e   : > { %v4408_v40 = vrot.slane %v4400_v14, %v11795_v48  ;;  %v4415_v44 = vrot.slane %v4401_v15, %v11795_v48  ;;  %v4416_v34 = vcombine.low %v4384_v3, %v4399_v13  ;;  %v4417_v41 = vcombine.high %v4384_v3, %v4399_v13  ;;  %v4063_v45 = vpop.f32.mrb[46].mxu0 }
 0x93f   : > { %v4465_v37 = vrot.slane %v4451_v17, %v11785_v33  ;;  %v4466_v47 = vcombine.low %v4443_v11, %v4458_v61  ;;  %v4467_v51 = vcombine.high %v4443_v11, %v4458_v61  ;;  %v4072_v52 = vmul.f32 0.088388346, %v4060_v43  ;;  %v4065_v54 = vpop.f32.mrb[47].mxu0 }
 0x940   : > { %v4424_v10 = vrot.slane %v4416_v34, %v11795_v48  ;;  %v4431_v60 = vrot.slane %v4417_v41, %v11795_v48  ;;  %v4634_v39 = vcombine.low %v4408_v40, %v4415_v44  ;;  %v9288_v20 = vcombine.high %v4408_v40, %v4415_v44 }
 0x941   : > { %v4474_v55 = vrot.slane %v4466_v47, %v11795_v48  ;;  %v4481_v56 = vrot.slane %v4467_v51, %v11795_v48  ;;  %v4482_v59 = vcombine.low %v4450_v35, %v4465_v37  ;;  %v4483_v28 = vcombine.high %v4450_v35, %v4465_v37 }
 0x942   : > { %v4641_v1 = vrot.slane %v4634_v39, %v11785_v33  ;;  %v4649_v4 = vrot.slane %v9288_v20, %v11785_v33  ;;  %v4650_v57 = vcombine.low %v4424_v10, %v4431_v60  ;;  %v9289_v46 = vcombine.high %v4424_v10, %v4431_v60 }
 0x943   : > { %v4490_v29 = vrot.slane %v4482_v59, %v11795_v48  ;;  %v4497_v5 = vrot.slane %v4483_v28, %v11795_v48  ;;  %v4684_v26 = vcombine.low %v4474_v55, %v4481_v56  ;;  %v9290_v2 = vcombine.high %v4474_v55, %v4481_v56 }
 0x944   : > { %v4657_v6 = vrot.slane %v4650_v57, %v11785_v33  ;;  %v4665_v12 = vrot.slane %v9289_v46, %v11785_v33  ;;  %v4666_v3 = vcombine.low %v4641_v1, %v4649_v4  ;;  %v4502_v38 = vcombine.high %v4072_v52, %v11102_v63 }
 0x945   : > { %v4691_v11 = vrot.slane %v4684_v26, %v11785_v33  ;;  %v4699_v13 = vrot.slane %v9290_v2, %v11785_v33  ;;  %v4700_v14 = vcombine.low %v4490_v29, %v4497_v5  ;;  %v9291_v15 = vcombine.high %v4490_v29, %v4497_v5 }
 0x946   : > { %v4674_v17 = vcombine.low %v4657_v6, %v4665_v12  ;;  %v12334_v35 = vrot.slane %v12147_v16, %v12310_v25  ;;  %v4062_v44 = vadd.f32 %v4061_v24, %v12291_v31  ;;  %v12340_v34 = vrot.slane %v4666_v3, %v11795_v48 }
 0x947   : > { %v4707_v61 = vrot.slane %v4700_v14, %v11785_v33  ;;  %v4715_v43 = vrot.slane %v9291_v15, %v11785_v33  ;;  %v4716_v40 = vcombine.low %v4691_v11, %v4699_v13  ;;  %v4064_v41 = vadd.f32 %v4063_v45, %v12287_v30 }
 0x948   : > { %v4066_v37 = vadd.f32 %v4065_v54, %v12291_v31  ;;  %v12345_v8 = vrot.slane %v4674_v17, %v11795_v48  ;;  %v4509_v16 = vrot.slane %v4072_v52, %v11785_v33  ;;  %v4516_v51 = vrot.slane %v4502_v38, %v11785_v33 }
 0x949   : > { %v4724_v47 = vcombine.low %v4707_v61, %v4715_v43  ;;  %v4073_v10 = vmul.f32 0.088388346, %v4062_v44  ;;  %v4074_v60 = vmul.f32 0.088388346, %v4064_v41  ;;  %v12354_v30 = vrot.slane %v4716_v40, %v11795_v48 }
 0x94a   : > { %v4075_v39 = vmul.f32 0.088388346, %v4066_v37  ;;  %v4682_v24 = vcombine.low %v12340_v34, %v12345_v8  ;;  %v4683_v20 = vcombine.high %v12340_v34, %v12345_v8  ;;  %v12513_v34 = vld [vmem:[%s13054_s1 + $0x10] sm:$0xff] }
 0x94b   : > { %v4517_v31 = vcombine.high %v4073_v10, %v11102_v63  ;;  %v4524_v45 = vrot.slane %v4073_v10, %v11785_v33  ;;  %v12359_v52 = vrot.slane %v4724_v47, %v11795_v48  ;;  %v4568_v54 = vcombine.high %v4074_v60, %v11102_v63 }
 0x94c   : > { %v4575_v55 = vrot.slane %v4074_v60, %v11785_v33  ;;  %v4583_v56 = vcombine.high %v4075_v39, %v11102_v63  ;;  %v4590_v59 = vrot.slane %v4075_v39, %v11785_v33  ;;  %v12517_v8 = vrot.slane %v12513_v34, %v11763_v21 }
 0x94d   : > { %v4531_v28 = vrot.slane %v4517_v31, %v11785_v33  ;;  %v4532_v1 = vcombine.low %v4509_v16, %v4524_v45  ;;  %v4533_v4 = vcombine.high %v4509_v16, %v4524_v45  ;;  %v4732_v57 = vcombine.low %v12354_v30, %v12359_v52 }
 0x94e   : > { %v4582_v46 = vrot.slane %v4568_v54, %v11785_v33  ;;  %v4597_v29 = vrot.slane %v4583_v56, %v11785_v33  ;;  %v4598_v5 = vcombine.low %v4575_v55, %v4590_v59  ;;  %v4599_v26 = vcombine.high %v4575_v55, %v4590_v59 }
 0x94f   : > { %v4540_v2 = vrot.slane %v4532_v1, %v11795_v48  ;;  %v4547_v6 = vrot.slane %v4533_v4, %v11795_v48  ;;  %v4548_v12 = vcombine.low %v4516_v51, %v4531_v28  ;;  %v4549_v3 = vcombine.high %v4516_v51, %v4531_v28 }
 0x950   : > { %v4606_v38 = vrot.slane %v4598_v5, %v11795_v48  ;;  %v4613_v11 = vrot.slane %v4599_v26, %v11795_v48  ;;  %v4614_v13 = vcombine.low %v4582_v46, %v4597_v29  ;;  %v4615_v14 = vcombine.high %v4582_v46, %v4597_v29 }
 0x951   : > { %v4556_v15 = vrot.slane %v4548_v12, %v11795_v48  ;;  %v4563_v17 = vrot.slane %v4549_v3, %v11795_v48  ;;  %v4734_v61 = vcombine.low %v4540_v2, %v4547_v6  ;;  %v9292_v43 = vcombine.high %v4540_v2, %v4547_v6 }
 0x952   : > { %v4622_v40 = vrot.slane %v4614_v13, %v11795_v48  ;;  %v4629_v44 = vrot.slane %v4615_v14, %v11795_v48  ;;  %v4784_v41 = vcombine.low %v4606_v38, %v4613_v11  ;;  %v9294_v37 = vcombine.high %v4606_v38, %v4613_v11 }
 0x953   : > { %v4741_v47 = vrot.slane %v4734_v61, %v11785_v33  ;;  %v4749_v16 = vrot.slane %v9292_v43, %v11785_v33  ;;  %v4750_v51 = vcombine.low %v4556_v15, %v4563_v17  ;;  %v9293_v10 = vcombine.high %v4556_v15, %v4563_v17 }
 0x954   : > { %v4791_v60 = vrot.slane %v4784_v41, %v11785_v33  ;;  %v4799_v39 = vrot.slane %v9294_v37, %v11785_v33  ;;  %v4800_v31 = vcombine.low %v4622_v40, %v4629_v44  ;;  %v9295_v45 = vcombine.high %v4622_v40, %v4629_v44  ;;  %v4210_v54 = vpop.f32.mrb[48].mxu0 }
 0x955   : > { %v4757_v55 = vrot.slane %v4750_v51, %v11785_v33  ;;  %v4765_v56 = vrot.slane %v9293_v10, %v11785_v33  ;;  %v4766_v59 = vcombine.low %v4741_v47, %v4749_v16  ;;  %v4211_v28 = vadd.f32 %v4210_v54, %v12330_v23  ;;  %v4212_v1 = vpop.f32.mrb[49].mxu0 }
 0x956   : > { %v12386_v4 = vrot.slane %v4800_v31, %v11785_v33  ;;  %v12389_v46 = vrot.slane %v9295_v45, %v11785_v33  ;;  %v4816_v29 = vcombine.low %v4791_v60, %v4799_v39  ;;  %v4213_v5 = vadd.f32 %v4212_v1, %v12334_v35  ;;  %v4214_v26 = vpop.f32.mrb[50].mxu0 }
 0x957   : > { %v12393_v2 = vrot.slane %v4766_v59, %v11795_v48  ;;  %v4774_v6 = vcombine.low %v4757_v55, %v4765_v56  ;;  %v4838_v12 = vcombine.high %v4211_v28, %v11102_v63  ;;  %v4845_v3 = vrot.slane %v4211_v28, %v11785_v33  ;;  %v4216_v38 = vpop.f32.mrb[51].mxu0 }
 0x958   : > { %v12398_v11 = vrot.slane %v4816_v29, %v11795_v48  ;;  %v4824_v13 = vcombine.low %v12386_v4, %v12389_v46  ;;  %v4853_v14 = vcombine.high %v4213_v5, %v11102_v63  ;;  %v4860_v15 = vrot.slane %v4213_v5, %v11785_v33 }
 0x959   : > { %v4852_v17 = vrot.slane %v4838_v12, %v11785_v33  ;;  %v4215_v61 = vadd.f32 %v4214_v26, %v12330_v23  ;;  %v4217_v43 = vadd.f32 %v4216_v38, %v12334_v35  ;;  %v12410_v40 = vpack.c.bf16 %v4732_v57, %v4682_v24 }
 0x95a   : > { %v4867_v44 = vrot.slane %v4853_v14, %v11785_v33  ;;  %v4868_v41 = vcombine.low %v4845_v3, %v4860_v15  ;;  %v4869_v37 = vcombine.high %v4845_v3, %v4860_v15  ;;  %v12414_v47 = vrot.slane %v4774_v6, %v11795_v48 }
 0x95b   : > { %v4904_v16 = vcombine.high %v4215_v61, %v11102_v63  ;;  %v4911_v51 = vrot.slane %v4215_v61, %v11785_v33  ;;  %v4919_v10 = vcombine.high %v4217_v43, %v11102_v63  ;;  %v4926_v60 = vrot.slane %v4217_v43, %v11785_v33 }
 0x95c   : > { %v4876_v39 = vrot.slane %v4868_v41, %v11795_v48  ;;  %v4883_v24 = vrot.slane %v4869_v37, %v11795_v48  ;;  %v4884_v57 = vcombine.low %v4852_v17, %v4867_v44  ;;  %v4885_v31 = vcombine.high %v4852_v17, %v4867_v44  ;;  %v4220_v45 = vpop.f32.mrb[52].mxu0 }
 0x95d   : > { %v4918_v54 = vrot.slane %v4904_v16, %v11785_v33  ;;  %v4933_v55 = vrot.slane %v4919_v10, %v11785_v33  ;;  %v4934_v56 = vcombine.low %v4911_v51, %v4926_v60  ;;  %v4935_v59 = vcombine.high %v4911_v51, %v4926_v60  ;;  %v4222_v28 = vpop.f32.mrb[53].mxu0 }
 0x95e   : > { %v4892_v1 = vrot.slane %v4884_v57, %v11795_v48  ;;  %v4899_v29 = vrot.slane %v4885_v31, %v11795_v48  ;;  %v5102_v5 = vcombine.low %v4876_v39, %v4883_v24  ;;  %v9296_v26 = vcombine.high %v4876_v39, %v4883_v24  ;;  %v4224_v6 = vpop.f32.mrb[54].mxu0 }
 0x95f   : > { %v4942_v12 = vrot.slane %v4934_v56, %v11795_v48  ;;  %v4949_v3 = vrot.slane %v4935_v59, %v11795_v48  ;;  %v4950_v38 = vcombine.low %v4918_v54, %v4933_v55  ;;  %v4951_v14 = vcombine.high %v4918_v54, %v4933_v55  ;;  %v4226_v15 = vpop.f32.mrb[55].mxu0 }
 0x960   : > { %v5109_v17 = vrot.slane %v5102_v5, %v11785_v33  ;;  %v5117_v61 = vrot.slane %v9296_v26, %v11785_v33  ;;  %v5118_v43 = vcombine.low %v4892_v1, %v4899_v29  ;;  %v9297_v44 = vcombine.high %v4892_v1, %v4899_v29 }
 0x961   : > { %v4958_v41 = vrot.slane %v4950_v38, %v11795_v48  ;;  %v4965_v37 = vrot.slane %v4951_v14, %v11795_v48  ;;  %v5152_v16 = vcombine.low %v4942_v12, %v4949_v3  ;;  %v9298_v51 = vcombine.high %v4942_v12, %v4949_v3 }
 0x962   : > { %v5125_v10 = vrot.slane %v5118_v43, %v11785_v33  ;;  %v5133_v60 = vrot.slane %v9297_v44, %v11785_v33  ;;  %v5134_v39 = vcombine.low %v5109_v17, %v5117_v61  ;;  %v4221_v24 = vadd.f32 %v4220_v45, %v12330_v23 }
 0x963   : > { %v5159_v57 = vrot.slane %v5152_v16, %v11785_v33  ;;  %v5167_v31 = vrot.slane %v9298_v51, %v11785_v33  ;;  %v5168_v54 = vcombine.low %v4958_v41, %v4965_v37  ;;  %v9299_v55 = vcombine.high %v4958_v41, %v4965_v37 }
 0x964   : > { %v4970_v56 = vcombine.high %v4221_v24, %v11102_v63  ;;  %v4977_v59 = vrot.slane %v4221_v24, %v11785_v33  ;;  %v4223_v1 = vadd.f32 %v4222_v28, %v12334_v35  ;;  %v4225_v29 = vadd.f32 %v4224_v6, %v12330_v23 }
 0x965   : > { %v5175_v5 = vrot.slane %v5168_v54, %v11785_v33  ;;  %v5183_v26 = vrot.slane %v9299_v55, %v11785_v33  ;;  %v5184_v12 = vcombine.low %v5159_v57, %v5167_v31  ;;  %v4227_v45 = vadd.f32 %v4226_v15, %v12334_v35 }
 0x966   : > { %v4984_v3 = vrot.slane %v4970_v56, %v11785_v33  ;;  %v4985_v38 = vcombine.high %v4223_v1, %v11102_v63  ;;  %v4992_v14 = vrot.slane %v4223_v1, %v11785_v33  ;;  %v5036_v17 = vcombine.high %v4225_v29, %v11102_v63 }
 0x967   : > { %v5043_v61 = vrot.slane %v4225_v29, %v11785_v33  ;;  %v5051_v28 = vcombine.high %v4227_v45, %v11102_v63  ;;  %v5058_v23 = vrot.slane %v4227_v45, %v11785_v33  ;;  %v12452_v6 = vrot.slane %v5134_v39, %v11795_v48 }
 0x968   : > { %v4999_v43 = vrot.slane %v4985_v38, %v11785_v33  ;;  %v5000_v35 = vcombine.low %v4977_v59, %v4992_v14  ;;  %v5001_v15 = vcombine.high %v4977_v59, %v4992_v14  ;;  %v5050_v44 = vrot.slane %v5036_v17, %v11785_v33 }
 0x969   : > { %v5065_v41 = vrot.slane %v5051_v28, %v11785_v33  ;;  %v5066_v37 = vcombine.low %v5043_v61, %v5058_v23  ;;  %v5067_v16 = vcombine.high %v5043_v61, %v5058_v23  ;;  %v5142_v51 = vcombine.low %v5125_v10, %v5133_v60 }
 0x96a   : > { %v5008_v24 = vrot.slane %v5000_v35, %v11795_v48  ;;  %v5015_v57 = vrot.slane %v5001_v15, %v11795_v48  ;;  %v5016_v31 = vcombine.low %v4984_v3, %v4999_v43  ;;  %v5017_v54 = vcombine.high %v4984_v3, %v4999_v43 }
 0x96b   : > { %v5074_v39 = vrot.slane %v5066_v37, %v11795_v48  ;;  %v5081_v55 = vrot.slane %v5067_v16, %v11795_v48  ;;  %v5082_v56 = vcombine.low %v5050_v44, %v5065_v41  ;;  %v5083_v1 = vcombine.high %v5050_v44, %v5065_v41 }
 0x96c   : > { %v5024_v59 = vrot.slane %v5016_v31, %v11795_v48  ;;  %v5031_v29 = vrot.slane %v5017_v54, %v11795_v48  ;;  %v5202_v45 = vcombine.low %v5008_v24, %v5015_v57  ;;  %v9300_v38 = vcombine.high %v5008_v24, %v5015_v57 }
 0x96d   : > { %v5090_v10 = vrot.slane %v5082_v56, %v11795_v48  ;;  %v5097_v60 = vrot.slane %v5083_v1, %v11795_v48  ;;  %v5252_v14 = vcombine.low %v5074_v39, %v5081_v55  ;;  %v9302_v17 = vcombine.high %v5074_v39, %v5081_v55 }
 0x96e   : > { %v5209_v3 = vrot.slane %v5202_v45, %v11785_v33  ;;  %v5217_v61 = vrot.slane %v9300_v38, %v11785_v33  ;;  %v5218_v28 = vcombine.low %v5024_v59, %v5031_v29  ;;  %v9301_v23 = vcombine.high %v5024_v59, %v5031_v29 }
 0x96f   : > { %v5259_v43 = vrot.slane %v5252_v14, %v11785_v33  ;;  %v5267_v35 = vrot.slane %v9302_v17, %v11785_v33  ;;  %v5268_v15 = vcombine.low %v5090_v10, %v5097_v60  ;;  %v9303_v44 = vcombine.high %v5090_v10, %v5097_v60 }
 0x970   : > { %v5225_v41 = vrot.slane %v5218_v28, %v11785_v33  ;;  %v5233_v37 = vrot.slane %v9301_v23, %v11785_v33  ;;  %v5234_v16 = vcombine.low %v5209_v3, %v5217_v61  ;;  %v5149_v24 = vrot.slane %v5142_v51, %v11795_v48 }
 0x971   : > { %v5275_v57 = vrot.slane %v5268_v15, %v11785_v33  ;;  %v5283_v31 = vrot.slane %v9303_v44, %v11785_v33  ;;  %v5284_v54 = vcombine.low %v5259_v43, %v5267_v35  ;;  %v5191_v39 = vrot.slane %v5184_v12, %v11795_v48 }
 0x972   : > { %v5150_v55 = vcombine.low %v12452_v6, %v5149_v24  ;;  %v5192_v56 = vcombine.low %v5175_v5, %v5183_v26  ;;  %v5241_v1 = vrot.slane %v5234_v16, %v11795_v48  ;;  %v5242_v59 = vcombine.low %v5225_v41, %v5233_v37 }
 0x973   : > { %v5291_v29 = vrot.slane %v5284_v54, %v11795_v48  ;;  %v5292_v45 = vcombine.low %v5275_v57, %v5283_v31  ;;  %v5151_v38 = vcombine.high %v12452_v6, %v5149_v24  ;;  %v4782_v51 = vcombine.low %v12393_v2, %v12414_v47 }
 0x974   : > { %v5199_v10 = vrot.slane %v5192_v56, %v11795_v48  ;;  %v5249_v60 = vrot.slane %v5242_v59, %v11795_v48  ;;  %v4831_v5 = vrot.slane %v4824_v13, %v11795_v48  ;;  %v4733_v26 = vcombine.high %v12354_v30, %v12359_v52 }
 0x975   : > { %v5299_v12 = vrot.slane %v5292_v45, %v11795_v48  ;;  %v4783_v6 = vcombine.high %v12393_v2, %v12414_v47 }
 0x976   : > { %v5200_v14 = vcombine.low %v5191_v39, %v5199_v10  ;;  %v5250_v17 = vcombine.low %v5241_v1, %v5249_v60  ;;  %v5201_v3 = vcombine.high %v5191_v39, %v5199_v10  ;;  %v4832_v61 = vcombine.low %v12398_v11, %v4831_v5 }
 0x977   : > { %v5300_v28 = vcombine.low %v5291_v29, %v5299_v12  ;;  %v4836_v23 = vpack.c.bf16 %v4733_v26, %v4683_v20  ;;  %v5251_v4 = vcombine.high %v5241_v1, %v5249_v60  ;;  %v5301_v46 = vcombine.high %v5291_v29, %v5299_v12  ;;  %v4351_v20 = vpop.f32.mrb[24].mxu1 }
 0x978   : > { %v5302_v13 = vpack.c.bf16 %v5200_v14, %v5150_v55  ;;  %v5304_v43 = vpack.c.bf16 %v5201_v3, %v5151_v38  ;;  %v4835_v30 = vpack.c.bf16 %v4832_v61, %v4782_v51  ;;  %v4833_v52 = vcombine.high %v12398_v11, %v4831_v5  ;;  %v12522_v11 = vld [vmem:[%s13054_s1 + $0x18] sm:$0xff]  ;;  %v4353_v44 = vpop.f32.mrb[25].mxu1 }
 0x979   : > { %v5303_v35 = vpack.c.bf16 %v5300_v28, %v5250_v17  ;;  %v5305_v15 = vpack.c.bf16 %v5301_v46, %v5251_v4  ;;  %v4236_v47 = vrot.slane %v12522_v11, %v11763_v21  ;;  %v4355_v41 = vpop.f32.mrb[26].mxu1 }
 0x97a   : > { %9703 = vmatpush3.bf16.xpose.msra.mxu0 %v5302_v13  ;;  %v4837_v2 = vpack.c.bf16 %v4833_v52, %v4783_v6  ;;  %v4356_v57 = vadd.f32 %v4355_v41, %v12517_v8  ;;  %v4357_v31 = vpop.f32.mrb[27].mxu1 }
 0x97b   : > { %9714 = vmatprep.subr.bf16.mxu0 %v11102_v63  ;;  %9709 = vmatpush3.bf16.xpose.msra.mxu1 %v5303_v35  ;;  %v4354_v24 = vadd.f32 %v4353_v44, %v4236_v47  ;;  %v4358_v54 = vadd.f32 %v4357_v31, %v4236_v47  ;;  %v4361_v6 = vpop.f32.mrb[28].mxu1 }
 0x97c   : > { %9720 = vmatprep.subr.bf16.mxu1 %v11102_v63  ;;  %v5372_v1 = vcombine.high %v4356_v57, %v11102_v63  ;;  %v5379_v59 = vrot.slane %v4356_v57, %v11785_v33  ;;  %v4363_v28 = vpop.f32.mrb[29].mxu1 }
 0x97d   : > { %v5321_v55 = vcombine.high %v4354_v24, %v11102_v63  ;;  %v5328_v56 = vrot.slane %v4354_v24, %v11785_v33  ;;  %v5387_v29 = vcombine.high %v4358_v54, %v11102_v63  ;;  %v5394_v45 = vrot.slane %v4358_v54, %v11785_v33 }
 0x97e   : > { %v5386_v60 = vrot.slane %v5372_v1, %v11785_v33 }
 0x97f   : > { %v5335_v38 = vrot.slane %v5321_v55, %v11785_v33  ;;  %v5401_v5 = vrot.slane %v5387_v29, %v11785_v33  ;;  %v5402_v26 = vcombine.low %v5379_v59, %v5394_v45  ;;  %v5403_v12 = vcombine.high %v5379_v59, %v5394_v45 }
 0x980   : > { %v4362_v29 = vadd.f32 %v4361_v6, %v12517_v8 }
 0x981   : > { %9705 = vmatmul.mubr.bf16.vlgmr.msra.gmra.mrb[56].mxu0 %v12410_v40  ;;  %v4352_v40 = vadd.f32 %v4351_v20, %v12517_v8  ;;  %v5417_v4 = vrot.slane %v5403_v12, %v11795_v48  ;;  %v5418_v46 = vcombine.low %v5386_v60, %v5401_v5  ;;  %v5419_v13 = vcombine.high %v5386_v60, %v5401_v5 }
 0x982   : > { %9715 = vmatpush3.bf16.xpose.msra.mxu0 %v5304_v43  ;;  %9716 = vmatprep.mubr.msk.bf16.mxu0 %vm11103_vm0, %v11102_v63  ;;  %v4365_v43 = vpop.f32.mrb[30].mxu1  ;;  %v5445_v60 = vrot.slane %v4362_v29, %v11785_v33 }
 0x983   : > { %9711 = vmatmul.mubr.bf16.vlgmr.msra.gmra.mrb[32].mxu1 %v4835_v30  ;;  %9726 = vmatprep.subr.bf16.mxu0 %v11102_v63  ;;  %v5306_v37 = vcombine.high %v4352_v40, %v11102_v63  ;;  %v5313_v16 = vrot.slane %v4352_v40, %v11785_v33  ;;  %v5426_v20 = vrot.slane %v5418_v46, %v11795_v48 }
 0x984   : > { %9721 = vmatpush3.bf16.xpose.msra.mxu1 %v5305_v15  ;;  %9722 = vmatprep.mubr.msk.bf16.mxu1 %vm11103_vm0, %v11102_v63  ;;  %v5433_v40 = vrot.slane %v5419_v13, %v11795_v48  ;;  %v4366_v5 = vadd.f32 %v4365_v43, %v12517_v8 }
 0x985   : > { %9732 = vmatprep.subr.bf16.mxu1 %v11102_v63  ;;  %v5320_v39 = vrot.slane %v5306_v37, %v11785_v33  ;;  %v5336_v51 = vcombine.low %v5313_v16, %v5328_v56  ;;  %v5337_v10 = vcombine.high %v5313_v16, %v5328_v56 }
 0x986   : > { %v9307_v55 = vcombine.high %v5426_v20, %v5433_v40 }
 0x987   : > { %v5344_v14 = vrot.slane %v5336_v51, %v11795_v48  ;;  %v5351_v17 = vrot.slane %v5337_v10, %v11795_v48  ;;  %v5352_v3 = vcombine.low %v5320_v39, %v5335_v38  ;;  %v5353_v61 = vcombine.high %v5320_v39, %v5335_v38 }
 0x988   : > { %v5636_v39 = vcombine.low %v5426_v20, %v5433_v40  ;;  %v4364_v51 = vadd.f32 %v4363_v28, %v4236_v47  ;;  %v5438_v10 = vcombine.high %v4362_v29, %v11102_v63  ;;  %v5651_v12 = vrot.slane %v9307_v55, %v11785_v33 }
 0x989   : > { %9717 = vmatmul.mubr.bf16.vlgmr.msra.gmra.mrb[60].mxu0 %v4836_v23  ;;  %v5410_v23 = vrot.slane %v5402_v26, %v11795_v48  ;;  %v5360_v30 = vrot.slane %v5352_v3, %v11795_v48  ;;  %v5367_v52 = vrot.slane %v5353_v61, %v11795_v48  ;;  %v5570_v35 = vcombine.low %v5344_v14, %v5351_v17 }
 0x98a   : > { %9728 = vmatprep.mubr.msk.bf16.mxu0 %vm11103_vm0, %v11102_v63  ;;  %v9304_v15 = vcombine.high %v5344_v14, %v5351_v17  ;;  %v5643_v45 = vrot.slane %v5636_v39, %v11785_v33  ;;  %v5453_v14 = vcombine.high %v4364_v51, %v11102_v63  ;;  %v5460_v17 = vrot.slane %v4364_v51, %v11785_v33 }
 0x98b   : > { %9723 = vmatmul.mubr.bf16.vlgmr.msra.gmra.mrb[36].mxu1 %v4837_v2  ;;  %v4367_v2 = vpop.f32.mrb[31].mxu1  ;;  %v5620_v44 = vcombine.low %v5410_v23, %v5417_v4  ;;  %v9306_v41 = vcombine.high %v5410_v23, %v5417_v4  ;;  %v5577_v37 = vrot.slane %v5570_v35, %v11785_v33  ;;  %v5586_v24 = vcombine.low %v5360_v30, %v5367_v52 }
 0x98c   : > { %9734 = vmatprep.mubr.msk.bf16.mxu1 %vm11103_vm0, %v11102_v63  ;;  %v5585_v16 = vrot.slane %v9304_v15, %v11785_v33  ;;  %v9305_v57 = vcombine.high %v5360_v30, %v5367_v52  ;;  %v4368_v26 = vadd.f32 %v4367_v2, %v4236_v47  ;;  %v5452_v3 = vrot.slane %v5438_v10, %v11785_v33 }
 0x98d   : > { %v12551_v31 = vrot.slane %v5620_v44, %v11785_v33  ;;  %v12554_v54 = vrot.slane %v9306_v41, %v11785_v33  ;;  %v5593_v56 = vrot.slane %v5586_v24, %v11785_v33  ;;  %v5504_v61 = vcombine.high %v4366_v5, %v11102_v63 }
 0x98e   : > { %v5601_v1 = vrot.slane %v9305_v57, %v11785_v33  ;;  %v5602_v59 = vcombine.low %v5577_v37, %v5585_v16  ;;  %v5511_v28 = vrot.slane %v4366_v5, %v11785_v33  ;;  %v5519_v23 = vcombine.high %v4368_v26, %v11102_v63 }
 0x98f   : > { %v5652_v38 = vcombine.low %v12551_v31, %v12554_v54  ;;  %v5467_v4 = vrot.slane %v5453_v14, %v11785_v33  ;;  %v5468_v46 = vcombine.low %v5445_v60, %v5460_v17  ;;  %v5469_v8 = vcombine.high %v5445_v60, %v5460_v17 }
 0x990   : > { %v5610_v6 = vcombine.low %v5593_v56, %v5601_v1  ;;  %v5526_v47 = vrot.slane %v4368_v26, %v11785_v33  ;;  %v5518_v13 = vrot.slane %v5504_v61, %v11785_v33  ;;  %v5533_v43 = vrot.slane %v5519_v23, %v11785_v33 }
 0x991   : > { %v5609_v30 = vrot.slane %v5602_v59, %v11795_v48  ;;  %v5476_v35 = vrot.slane %v5468_v46, %v11795_v48  ;;  %v5483_v15 = vrot.slane %v5469_v8, %v11795_v48  ;;  %v5484_v2 = vcombine.low %v5452_v3, %v5467_v4 }
 0x992   : > { %v5617_v52 = vrot.slane %v5610_v6, %v11795_v48  ;;  %v5485_v20 = vcombine.high %v5452_v3, %v5467_v4  ;;  %v5534_v40 = vcombine.low %v5511_v28, %v5526_v47  ;;  %v5535_v44 = vcombine.high %v5511_v28, %v5526_v47 }
 0x993   : > { %v5550_v41 = vcombine.low %v5518_v13, %v5533_v43  ;;  %v5551_v37 = vcombine.high %v5518_v13, %v5533_v43  ;;  %v5492_v16 = vrot.slane %v5484_v2, %v11795_v48  ;;  %v5670_v57 = vcombine.low %v5476_v35, %v5483_v15 }
 0x994   : > { %v5499_v24 = vrot.slane %v5485_v20, %v11795_v48  ;;  %v9308_v31 = vcombine.high %v5476_v35, %v5483_v15  ;;  %v5542_v54 = vrot.slane %v5534_v40, %v11795_v48  ;;  %v5549_v39 = vrot.slane %v5535_v44, %v11795_v48 }
 0x995   : > { %v5558_v55 = vrot.slane %v5550_v41, %v11795_v48  ;;  %v5565_v56 = vrot.slane %v5551_v37, %v11795_v48  ;;  %v5677_v1 = vrot.slane %v5670_v57, %v11785_v33  ;;  %v5618_v3 = vcombine.low %v5609_v30, %v5617_v52 }
 0x996   : > { %v5685_v59 = vrot.slane %v9308_v31, %v11785_v33  ;;  %v5686_v29 = vcombine.low %v5492_v16, %v5499_v24  ;;  %v9309_v51 = vcombine.high %v5492_v16, %v5499_v24  ;;  %v5720_v10 = vcombine.low %v5542_v54, %v5549_v39 }
 0x997   : > { %v9310_v60 = vcombine.high %v5542_v54, %v5549_v39  ;;  %v5736_v5 = vcombine.low %v5558_v55, %v5565_v56  ;;  %v9311_v26 = vcombine.high %v5558_v55, %v5565_v56  ;;  %v5659_v46 = vrot.slane %v5652_v38, %v11795_v48  ;;  %v9313_v39 = vld [vmem:[%s854_s17 + $0x1] ss:$0 sm:$0xff] }
 0x998   : > { %v5693_v14 = vrot.slane %v5686_v29, %v11785_v33  ;;  %v5701_v17 = vrot.slane %v9309_v51, %v11785_v33  ;;  %v5702_v6 = vcombine.low %v5677_v1, %v5685_v59  ;;  %v5727_v61 = vrot.slane %v5720_v10, %v11785_v33 }
 0x999   : > { %v5735_v28 = vrot.slane %v9310_v60, %v11785_v33  ;;  %v5743_v23 = vrot.slane %v5736_v5, %v11785_v33  ;;  %v5751_v4 = vrot.slane %v9311_v26, %v11785_v33  ;;  %v5660_v8 = vcombine.low %v5643_v45, %v5651_v12 }
 0x99a   : > { %v5709_v47 = vrot.slane %v5702_v6, %v11795_v48  ;;  %v5710_v13 = vcombine.low %v5693_v14, %v5701_v17  ;;  %v5619_v45 = vcombine.high %v5609_v30, %v5617_v52 }
 0x99b   : > { %v5752_v43 = vcombine.low %v5727_v61, %v5735_v28  ;;  %v5760_v35 = vcombine.low %v5743_v23, %v5751_v4  ;;  %v5667_v15 = vrot.slane %v5660_v8, %v11795_v48 }
 0x99c   : > { %v5717_v2 = vrot.slane %v5710_v13, %v11795_v48 }
 0x99d   : > { %v5759_v20 = vrot.slane %v5752_v43, %v11795_v48  ;;  %v5767_v40 = vrot.slane %v5760_v35, %v11795_v48  ;;  %v5668_v44 = vcombine.low %v5659_v46, %v5667_v15  ;;  %v5669_v12 = vcombine.high %v5659_v46, %v5667_v15  ;;  %v9312_v48 = vld [vmem:[%s854_s17] ss:$0 sm:$0xff]  ;;  %s11106_s17 = smov [#allocation25]  }
 0x99e   : > { %v5718_v41 = vcombine.low %v5709_v47, %v5717_v2  ;;  %v5719_v24 = vcombine.high %v5709_v47, %v5717_v2  ;;  %s10983_s19 = sshll.u32 %s11106_s17, 4  ;;  %s10984_s19 = int_to_ptr.vmem [resolvable:$false] %s10983_s19 }
 0x99f   : > { %v5768_v33 = vcombine.low %v5759_v20, %v5767_v40  ;;  %v5770_v37 = vpack.c.bf16 %v5668_v44, %v5618_v3  ;;  %v12602_v16 = vpack.c.bf16 %v5669_v12, %v5619_v45  ;;  %v5769_v57 = vcombine.high %v5759_v20, %v5767_v40  ;;  %s10985_s20 = scalar_lea.vmem %s10984_s19, 2048  ;;  %p10986_p4 = scmp.lt.s32.totalorder %s12887_s11, %s10984_s19 }
 0x9a0   : > { %p10987_p12 = scmp.lt.s32.totalorder %s10985_s20, %s10979_s24 }
 0x9a1   : > { %v5771_v38 = vpack.c.bf16 %v5768_v33, %v5718_v41  ;;  %9727 = vmatpush3.bf16.msra.mxu0 %v5770_v37  ;;  %v12604_v31 = vpack.c.bf16 %v5769_v57, %v5719_v24 }
 0x9a2   : > { %9738 = vmatprep.subr.bf16.mxu0 %v11102_v63  ;;  %p10988_p2 = por %p10987_p12, %p10986_p4 }
 0x9a3   : > { %9733 = vmatpush3.bf16.msra.mxu1 %v5771_v38 }
 0x9a4   : > { %9744 = vmatprep.subr.bf16.mxu1 %v11102_v63  ;;  %p10989_p11 = pnand %p10988_p2, %p10982_p13 }
 0xa54   : > { %v5808_v54 = vpop.f32.mrb[56].mxu0 }
 0xa55   : > { %v5950_v55 = vadd.f32 %v9312_v48, %v5808_v54  ;;  %v9706_v56 = vpop.f32.mrb[57].mxu0 }
 0xa56   : > { %v5811_v30 = vpop.f32.mrb[58].mxu0  ;;  %v5849_v52 = vpop.f32.mrb[32].mxu1 }
 0xa57   : > { %v5951_v1 = vadd.f32 %v9312_v48, %v5811_v30  ;;  %v9707_v59 = vpop.f32.mrb[59].mxu0  ;;  %v5958_v29 = vsel %vm3087_vm1, %v5950_v55, -inf  ;;  %v5952_v51 = vadd.f32 %v9313_v39, %v5849_v52  ;;  %v9712_v10 = vpop.f32.mrb[33].mxu1 }
 0xa58   : > { %5959 = vmax.xlane.f32.xlu0 %v5958_v29  ;;  %v5852_v60 = vpop.f32.mrb[34].mxu1 }
 0xa59   : > { %v5961_v5 = vsel %vm3087_vm1, %v5951_v1, -inf  ;;  %v5953_v26 = vadd.f32 %v9313_v39, %v5852_v60  ;;  %v9713_v14 = vpop.f32.mrb[35].mxu1  ;;  %v5964_v17 = vsel %vm3087_vm1, %v5952_v51, -inf }
 0xa5a   : > { %5962 = vmax.xlane.f32.xlu1 %v5961_v5 }
 0xa5b   : > { %v5967_v6 = vsel %vm3087_vm1, %v5953_v26, -inf }
 0xa5c   : > { %v5890_v3 = vpop.f32.mrb[60].mxu0  ;;  %5965 = vmax.xlane.f32.xlu0 %v5964_v17 }
 0xa5d   : > { %v5954_v61 = vadd.f32 %v9312_v48, %v5890_v3  ;;  %v9718_v28 = vpop.f32.mrb[61].mxu0 }
 0xa5e   : > { %v5893_v23 = vpop.f32.mrb[62].mxu0  ;;  %5968 = vmax.xlane.f32.xlu1 %v5967_v6  ;;  %v5931_v4 = vpop.f32.mrb[36].mxu1 }
 0xa5f   : > { %v5955_v46 = vadd.f32 %v9312_v48, %v5893_v23  ;;  %v9719_v8 = vpop.f32.mrb[63].mxu0  ;;  %v5970_v47 = vsel %vm3087_vm1, %v5954_v61, -inf  ;;  %v5956_v13 = vadd.f32 %v9313_v39, %v5931_v4  ;;  %v9724_v43 = vpop.f32.mrb[37].mxu1 }
 0xa60   : > { %5971 = vmax.xlane.f32.xlu0 %v5970_v47  ;;  %v5934_v35 = vpop.f32.mrb[38].mxu1 }
 0xa61   : > { %v5973_v15 = vsel %vm3087_vm1, %v5955_v46, -inf  ;;  %v5957_v2 = vadd.f32 %v9313_v39, %v5934_v35  ;;  %v9725_v20 = vpop.f32.mrb[39].mxu1  ;;  %v5976_v40 = vsel %vm3087_vm1, %v5956_v13, -inf }
 0xa62   : > { %5974 = vmax.xlane.f32.xlu1 %v5973_v15 }
 0xa63   : > { %v5979_v44 = vsel %vm3087_vm1, %v5957_v2, -inf }
 0xa64   : > { %5977 = vmax.xlane.f32.xlu0 %v5976_v40 }
 0xa66   : > { %5980 = vmax.xlane.f32.xlu1 %v5979_v44 }
 0xae5   : > { %v5960_v41 = vpop.xlane.xlu0 %5959 }
 0xae6   : > { %v5982_v33 = vsub.f32 %v5950_v55, %v5960_v41 }
 0xae7   : > { %v5963_v37 = vpop.xlane.xlu1 %5962 }
 0xae8   : > { %v5990_v38 = vmul.f32 1.442695, %v5982_v33  ;;  %v5983_v45 = vsub.f32 %v5951_v1, %v5963_v37 }
 0xae9   : > { %v5966_v12 = vpop.xlane.xlu0 %5965 }
 0xaea   : > { %10517 = vpow2.f32 %v5990_v38  ;;  %v5992_v24 = vmul.f32 1.442695, %v5983_v45  ;;  %v5984_v57 = vsub.f32 %v5952_v51, %v5966_v12 }
 0xaeb   : > { %v5969_v48 = vpop.xlane.xlu1 %5968 }
 0xaec   : > { %10519 = vpow2.f32 %v5992_v24  ;;  %v5994_v54 = vmul.f32 1.442695, %v5984_v57  ;;  %v5985_v39 = vsub.f32 %v5953_v26, %v5969_v48 }
 0xaed   : > { %v5972_v56 = vpop.xlane.xlu0 %5971 }
 0xaee   : > { %10521 = vpow2.f32 %v5994_v54  ;;  %v5996_v30 = vmul.f32 1.442695, %v5985_v39  ;;  %v5986_v52 = vsub.f32 %v5954_v61, %v5972_v56 }
 0xaef   : > { %v5975_v59 = vpop.xlane.xlu1 %5974 }
 0xaf0   : > { %10523 = vpow2.f32 %v5996_v30  ;;  %v5998_v29 = vmul.f32 1.442695, %v5986_v52  ;;  %v5987_v10 = vsub.f32 %v5955_v46, %v5975_v59  ;;  %v10239_v30 = vld [vmem:[#allocation20 + $0x4] ss:$8 sps:$4 sm:$0xff]  }
 0xaf1   : > { %v5978_v55 = vpop.xlane.xlu0 %5977 }
 0xaf2   : > { %10525 = vpow2.f32 %v5998_v29  ;;  %v6000_v60 = vmul.f32 1.442695, %v5987_v10  ;;  %v5988_v1 = vsub.f32 %v5956_v13, %v5978_v55 }
 0xaf3   : > { %v5981_v5 = vpop.xlane.xlu1 %5980 }
 0xaf4   : > { %v10518_v14 = vpop.eup %10517  ;;  %10527 = vpow2.f32 %v6000_v60  ;;  %v6002_v51 = vmul.f32 1.442695, %v5988_v1  ;;  %v5989_v17 = vsub.f32 %v5957_v2, %v5981_v5 }
 0xaf5   : > { %v6006_v6 = vsel %vm3087_vm1, %v10518_v14, 0.0 }
 0xaf6   : > { %v10520_v26 = vpop.eup %10519  ;;  %10529 = vpow2.f32 %v6002_v51  ;;  %6007 = vadd.xlane.f32.xlu0 %v6006_v6  ;;  %v6004_v3 = vmul.f32 1.442695, %v5989_v17  ;;  %v10237_v51 = vld [vmem:[#allocation20] ss:$8 sps:$4 sm:$0xff]   ;;  %v10242_v6 = vld [vmem:[#allocation20 + $0x14] ss:$8 sps:$4 sm:$0xff]  }
 0xaf7   : > { %v6009_v61 = vsel %vm3087_vm1, %v10520_v26, 0.0 }
 0xaf8   : > { %v10522_v28 = vpop.eup %10521  ;;  %10531 = vpow2.f32 %v6004_v3  ;;  %6010 = vadd.xlane.f32.xlu1 %v6009_v61  ;;  %v10240_v61 = vld [vmem:[#allocation20 + $0x10] ss:$8 sps:$4 sm:$0xff]  }
 0xaf9   : > { %v6012_v23 = vsel %vm3087_vm1, %v10522_v28, 0.0 }
 0xafa   : > { %v10524_v4 = vpop.eup %10523  ;;  %6013 = vadd.xlane.f32.xlu0 %v6012_v23  ;;  %v10245_v23 = vld [vmem:[#allocation20 + $0x24] ss:$8 sps:$4 sm:$0xff]  }
 0xafb   : > { %v6015_v46 = vsel %vm3087_vm1, %v10524_v4, 0.0 }
 0xafc   : > { %v10526_v8 = vpop.eup %10525  ;;  %6016 = vadd.xlane.f32.xlu1 %v6015_v46  ;;  %v10251_v46 = vld [vmem:[#allocation20 + $0x44] ss:$8 sps:$4 sm:$0xff]  }
 0xafd   : > { %v6018_v47 = vsel %vm3087_vm1, %v10526_v8, 0.0 }
 0xafe   : > { %v10528_v13 = vpop.eup %10527  ;;  %6019 = vadd.xlane.f32.xlu0 %v6018_v47  ;;  %v10254_v47 = vld [vmem:[#allocation20 + $0x54] ss:$8 sps:$4 sm:$0xff]  }
 0xaff   : > { %v6021_v43 = vsel %vm3087_vm1, %v10528_v13, 0.0 }
 0xb00   : > { %v10530_v35 = vpop.eup %10529  ;;  %6022 = vadd.xlane.f32.xlu1 %v6021_v43  ;;  %v10257_v43 = vld [vmem:[#allocation20 + $0x64] ss:$8 sps:$4 sm:$0xff]  }
 0xb01   : > { %v6024_v15 = vsel %vm3087_vm1, %v10530_v35, 0.0 }
 0xb02   : > { %v10532_v2 = vpop.eup %10531  ;;  %6025 = vadd.xlane.f32.xlu0 %v6024_v15  ;;  %v10258_v15 = vld [vmem:[#allocation20 + $0x70] ss:$8 sps:$4 sm:$0xff]  }
 0xb03   : > { %v6027_v20 = vsel %vm3087_vm1, %v10532_v2, 0.0 }
 0xb04   : > { %6028 = vadd.xlane.f32.xlu1 %v6027_v20  ;;  %v10263_v20 = vld [vmem:[#allocation20 + $0x84] ss:$8 sps:$4 sm:$0xff]  }
 0xb83   : > { %v6008_v40 = vpop.xlane.xlu0 %6007 }
 0xb84   : > { %10533 = vrcp.f32 %v6008_v40 }
 0xb85   : > { %v6011_v44 = vpop.xlane.xlu1 %6010 }
 0xb86   : > { %10535 = vrcp.f32 %v6011_v44 }
 0xb87   : > { %v6014_v41 = vpop.xlane.xlu0 %6013 }
 0xb88   : > { %10537 = vrcp.f32 %v6014_v41 }
 0xb89   : > { %v6017_v33 = vpop.xlane.xlu1 %6016 }
 0xb8a   : > { %10539 = vrcp.f32 %v6017_v33  ;;  %v10261_v33 = vld [vmem:[#allocation20 + $0x80] ss:$8 sps:$4 sm:$0xff]  }
 0xb8b   : > { %v6020_v37 = vpop.xlane.xlu0 %6019 }
 0xb8c   : > { %10541 = vrcp.f32 %v6020_v37 }
 0xb8d   : > { %v6023_v38 = vpop.xlane.xlu1 %6022 }
 0xb8e   : > { %v10534_v45 = vpop.eup %10533  ;;  %10543 = vrcp.f32 %v6023_v38 }
 0xb8f   : > { %v6026_v12 = vpop.xlane.xlu0 %6025  ;;  %v6038_v57 = vmul.f32 %v10534_v45, %v10518_v14  ;;  %v10266_v45 = vld [vmem:[#allocation20 + $0x94] ss:$8 sps:$4 sm:$0xff]  }
 0xb90   : > { %v10536_v24 = vpop.eup %10535  ;;  %10545 = vrcp.f32 %v6026_v12 }
 0xb91   : > { %v6039_v48 = vmul.f32 %v10536_v24, %v10520_v26  ;;  %v6029_v54 = vpop.xlane.xlu1 %6028 }
 0xb92   : > { %v10538_v39 = vpop.eup %10537  ;;  %10547 = vrcp.f32 %v6029_v54 }
 0xb93   : > { %v6046_v56 = vpack.c.bf16 %v6039_v48, %v6038_v57  ;;  %v6040_v59 = vmul.f32 %v10538_v39, %v10522_v28  ;;  %v10264_v57 = vld [vmem:[#allocation20 + $0x90] ss:$8 sps:$4 sm:$0xff]  }
 0xb94   : > { %v10540_v52 = vpop.eup %10539 }
 0xb95   : > { %v6041_v29 = vmul.f32 %v10540_v52, %v10524_v4  ;;  %9729 = vmatmul.mubr.msk.bf16.vlgmr.msra.gmra.mrb[64].mxu0 %vm3087_vm1, %v6046_v56  ;;  %v10246_v4 = vld [vmem:[#allocation20 + $0x30] ss:$8 sps:$4 sm:$0xff]   ;;  %v10269_v56 = vld [vmem:[#allocation20 + $0xa4] ss:$8 sps:$4 sm:$0xff]  }
 0xb96   : > { %v10542_v10 = vpop.eup %10541  ;;  %9739 = vmatpush3.bf16.msra.mxu0 %v12602_v16  ;;  %9740 = vmatprep.mubr.msk.bf16.mxu0 %vm11103_vm0, %v11102_v63 }
 0xb97   : > { %v6047_v55 = vpack.c.bf16 %v6041_v29, %v6040_v59  ;;  %6316 = vmatprep.subr.bf16.mxu0 %v10239_v30  ;;  %v6042_v1 = vmul.f32 %v10542_v10, %v10526_v8  ;;  %v10249_v8 = vld [vmem:[#allocation20 + $0x40] ss:$8 sps:$4 sm:$0xff]  }
 0xb98   : > { %v10544_v60 = vpop.eup %10543  ;;  %v10267_v59 = vld [vmem:[#allocation20 + $0xa0] ss:$8 sps:$4 sm:$0xff]  }
 0xb99   : > { %v6043_v5 = vmul.f32 %v10544_v60, %v10528_v13  ;;  %9735 = vmatmul.mubr.msk.bf16.vlgmr.msra.gmra.mrb[40].mxu1 %vm3087_vm1, %v6047_v55  ;;  %v10252_v13 = vld [vmem:[#allocation20 + $0x50] ss:$8 sps:$4 sm:$0xff]   ;;  %v10272_v60 = vld [vmem:[#allocation20 + $0xb4] ss:$8 sps:$4 sm:$0xff]  }
 0xb9a   : > { %v10546_v14 = vpop.eup %10545  ;;  %9745 = vmatpush3.bf16.msra.mxu1 %v12604_v31  ;;  %9746 = vmatprep.mubr.msk.bf16.mxu1 %vm11103_vm0, %v11102_v63  ;;  %v10243_v31 = vld [vmem:[#allocation20 + $0x20] ss:$8 sps:$4 sm:$0xff]   ;;  %v10248_v63 = vld [vmem:[#allocation20 + $0x34] ss:$8 sps:$4 sm:$0xff]  }
 0xb9b   : > { %v6048_v17 = vpack.c.bf16 %v6043_v5, %v6042_v1  ;;  %v6044_v26 = vmul.f32 %v10546_v14, %v10530_v35  ;;  %v10255_v35 = vld [vmem:[#allocation20 + $0x60] ss:$8 sps:$4 sm:$0xff]   ;;  %v10270_v14 = vld [vmem:[#allocation20 + $0xb0] ss:$8 sps:$4 sm:$0xff]  }
 0xb9c   : > { %v10548_v16 = vpop.eup %10547 }
 0xb9d   : > { %v6045_v3 = vmul.f32 %v10548_v16, %v10532_v2  ;;  %9741 = vmatmul.mubr.msk.bf16.vlgmr.msra.gmra.mrb[68].mxu0 %vm3087_vm1, %v6048_v17  ;;  %v10260_v2 = vld [vmem:[#allocation20 + $0x74] ss:$8 sps:$4 sm:$0xff]   ;;  %v10275_v16 = vld [vmem:[#allocation20 + $0xc4] ss:$8 sps:$4 sm:$0xff]  }
 0xb9e   : > { %6317 = vmatpush1.bf16.msra.mxu0 %v10237_v51  ;;  %6348 = vmatprep.mubr.bf16.mxu0 %v11101_v0 }
 0xb9f   : > { %v6049_v28 = vpack.c.bf16 %v6045_v3, %v6044_v26  ;;  %6318 = vmatprep.subr.bf16.mxu0 %v10242_v6  ;;  %v10273_v26 = vld [vmem:[#allocation20 + $0xc0] ss:$8 sps:$4 sm:$0xff]   ;;  %v10278_v3 = vld [vmem:[#allocation20 + $0xd4] ss:$8 sps:$4 sm:$0xff]  }
 0xba1   : > { %9747 = vmatmul.mubr.msk.bf16.vlgmr.msra.gmra.mrb[44].mxu1 %vm3087_vm1, %v6049_v28  ;;  %v10281_v28 = vld [vmem:[#allocation20 + $0xe4] ss:$8 sps:$4 sm:$0xff]  }
 0xba2   : > { %6319 = vmatpush1.bf16.msra.mxu0 %v10240_v61  ;;  %v10276_v61 = vld [vmem:[#allocation20 + $0xd0] ss:$8 sps:$4 sm:$0xff]  }
 0xba3   : > { %6320 = vmatprep.subr.bf16.mxu0 %v10245_v23  ;;  %v10279_v23 = vld [vmem:[#allocation20 + $0xe0] ss:$8 sps:$4 sm:$0xff]  }
 0xba6   : > { %6321 = vmatpush1.bf16.msra.mxu0 %v10243_v31  ;;  %v10284_v31 = vld [vmem:[#allocation20 + $0xf4] ss:$8 sps:$4 sm:$0xff]  }
 0xba7   : > { %6322 = vmatprep.subr.bf16.mxu0 %v10248_v63  ;;  %v10282_v63 = vld [vmem:[#allocation20 + $0xf0] ss:$8 sps:$4 sm:$0xff]  }
 0xbaa   : > { %6323 = vmatpush1.bf16.msra.mxu0 %v10246_v4  ;;  %v6231_v4 = vrot.slane %v12513_v34, %v11806_v62 }
 0xbab   : > { %6324 = vmatprep.subr.bf16.mxu0 %v10251_v46  ;;  %v6235_v46 = vrot.slane %v12522_v11, %v11806_v62 }
 0xbae   : > { %6325 = vmatpush1.bf16.msra.mxu0 %v10249_v8 }
 0xbaf   : > { %6326 = vmatprep.subr.bf16.mxu0 %v10254_v47 }
 0xbb2   : > { %6327 = vmatpush1.bf16.msra.mxu0 %v10252_v13 }
 0xbb3   : > { %6328 = vmatprep.subr.bf16.mxu0 %v10257_v43 }
 0xbb6   : > { %6329 = vmatpush1.bf16.msra.mxu0 %v10255_v35 }
 0xbb7   : > { %6330 = vmatprep.subr.bf16.mxu0 %v10260_v2 }
 0xbba   : > { %6331 = vmatpush1.bf16.msra.mxu0 %v10258_v15 }
 0xbbb   : > { %6451 = vmatprep.subr.bf16.mxu0 %v10263_v20 }
 0xc68   : > { %v6087_v40 = vpop.f32.mrb[64].mxu0 }
 0xc69   : > { %v9730_v44 = vpop.f32.mrb[65].mxu0 }
 0xc6a   : > { %v6090_v41 = vpop.f32.mrb[66].mxu0 }
 0xc6b   : > { %v6226_v37 = vpack.c.bf16 %v6090_v41, %v6087_v40  ;;  %v9731_v38 = vpop.f32.mrb[67].mxu0 }
 0xc6c   : > { %v6131_v12 = vpop.f32.mrb[40].mxu1 }
 0xc6d   : > { %6349 = vmatmul.mubr.bf16.vlgmr.msra.gmra.mrb[72].mxu0 %v6226_v37  ;;  %v9736_v24 = vpop.f32.mrb[41].mxu1 }
 0xc6e   : > { %6452 = vmatpush1.bf16.msra.mxu0 %v10261_v33  ;;  %v6134_v48 = vpop.f32.mrb[42].mxu1  ;;  %6358 = vmatprep.mubr.bf16.mxu0 %v11101_v0 }
 0xc6f   : > { %6453 = vmatprep.subr.bf16.mxu0 %v10266_v45  ;;  %v6227_v54 = vpack.c.bf16 %v6134_v48, %v6131_v12  ;;  %v9737_v39 = vpop.f32.mrb[43].mxu1 }
 0xc70   : > { %v6175_v30 = vpop.f32.mrb[68].mxu0  ;;  %v6616_v39 = vld [vmem:[#allocation22] sm:$0xff] }
 0xc71   : > { %v9742_v52 = vpop.f32.mrb[69].mxu0 }
 0xc72   : > { %6454 = vmatpush1.bf16.msra.mxu0 %v10264_v57  ;;  %v6178_v29 = vpop.f32.mrb[70].mxu0 }
 0xc73   : > { %6455 = vmatprep.subr.bf16.mxu0 %v10269_v56  ;;  %v6369_v10 = vpack.c.bf16 %v6178_v29, %v6175_v30  ;;  %v9743_v55 = vpop.f32.mrb[71].mxu0  ;;  %v6620_v56 = vld [vmem:[#allocation22 + $0x20] sm:$0xff]  ;;  %v6617_v30 = vld [vmem:[#allocation22 + $0x8] sm:$0xff] }
 0xc74   : > { %v6219_v1 = vpop.f32.mrb[44].mxu1  ;;  %v9351_v52 = vcombine.high %v6616_v39, %v6620_v56  ;;  %v6624_v29 = vld [vmem:[#allocation22 + $0x40] sm:$0xff] }
 0xc75   : > { %6359 = vmatmul.mubr.bf16.gmra.mrb[76].mxu0 %v6227_v54  ;;  %v9748_v5 = vpop.f32.mrb[45].mxu1 }
 0xc76   : > { %6456 = vmatpush1.bf16.msra.mxu0 %v10267_v59  ;;  %v6222_v51 = vpop.f32.mrb[46].mxu1  ;;  %6483 = vmatprep.mubr.bf16.mxu0 %v11101_v0  ;;  %v6621_v59 = vld [vmem:[#allocation22 + $0x28] sm:$0xff]  ;;  %v6632_v5 = vld [vmem:[#allocation22 + $0x80] sm:$0xff] }
 0xc77   : > { %6457 = vmatprep.subr.bf16.mxu0 %v10272_v60  ;;  %v6370_v17 = vpack.c.bf16 %v6222_v51, %v6219_v1  ;;  %v9749_v6 = vpop.f32.mrb[47].mxu1  ;;  %v9353_v55 = vcombine.high %v6617_v30, %v6621_v59  ;;  %v6625_v60 = vld [vmem:[#allocation22 + $0x48] sm:$0xff]  ;;  %7430 = vmatprep.subr.bf16.mxu1 %v9351_v52  ;;  %v6636_v51 = vld [vmem:[#allocation22 + $0xa0] sm:$0xff] }
 0xc78   : > { %v6629_v1 = vld [vmem:[#allocation22 + $0x68] sm:$0xff] }
 0xc79   : > { %v6637_v6 = vld [vmem:[#allocation22 + $0xa8] sm:$0xff] }
 0xc7a   : > { %6458 = vmatpush1.bf16.msra.mxu0 %v10270_v14  ;;  %v9361_v14 = vcombine.high %v6625_v60, %v6629_v1 }
 0xc7b   : > { %6459 = vmatprep.subr.bf16.mxu0 %v10275_v16 }
 0xc7e   : > { %6460 = vmatpush1.bf16.msra.mxu0 %v10273_v26  ;;  %v9360_v26 = vcombine.low %v6625_v60, %v6629_v1 }
 0xc7f   : > { %6461 = vmatprep.subr.bf16.mxu0 %v10278_v3  ;;  %v9367_v3 = vcombine.high %v6632_v5, %v6636_v51 }
 0xc82   : > { %6462 = vmatpush1.bf16.msra.mxu0 %v10276_v61 }
 0xc83   : > { %6463 = vmatprep.subr.bf16.mxu0 %v10281_v28  ;;  %v6640_v28 = vld [vmem:[#allocation22 + $0xc0] sm:$0xff] }
 0xc86   : > { %6464 = vmatpush1.bf16.msra.mxu0 %v10279_v23  ;;  %v6644_v23 = vld [vmem:[#allocation22 + $0xe0] sm:$0xff] }
 0xc87   : > { %6465 = vmatprep.subr.bf16.mxu0 %v10284_v31  ;;  %v6641_v31 = vld [vmem:[#allocation22 + $0xc8] sm:$0xff] }
 0xc8a   : > { %6466 = vmatpush1.bf16.msra.mxu0 %v10282_v63  ;;  %v6645_v63 = vld [vmem:[#allocation22 + $0xe8] sm:$0xff] }
 0xc8b   : > { %7483 = vmatprep.subr.bf16.mxu0 %v9353_v55  ;;  %v6677_v55 = vld [vmem:[#allocation22 + $0x1e8] sm:$0xff] }
 0xc8d   : > { %6484 = vmatmul.mubr.bf16.vlgmr.msra.gmra.mrb[72].mxu0 %v6369_v10  ;;  %v9352_v10 = vcombine.low %v6617_v30, %v6621_v59 }
 0xc8e   : > { %6493 = vmatprep.mubr.bf16.mxu0 %v11101_v0 }
 0xc8f   : > { %7484 = vmatpush1.bf16.msra.mxu0 %v9352_v10  ;;  %v6673_v10 = vld [vmem:[#allocation22 + $0x1c8] sm:$0xff] }
 0xc90   : > { %7485 = vmatprep.subr.bf16.mxu0 %v9361_v14  ;;  %v6680_v14 = vld [vmem:[#allocation22 + $0x200] sm:$0xff] }
 0xc93   : > { %7486 = vmatpush1.bf16.msra.mxu0 %v9360_v26  ;;  %v9408_v26 = vcombine.low %v6673_v10, %v6677_v55 }
 0xc95   : > { %6494 = vmatmul.mubr.bf16.gmra.mrb[76].mxu0 %v6370_v17  ;;  %v6633_v17 = vld [vmem:[#allocation22 + $0x88] sm:$0xff] }
 0xc96   : > { %v9369_v61 = vcombine.high %v6633_v17, %v6637_v6 }
 0xc98   : > { %7487 = vmatprep.subr.bf16.mxu0 %v9369_v61 }
 0xd60   : > { %v6485_v8 = vpop.f32.mrb[72].mxu0 }
 0xd61   : > { %v9758_v47 = vadd.f32 %v6485_v8, %v6231_v4  ;;  %v6487_v13 = vpop.f32.mrb[73].mxu0  ;;  %v9375_v8 = vcombine.high %v6640_v28, %v6644_v23 }
 0xd62   : > { %v9759_v43 = vadd.f32 %v6487_v13, %v6235_v46  ;;  %v6489_v35 = vpop.f32.mrb[74].mxu0  ;;  %v6648_v13 = vld [vmem:[#allocation22 + $0x100] sm:$0xff] }
 0xd63   : > { %v12645_v15 = vadd.f32 %v9758_v47, %v12245_v19  ;;  %v9760_v2 = vadd.f32 %v6489_v35, %v6231_v4  ;;  %v6491_v20 = vpop.f32.mrb[75].mxu0  ;;  %v9377_v47 = vcombine.high %v6641_v31, %v6645_v63  ;;  %v6649_v35 = vld [vmem:[#allocation22 + $0x108] sm:$0xff] }
 0xd64   : > { %v12648_v40 = vadd.f32 %v9759_v43, %v12241_v49  ;;  %v9761_v0 = vadd.f32 %v6491_v20, %v6235_v46  ;;  %v6652_v43 = vld [vmem:[#allocation22 + $0x120] sm:$0xff]  ;;  %v9374_v20 = vcombine.low %v6640_v28, %v6644_v23 }
 0xd65   : > { %v12651_v44 = vadd.f32 %v9760_v2, %v12247_v27  ;;  %v6653_v2 = vld [vmem:[#allocation22 + $0x128] sm:$0xff]  ;;  %v6688_v28 = vld [vmem:[#allocation22 + $0x240] sm:$0xff] }
 0xd66   : > { %v12654_v34 = vadd.f32 %v9761_v0, %v12243_v18  ;;  %v6520_v11 = vadd.f32 %v12648_v40, %v12645_v15  ;;  %v9376_v0 = vcombine.low %v6641_v31, %v6645_v63  ;;  %v6692_v23 = vld [vmem:[#allocation22 + $0x260] sm:$0xff]  ;;  %v6689_v31 = vld [vmem:[#allocation22 + $0x248] sm:$0xff] }
 0xd67   : > { %v6693_v63 = vld [vmem:[#allocation22 + $0x268] sm:$0xff] }
 0xd68   : > { %6521 = vadd.xlane.f32.xlu0 %v6520_v11  ;;  %v6495_v41 = vpop.f32.mrb[76].mxu0  ;;  %v6523_v19 = vadd.f32 %v12654_v34, %v12651_v44  ;;  %v9383_v11 = vcombine.high %v6648_v13, %v6652_v43 }
 0xd69   : > { %v9762_v33 = vadd.f32 %v6495_v41, %v6231_v4  ;;  %v6497_v37 = vpop.f32.mrb[77].mxu0  ;;  %v9385_v41 = vcombine.high %v6649_v35, %v6653_v2 }
 0xd6a   : > { %v9763_v38 = vadd.f32 %v6497_v37, %v6235_v46  ;;  %6524 = vadd.xlane.f32.xlu1 %v6523_v19  ;;  %v6499_v49 = vpop.f32.mrb[78].mxu0  ;;  %v6656_v19 = vld [vmem:[#allocation22 + $0x140] sm:$0xff]  ;;  %v6657_v37 = vld [vmem:[#allocation22 + $0x148] sm:$0xff] }
 0xd6b   : > { %v12661_v45 = vadd.f32 %v9762_v33, %v12261_v36  ;;  %v9764_v27 = vadd.f32 %v6499_v49, %v6231_v4  ;;  %v6501_v12 = vpop.f32.mrb[79].mxu0  ;;  %v9366_v4 = vcombine.low %v6632_v5, %v6636_v51  ;;  %v6660_v33 = vld [vmem:[#allocation22 + $0x160] sm:$0xff]  ;;  %v9382_v49 = vcombine.low %v6648_v13, %v6652_v43 }
 0xd6c   : > { %v12664_v18 = vadd.f32 %v9763_v38, %v12257_v58  ;;  %v9765_v24 = vadd.f32 %v6501_v12, %v6235_v46  ;;  %v9350_v58 = vcombine.low %v6616_v39, %v6620_v56  ;;  %v9368_v46 = vcombine.low %v6633_v17, %v6637_v6  ;;  %v6661_v38 = vld [vmem:[#allocation22 + $0x168] sm:$0xff]  ;;  %v6684_v51 = vld [vmem:[#allocation22 + $0x220] sm:$0xff] }
 0xd6d   : > { %v12667_v57 = vadd.f32 %v9764_v27, %v12263_v9  ;;  %v6628_v9 = vld [vmem:[#allocation22 + $0x60] sm:$0xff]  ;;  %v9384_v27 = vcombine.low %v6649_v35, %v6653_v2  ;;  %v9391_v12 = vcombine.high %v6656_v19, %v6660_v33  ;;  %v6665_v39 = vld [vmem:[#allocation22 + $0x188] sm:$0xff]  ;;  %v9390_v30 = vcombine.low %v6656_v19, %v6660_v33 }
 0xd6e   : > { %v12670_v48 = vadd.f32 %v9765_v24, %v12259_v42  ;;  %v6526_v54 = vadd.f32 %v12664_v18, %v12661_v45  ;;  %v9359_v42 = vcombine.high %v6624_v29, %v6628_v9  ;;  %7431 = vmatpush1.bf16.msra.mxu1 %v9350_v58  ;;  %v9358_v16 = vcombine.low %v6624_v29, %v6628_v9  ;;  %v6669_v56 = vld [vmem:[#allocation22 + $0x1a8] sm:$0xff]  ;;  %v6672_v29 = vld [vmem:[#allocation22 + $0x1c0] sm:$0xff] }
 0xd6f   : > { %7488 = vmatpush1.bf16.msra.mxu0 %v9368_v46  ;;  %v9393_v24 = vcombine.high %v6657_v37, %v6661_v38  ;;  %v9392_v58 = vcombine.low %v6657_v37, %v6661_v38  ;;  %v9401_v59 = vcombine.high %v6665_v39, %v6669_v56  ;;  %v6676_v9 = vld [vmem:[#allocation22 + $0x1e0] sm:$0xff]  ;;  %v9400_v60 = vcombine.low %v6665_v39, %v6669_v56  ;;  %v6681_v17 = vld [vmem:[#allocation22 + $0x208] sm:$0xff] }
 0xd70   : > { %6527 = vadd.xlane.f32.xlu0 %v6526_v54  ;;  %v6529_v36 = vadd.f32 %v12670_v48, %v12667_v57  ;;  %7432 = vmatprep.subr.bf16.mxu1 %v9359_v42  ;;  %v6664_v54 = vld [vmem:[#allocation22 + $0x180] sm:$0xff]  ;;  %v9407_v1 = vcombine.high %v6672_v29, %v6676_v9  ;;  %v9409_v5 = vcombine.high %v6673_v10, %v6677_v55  ;;  %v6685_v6 = vld [vmem:[#allocation22 + $0x228] sm:$0xff] }
 0xd71   : > { %7489 = vmatprep.subr.bf16.mxu0 %v9377_v47  ;;  %v9417_v61 = vcombine.high %v6681_v17, %v6685_v6  ;;  %v9416_v46 = vcombine.low %v6681_v17, %v6685_v6  ;;  %v9425_v47 = vcombine.high %v6689_v31, %v6693_v63  ;;  %v9422_v13 = vcombine.low %v6688_v28, %v6692_v23  ;;  %v6701_v55 = vld [vmem:[#allocation22 + $0x2a8] sm:$0xff] }
 0xd72   : > { %6530 = vadd.xlane.f32.xlu1 %v6529_v36  ;;  %7433 = vmatpush1.bf16.msra.mxu1 %v9358_v16  ;;  %v6668_v36 = vld [vmem:[#allocation22 + $0x1a0] sm:$0xff]  ;;  %v9406_v16 = vcombine.low %v6672_v29, %v6676_v9  ;;  %v9424_v43 = vcombine.low %v6689_v31, %v6693_v63  ;;  %v6709_v17 = vld [vmem:[#allocation22 + $0x2e8] sm:$0xff] }
 0xd73   : > { %7434 = vmatprep.subr.bf16.mxu1 %v9367_v3  ;;  %7490 = vmatpush1.bf16.msra.mxu0 %v9376_v0  ;;  %v9399_v52 = vcombine.high %v6664_v54, %v6668_v36  ;;  %v9398_v42 = vcombine.low %v6664_v54, %v6668_v36  ;;  %v9415_v3 = vcombine.high %v6680_v14, %v6684_v51  ;;  %v6700_v29 = vld [vmem:[#allocation22 + $0x2a0] sm:$0xff]  ;;  %v6717_v63 = vld [vmem:[#allocation22 + $0x328] sm:$0xff] }
 0xd74   : > { %7491 = vmatprep.subr.bf16.mxu0 %v9385_v41 }
 0xd76   : > { %7435 = vmatpush1.bf16.msra.mxu1 %v9366_v4  ;;  %v9414_v4 = vcombine.low %v6680_v14, %v6684_v51  ;;  %v6705_v14 = vld [vmem:[#allocation22 + $0x2c8] sm:$0xff] }
 0xd77   : > { %7436 = vmatprep.subr.bf16.mxu1 %v9375_v8  ;;  %7492 = vmatpush1.bf16.msra.mxu0 %v9384_v27  ;;  %v9423_v8 = vcombine.high %v6688_v28, %v6692_v23  ;;  %v6713_v28 = vld [vmem:[#allocation22 + $0x308] sm:$0xff] }
 0xd78   : > { %7493 = vmatprep.subr.bf16.mxu0 %v9393_v24 }
 0xd7a   : > { %7437 = vmatpush1.bf16.msra.mxu1 %v9374_v20 }
 0xd7b   : > { %7438 = vmatprep.subr.bf16.mxu1 %v9383_v11  ;;  %7494 = vmatpush1.bf16.msra.mxu0 %v9392_v58 }
 0xd7c   : > { %7495 = vmatprep.subr.bf16.mxu0 %v9401_v59 }
 0xd7e   : > { %7439 = vmatpush1.bf16.msra.mxu1 %v9382_v49 }
 0xd7f   : > { %7440 = vmatprep.subr.bf16.mxu1 %v9391_v12  ;;  %7496 = vmatpush1.bf16.msra.mxu0 %v9400_v60 }
 0xd80   : > { %7497 = vmatprep.subr.bf16.mxu0 %v9409_v5  ;;  %v6708_v5 = vld [vmem:[#allocation22 + $0x2e0] sm:$0xff] }
 0xd82   : > { %7441 = vmatpush1.bf16.msra.mxu1 %v9390_v30 }
 0xd83   : > { %7442 = vmatprep.subr.bf16.mxu1 %v9399_v52  ;;  %7498 = vmatpush1.bf16.msra.mxu0 %v9408_v26  ;;  %v9440_v26 = vcombine.low %v6705_v14, %v6709_v17 }
 0xd84   : > { %7499 = vmatprep.subr.bf16.mxu0 %v9417_v61  ;;  %v6716_v61 = vld [vmem:[#allocation22 + $0x320] sm:$0xff] }
 0xd86   : > { %7443 = vmatpush1.bf16.msra.mxu1 %v9398_v42 }
 0xd87   : > { %7444 = vmatprep.subr.bf16.mxu1 %v9407_v1  ;;  %7500 = vmatpush1.bf16.msra.mxu0 %v9416_v46  ;;  %v6704_v1 = vld [vmem:[#allocation22 + $0x2c0] sm:$0xff]  ;;  %v9449_v46 = vcombine.high %v6713_v28, %v6717_v63 }
 0xd88   : > { %7501 = vmatprep.subr.bf16.mxu0 %v9425_v47  ;;  %v9439_v51 = vcombine.high %v6704_v1, %v6708_v5  ;;  %v9438_v6 = vcombine.low %v6704_v1, %v6708_v5  ;;  %v6724_v47 = vld [vmem:[#allocation22 + $0x360] sm:$0xff] }
 0xd8a   : > { %7445 = vmatpush1.bf16.msra.mxu1 %v9406_v16  ;;  %v9441_v16 = vcombine.high %v6705_v14, %v6709_v17 }
 0xd8b   : > { %7446 = vmatprep.subr.bf16.mxu1 %v9415_v3  ;;  %7502 = vmatpush1.bf16.msra.mxu0 %v9424_v43  ;;  %v6712_v3 = vld [vmem:[#allocation22 + $0x300] sm:$0xff] }
 0xd8c   : > { %v9446_v23 = vcombine.low %v6712_v3, %v6716_v61  ;;  %v9447_v31 = vcombine.high %v6712_v3, %v6716_v61 }
 0xd8e   : > { %7447 = vmatpush1.bf16.msra.mxu1 %v9414_v4  ;;  %v9448_v4 = vcombine.low %v6713_v28, %v6717_v63 }
 0xd8f   : > { %7448 = vmatprep.subr.bf16.mxu1 %v9423_v8  ;;  %v6720_v8 = vld [vmem:[#allocation22 + $0x340] sm:$0xff] }
 0xd90   : > { %v9455_v43 = vcombine.high %v6720_v8, %v6724_v47 }
 0xd92   : > { %7449 = vmatpush1.bf16.msra.mxu1 %v9422_v13  ;;  %v6721_v13 = vld [vmem:[#allocation22 + $0x348] sm:$0xff] }
 0xdf5   : > { %v6522_v35 = vpop.xlane.xlu0 %6521 }
 0xdf6   : > { %v6532_v2 = vmul.f32 0.00390625, %v6522_v35  ;;  %v6725_v35 = vld [vmem:[#allocation22 + $0x368] sm:$0xff] }
 0xdf7   : > { %v6525_v20 = vpop.xlane.xlu1 %6524 }
 0xdf8   : > { %v12677_v0 = vsub.f32 %v12645_v15, %v6532_v2  ;;  %v12680_v11 = vsub.f32 %v12648_v40, %v6532_v2  ;;  %v6533_v41 = vmul.f32 0.00390625, %v6525_v20  ;;  %v6728_v2 = vld [vmem:[#allocation22 + $0x380] sm:$0xff] }
 0xdf9   : > { %v6732_v20 = vld [vmem:[#allocation22 + $0x3a0] sm:$0xff] }
 0xdfa   : > { %v12683_v19 = vsub.f32 %v12651_v44, %v6533_v41  ;;  %v12686_v33 = vsub.f32 %v12654_v34, %v6533_v41  ;;  %v6544_v37 = vmul.f32 %v12677_v0, %v12677_v0  ;;  %v6545_v38 = vmul.f32 %v12680_v11, %v12680_v11 }
 0xdfb   : > { %v9454_v41 = vcombine.low %v6720_v8, %v6724_v47 }
 0xdfc   : > { %v6552_v49 = vadd.f32 %v6545_v38, %v6544_v37  ;;  %v6546_v15 = vmul.f32 %v12683_v19, %v12683_v19  ;;  %v6547_v40 = vmul.f32 %v12686_v33, %v12686_v33  ;;  %v9457_v37 = vcombine.high %v6721_v13, %v6725_v35  ;;  %v6729_v38 = vld [vmem:[#allocation22 + $0x388] sm:$0xff] }
 0xdfd   : > { %v6528_v27 = vpop.xlane.xlu0 %6527 }
 0xdfe   : > { %v6534_v12 = vmul.f32 0.00390625, %v6528_v27  ;;  %6553 = vadd.xlane.f32.xlu0 %v6552_v49  ;;  %v6555_v44 = vadd.f32 %v6547_v40, %v6546_v15  ;;  %v6733_v49 = vld [vmem:[#allocation22 + $0x3a8] sm:$0xff]  ;;  %v9456_v15 = vcombine.low %v6721_v13, %v6725_v35  ;;  %v9463_v40 = vcombine.high %v6728_v2, %v6732_v20  ;;  %v6736_v27 = vld [vmem:[#allocation22 + $0x3c0] sm:$0xff] }
 0xdff   : > { %v6531_v24 = vpop.xlane.xlu1 %6530 }
 0xe00   : > { %v12697_v34 = vsub.f32 %v12661_v45, %v6534_v12  ;;  %v12700_v54 = vsub.f32 %v12664_v18, %v6534_v12  ;;  %v6535_v36 = vmul.f32 0.00390625, %v6531_v24  ;;  %6556 = vadd.xlane.f32.xlu1 %v6555_v44  ;;  %v6740_v12 = vld [vmem:[#allocation22 + $0x3e0] sm:$0xff]  ;;  %v9465_v44 = vcombine.high %v6729_v38, %v6733_v49  ;;  %v12716_v24 = vld [vmem:[#allocation22 + $0x10] sm:$0xff] }
 0xe02   : > { %v12703_v39 = vsub.f32 %v12667_v57, %v6535_v36  ;;  %v12706_v56 = vsub.f32 %v12670_v48, %v6535_v36  ;;  %v6548_v30 = vmul.f32 %v12697_v34, %v12697_v34  ;;  %v6549_v58 = vmul.f32 %v12700_v54, %v12700_v54  ;;  %v6696_v57 = vld [vmem:[#allocation22 + $0x280] sm:$0xff]  ;;  %v6697_v48 = vld [vmem:[#allocation22 + $0x288] sm:$0xff]  ;;  %v12718_v36 = vld [vmem:[#allocation22 + $0x30] sm:$0xff] }
 0xe03   : > { %v9430_v9 = vcombine.low %v6696_v57, %v6700_v29  ;;  %v9431_v10 = vcombine.high %v6696_v57, %v6700_v29  ;;  %v9432_v42 = vcombine.low %v6697_v48, %v6701_v55  ;;  %v9433_v60 = vcombine.high %v6697_v48, %v6701_v55 }
 0xe04   : > { %v6558_v52 = vadd.f32 %v6549_v58, %v6548_v30  ;;  %v6550_v45 = vmul.f32 %v12703_v39, %v12703_v39  ;;  %v6551_v18 = vmul.f32 %v12706_v56, %v12706_v56  ;;  %v12720_v30 = vld [vmem:[#allocation22 + $0x18] sm:$0xff]  ;;  %v6737_v58 = vld [vmem:[#allocation22 + $0x3c8] sm:$0xff]  ;;  %v9464_v29 = vcombine.low %v6729_v38, %v6733_v49 }
 0xe05   : > { %7450 = vmatprep.subr.bf16.mxu1 %v9431_v10  ;;  %7503 = vmatprep.subr.bf16.mxu0 %v9433_v60  ;;  %v9471_v48 = vcombine.high %v6736_v27, %v6740_v12  ;;  %v9470_v10 = vcombine.low %v6736_v27, %v6740_v12 }
 0xe06   : > { %6559 = vadd.xlane.f32.xlu0 %v6558_v52  ;;  %v6561_v59 = vadd.f32 %v6551_v18, %v6550_v45  ;;  %7451 = vmatpush1.bf16.msra.mxu1 %v9430_v9  ;;  %v6741_v52 = vld [vmem:[#allocation22 + $0x3e8] sm:$0xff]  ;;  %v9354_v45 = vcombine.low %v12716_v24, %v12718_v36  ;;  %v12724_v18 = vld [vmem:[#allocation22 + $0x38] sm:$0xff] }
 0xe07   : > { %7504 = vmatpush1.bf16.msra.mxu0 %v9432_v42  ;;  %7452 = vmatprep.subr.bf16.mxu1 %v9439_v51  ;;  %v9356_v57 = vcombine.low %v12720_v30, %v12724_v18  ;;  %v9473_v9 = vcombine.high %v6737_v58, %v6741_v52  ;;  %v9472_v55 = vcombine.low %v6737_v58, %v6741_v52  ;;  %v6627_v58 = vld [vmem:[#allocation22 + $0x58] sm:$0xff] }
 0xe08   : > { %6562 = vadd.xlane.f32.xlu1 %v6561_v59  ;;  %7505 = vmatprep.subr.bf16.mxu0 %v9441_v16  ;;  %v9462_v59 = vcombine.low %v6728_v2, %v6732_v20  ;;  %v9355_v42 = vcombine.high %v12716_v24, %v12718_v36  ;;  %v9357_v60 = vcombine.high %v12720_v30, %v12724_v18  ;;  %v6631_v52 = vld [vmem:[#allocation22 + $0x78] sm:$0xff]  ;;  %v6642_v24 = vld [vmem:[#allocation22 + $0xd0] sm:$0xff] }
 0xe09   : > { %v6643_v30 = vld [vmem:[#allocation22 + $0xd8] sm:$0xff] }
 0xe0a   : > { %7453 = vmatpush1.bf16.msra.mxu1 %v9438_v6  ;;  %v6647_v18 = vld [vmem:[#allocation22 + $0xf8] sm:$0xff] }
 0xe0b   : > { %7506 = vmatpush1.bf16.msra.mxu0 %v9440_v26  ;;  %7454 = vmatprep.subr.bf16.mxu1 %v9447_v31  ;;  %v10575_v31 = vld [vmem:[%s13054_s1 + $0x18] sm:$0xff] }
 0xe0c   : > { %7507 = vmatprep.subr.bf16.mxu0 %v9449_v46  ;;  %v6591_v63 = vrot.slane %v10575_v31, %v12007_v53  ;;  %v6607_v35 = vrot.slane %v10575_v31, %v12135_v50 }
 0xe0e   : > { %7455 = vmatpush1.bf16.msra.mxu1 %v9446_v23 }
 0xe0f   : > { %7508 = vmatpush1.bf16.msra.mxu0 %v9448_v4  ;;  %7456 = vmatprep.subr.bf16.mxu1 %v9455_v43  ;;  %v10576_v4 = vld [vmem:[%s13054_s1 + $0x10] sm:$0xff] }
 0xe10   : > { %7509 = vmatprep.subr.bf16.mxu0 %v9457_v37  ;;  %v6587_v46 = vrot.slane %v10576_v4, %v12007_v53  ;;  %v6603_v2 = vrot.slane %v10576_v4, %v12135_v50  ;;  %v6650_v4 = vld [vmem:[#allocation22 + $0x110] sm:$0xff] }
 0xe12   : > { %7457 = vmatpush1.bf16.msra.mxu1 %v9454_v41 }
 0xe13   : > { %7510 = vmatpush1.bf16.msra.mxu0 %v9456_v15  ;;  %7458 = vmatprep.subr.bf16.mxu1 %v9463_v40  ;;  %v6626_v40 = vld [vmem:[#allocation22 + $0x50] sm:$0xff] }
 0xe14   : > { %7511 = vmatprep.subr.bf16.mxu0 %v9465_v44  ;;  %v6630_v44 = vld [vmem:[#allocation22 + $0x70] sm:$0xff] }
 0xe16   : > { %7459 = vmatpush1.bf16.msra.mxu1 %v9462_v59 }
 0xe17   : > { %7512 = vmatpush1.bf16.msra.mxu0 %v9464_v29  ;;  %7460 = vmatprep.subr.bf16.mxu1 %v9471_v48 }
 0xe18   : > { %7513 = vmatprep.subr.bf16.mxu0 %v9473_v9 }
 0xe1a   : > { %7461 = vmatpush1.bf16.msra.mxu1 %v9470_v10  ;;  %v9363_v10 = vcombine.high %v6626_v40, %v6630_v44 }
 0xe1b   : > { %7514 = vmatpush1.bf16.msra.mxu0 %v9472_v55  ;;  %7536 = vmatprep.subr.bf16.mxu1 %v9355_v42  ;;  %v9365_v55 = vcombine.high %v6627_v58, %v6631_v52  ;;  %v6634_v42 = vld [vmem:[#allocation22 + $0x90] sm:$0xff] }
 0xe1c   : > { %7589 = vmatprep.subr.bf16.mxu0 %v9357_v60 }
 0xe8b   : > { %v6554_v1 = vpop.xlane.xlu0 %6553 }
 0xe8c   : > { %v6564_v5 = vmul.f32 0.00390625, %v6554_v1 }
 0xe8d   : > { %v6557_v14 = vpop.xlane.xlu1 %6556 }
 0xe8e   : > { %v6568_v51 = vadd.f32 1e-06, %v6564_v5  ;;  %v6565_v17 = vmul.f32 0.00390625, %v6557_v14  ;;  %v6638_v5 = vld [vmem:[#allocation22 + $0xb0] sm:$0xff]  ;;  %v6639_v14 = vld [vmem:[#allocation22 + $0xb8] sm:$0xff] }
 0xe8f   : > { %v9370_v36 = vcombine.low %v6634_v42, %v6638_v5 }
 0xe90   : > { %10549 = vrsqrt.f32 %v6568_v51  ;;  %v6569_v6 = vadd.f32 1e-06, %v6565_v17  ;;  %v9362_v51 = vcombine.low %v6626_v40, %v6630_v44 }
 0xe92   : > { %10551 = vrsqrt.f32 %v6569_v6 }
 0xe93   : > { %v6560_v16 = vpop.xlane.xlu0 %6559 }
 0xe94   : > { %v6566_v26 = vmul.f32 0.00390625, %v6560_v16  ;;  %v9371_v16 = vcombine.high %v6634_v42, %v6638_v5  ;;  %v6679_v5 = vld [vmem:[#allocation22 + $0x1f8] sm:$0xff] }
 0xe95   : > { %v6563_v3 = vpop.xlane.xlu1 %6562 }
 0xe96   : > { %v6570_v61 = vadd.f32 1e-06, %v6566_v26  ;;  %v6567_v28 = vmul.f32 0.00390625, %v6563_v3 }
 0xe98   : > { %10553 = vrsqrt.f32 %v6570_v61  ;;  %v6571_v23 = vadd.f32 1e-06, %v6567_v28 }
 0xe9a   : > { %v10550_v8 = vpop.eup %10549  ;;  %10555 = vrsqrt.f32 %v6571_v23 }
 0xe9b   : > { %v6576_v47 = vmul.f32 %v10550_v8, %v12677_v0  ;;  %v6577_v13 = vmul.f32 %v10550_v8, %v12680_v11  ;;  %v9381_v8 = vcombine.high %v6643_v30, %v6647_v18 }
 0xe9c   : > { %v10552_v43 = vpop.eup %10551 }
 0xe9d   : > { %v6578_v20 = vmul.f32 %v10552_v43, %v12683_v19  ;;  %v6579_v41 = vmul.f32 %v10552_v43, %v12686_v33  ;;  %v6593_v37 = vmul.f32 %v6591_v63, %v6577_v13  ;;  %v6592_v38 = vmul.f32 %v6587_v46, %v6576_v47  ;;  %v6654_v47 = vld [vmem:[#allocation22 + $0x130] sm:$0xff]  ;;  %v6651_v13 = vld [vmem:[#allocation22 + $0x118] sm:$0xff] }
 0xe9e   : > { %v6655_v43 = vld [vmem:[#allocation22 + $0x138] sm:$0xff]  ;;  %v9386_v40 = vcombine.low %v6650_v4, %v6654_v47 }
 0xe9f   : > { %v6595_v49 = vmul.f32 %v6591_v63, %v6579_v41  ;;  %v6594_v15 = vmul.f32 %v6587_v46, %v6578_v20  ;;  %v12746_v27 = vadd.f32 %v6607_v35, %v6593_v37  ;;  %v12750_v0 = vadd.f32 %v6603_v2, %v6592_v38  ;;  %v6658_v37 = vld [vmem:[#allocation22 + $0x150] sm:$0xff] }
 0xea0   : > { %v9387_v20 = vcombine.high %v6650_v4, %v6654_v47  ;;  %v9389_v41 = vcombine.high %v6651_v13, %v6655_v43  ;;  %v6662_v38 = vld [vmem:[#allocation22 + $0x170] sm:$0xff]  ;;  %v9388_v44 = vcombine.low %v6651_v13, %v6655_v43  ;;  %v6695_v4 = vld [vmem:[#allocation22 + $0x278] sm:$0xff] }
 0xea1   : > { %v12748_v12 = vadd.f32 %v6607_v35, %v6595_v49  ;;  %v12752_v11 = vadd.f32 %v6603_v2, %v6594_v15  ;;  %v6659_v49 = vld [vmem:[#allocation22 + $0x158] sm:$0xff]  ;;  %v6698_v43 = vld [vmem:[#allocation22 + $0x290] sm:$0xff] }
 0xea2   : > { %v10554_v59 = vpop.eup %10553  ;;  %v6663_v15 = vld [vmem:[#allocation22 + $0x178] sm:$0xff] }
 0xea3   : > { %v6580_v19 = vmul.f32 %v10554_v59, %v12697_v34  ;;  %v6581_v33 = vmul.f32 %v10554_v59, %v12700_v54  ;;  %v6746_v29 = vpack.c.bf16 %v12748_v12, %v12746_v27  ;;  %v12760_v48 = vpack.c.bf16 %v12752_v11, %v12750_v0  ;;  %v6635_v54 = vld [vmem:[#allocation22 + $0x98] sm:$0xff]  ;;  %v6666_v59 = vld [vmem:[#allocation22 + $0x190] sm:$0xff] }
 0xea4   : > { %v10556_v9 = vpop.eup %10555  ;;  %v9373_v26 = vcombine.high %v6635_v54, %v6639_v14  ;;  %v9372_v31 = vcombine.low %v6635_v54, %v6639_v14 }
 0xea5   : > { %v6582_v60 = vmul.f32 %v10556_v9, %v12703_v39  ;;  %v6583_v1 = vmul.f32 %v10556_v9, %v12706_v56  ;;  %7462 = vmatprep.mubr.bf16.mxu1 %v6746_v29  ;;  %7515 = vmatprep.mubr.bf16.mxu0 %v6746_v29  ;;  %v6597_v34 = vmul.f32 %v6591_v63, %v6581_v33  ;;  %v6667_v33 = vld [vmem:[#allocation22 + $0x198] sm:$0xff] }
 0xea6   : > { %7463 = vmatmul.mubr.bf16.vlgmr.msra.gmra.mrb[48].mxu1 %v12760_v48  ;;  %7516 = vmatmul.mubr.bf16.vlgmr.msra.gmra.mrb[80].mxu0 %v12760_v48  ;;  %v6596_v17 = vmul.f32 %v6587_v46, %v6580_v19  ;;  %v9364_v39 = vcombine.low %v6627_v58, %v6631_v52  ;;  %v9395_v58 = vcombine.high %v6658_v37, %v6662_v38  ;;  %v6670_v19 = vld [vmem:[#allocation22 + $0x1b0] sm:$0xff] }
 0xea7   : > { %7537 = vmatpush1.bf16.msra.mxu1 %v9354_v45  ;;  %7590 = vmatpush1.bf16.msra.mxu0 %v9356_v57  ;;  %v6599_v56 = vmul.f32 %v6591_v63, %v6583_v1  ;;  %v6598_v6 = vmul.f32 %v6587_v46, %v6582_v60  ;;  %v12772_v3 = vadd.f32 %v6607_v35, %v6597_v34  ;;  %v6646_v45 = vld [vmem:[#allocation22 + $0xf0] sm:$0xff]  ;;  %v6675_v34 = vld [vmem:[#allocation22 + $0x1d8] sm:$0xff] }
 0xea8   : > { %7538 = vmatprep.subr.bf16.mxu1 %v9363_v10  ;;  %7591 = vmatprep.subr.bf16.mxu0 %v9365_v55  ;;  %v12776_v28 = vadd.f32 %v6603_v2, %v6596_v17  ;;  %v9379_v46 = vcombine.high %v6642_v24, %v6646_v45  ;;  %v9397_v52 = vcombine.high %v6659_v49, %v6663_v15  ;;  %v6674_v60 = vld [vmem:[#allocation22 + $0x1d0] sm:$0xff] }
 0xea9   : > { %v12774_v61 = vadd.f32 %v6607_v35, %v6599_v56  ;;  %v12778_v23 = vadd.f32 %v6603_v2, %v6598_v6  ;;  %v9378_v35 = vcombine.low %v6642_v24, %v6646_v45  ;;  %v9380_v2 = vcombine.low %v6643_v30, %v6647_v18  ;;  %v6678_v1 = vld [vmem:[#allocation22 + $0x1f0] sm:$0xff]  ;;  %v6683_v6 = vld [vmem:[#allocation22 + $0x218] sm:$0xff] }
 0xeaa   : > { %v9394_v9 = vcombine.low %v6658_v37, %v6662_v38  ;;  %v9396_v10 = vcombine.low %v6659_v49, %v6663_v15  ;;  %v9403_v55 = vcombine.high %v6666_v59, %v6670_v19  ;;  %v9402_v54 = vcombine.low %v6666_v59, %v6670_v19  ;;  %v6686_v56 = vld [vmem:[#allocation22 + $0x230] sm:$0xff] }
 0xeab   : > { %7539 = vmatpush1.bf16.msra.mxu1 %v9362_v51  ;;  %7592 = vmatpush1.bf16.msra.mxu0 %v9364_v39  ;;  %v12782_v57 = vpack.c.bf16 %v12774_v61, %v12772_v3  ;;  %v12786_v63 = vpack.c.bf16 %v12778_v23, %v12776_v28  ;;  %v9411_v51 = vcombine.high %v6674_v60, %v6678_v1  ;;  %v6682_v39 = vld [vmem:[#allocation22 + $0x210] sm:$0xff] }
 0xeac   : > { %7540 = vmatprep.subr.bf16.mxu1 %v9371_v16  ;;  %7593 = vmatprep.subr.bf16.mxu0 %v9373_v26  ;;  %v9413_v17 = vcombine.high %v6675_v34, %v6679_v5  ;;  %v6687_v16 = vld [vmem:[#allocation22 + $0x238] sm:$0xff]  ;;  %v9410_v26 = vcombine.low %v6674_v60, %v6678_v1  ;;  %v9412_v24 = vcombine.low %v6675_v34, %v6679_v5  ;;  %v6690_v30 = vld [vmem:[#allocation22 + $0x250] sm:$0xff] }
 0xead   : > { %7472 = vmatprep.mubr.bf16.mxu1 %v12782_v57  ;;  %7525 = vmatprep.mubr.bf16.mxu0 %v12782_v57  ;;  %v9421_v45 = vcombine.high %v6683_v6, %v6687_v16  ;;  %v6694_v18 = vld [vmem:[#allocation22 + $0x270] sm:$0xff] }
 0xeae   : > { %7473 = vmatmul.mubr.bf16.gmra.mrb[52].mxu1 %v12786_v63  ;;  %7526 = vmatmul.mubr.bf16.gmra.mrb[84].mxu0 %v12786_v63  ;;  %v9427_v47 = vcombine.high %v6690_v30, %v6694_v18  ;;  %v6706_v15 = vld [vmem:[#allocation22 + $0x2d0] sm:$0xff] }
 0xeaf   : > { %7541 = vmatpush1.bf16.msra.mxu1 %v9370_v36  ;;  %7594 = vmatpush1.bf16.msra.mxu0 %v9372_v31  ;;  %v9419_v36 = vcombine.high %v6682_v39, %v6686_v56  ;;  %v6691_v31 = vld [vmem:[#allocation22 + $0x258] sm:$0xff]  ;;  %v6722_v5 = vld [vmem:[#allocation22 + $0x350] sm:$0xff] }
 0xeb0   : > { %7568 = vmatprep.mubr.bf16.mxu1 %v6746_v29  ;;  %7621 = vmatprep.mubr.bf16.mxu0 %v6746_v29  ;;  %v6671_v29 = vld [vmem:[#allocation22 + $0x1b8] sm:$0xff]  ;;  %v9429_v13 = vcombine.high %v6691_v31, %v6695_v4  ;;  %v9428_v37 = vcombine.low %v6691_v31, %v6695_v4  ;;  %v6738_v4 = vld [vmem:[#allocation22 + $0x3d0] sm:$0xff] }
 0xeb1   : > { %7542 = vmatprep.subr.bf16.mxu1 %v9379_v46  ;;  %7595 = vmatprep.subr.bf16.mxu0 %v9381_v8  ;;  %v9405_v42 = vcombine.high %v6667_v33, %v6671_v29  ;;  %v9404_v14 = vcombine.low %v6667_v33, %v6671_v29  ;;  %v9418_v46 = vcombine.low %v6682_v39, %v6686_v56  ;;  %v6714_v29 = vld [vmem:[#allocation22 + $0x310] sm:$0xff] }
 0xeb2   : > { %v9420_v8 = vcombine.low %v6683_v6, %v6687_v16  ;;  %v6730_v16 = vld [vmem:[#allocation22 + $0x390] sm:$0xff] }
 0xeb3   : > { %7543 = vmatpush1.bf16.msra.mxu1 %v9378_v35  ;;  %7596 = vmatpush1.bf16.msra.mxu0 %v9380_v2  ;;  %v6702_v35 = vld [vmem:[#allocation22 + $0x2b0] sm:$0xff]  ;;  %v6699_v2 = vld [vmem:[#allocation22 + $0x298] sm:$0xff] }
 0xeb4   : > { %7544 = vmatprep.subr.bf16.mxu1 %v9387_v20  ;;  %7597 = vmatprep.subr.bf16.mxu0 %v9389_v41  ;;  %v6703_v20 = vld [vmem:[#allocation22 + $0x2b8] sm:$0xff]  ;;  %v9426_v41 = vcombine.low %v6690_v30, %v6694_v18  ;;  %v9435_v38 = vcombine.high %v6698_v43, %v6702_v35 }
 0xeb5   : > { %v9437_v49 = vcombine.high %v6699_v2, %v6703_v20  ;;  %v9436_v59 = vcombine.low %v6699_v2, %v6703_v20 }
 0xeb7   : > { %7545 = vmatpush1.bf16.msra.mxu1 %v9386_v40  ;;  %7598 = vmatpush1.bf16.msra.mxu0 %v9388_v44  ;;  %v6710_v40 = vld [vmem:[#allocation22 + $0x2f0] sm:$0xff]  ;;  %v6707_v44 = vld [vmem:[#allocation22 + $0x2d8] sm:$0xff] }
 0xeb8   : > { %7546 = vmatprep.subr.bf16.mxu1 %v9395_v58  ;;  %7599 = vmatprep.subr.bf16.mxu0 %v9397_v52  ;;  %v6711_v58 = vld [vmem:[#allocation22 + $0x2f8] sm:$0xff]  ;;  %v9434_v52 = vcombine.low %v6698_v43, %v6702_v35  ;;  %v9443_v19 = vcombine.high %v6706_v15, %v6710_v40 }
 0xeb9   : > { %v9445_v33 = vcombine.high %v6707_v44, %v6711_v58  ;;  %v9444_v60 = vcombine.low %v6707_v44, %v6711_v58  ;;  %v10291_v44 = vld [vmem:[#allocation23 + $0x20] ss:$8 sps:$4 sm:$0xff]   ;;  %v10296_v58 = vld [vmem:[#allocation23 + $0x34] ss:$8 sps:$4 sm:$0xff]  }
 0xebb   : > { %7547 = vmatpush1.bf16.msra.mxu1 %v9394_v9  ;;  %7600 = vmatpush1.bf16.msra.mxu0 %v9396_v10  ;;  %v6718_v9 = vld [vmem:[#allocation22 + $0x330] sm:$0xff]  ;;  %v6715_v10 = vld [vmem:[#allocation22 + $0x318] sm:$0xff] }
 0xebc   : > { %7548 = vmatprep.subr.bf16.mxu1 %v9403_v55  ;;  %7601 = vmatprep.subr.bf16.mxu0 %v9405_v42  ;;  %v6719_v55 = vld [vmem:[#allocation22 + $0x338] sm:$0xff]  ;;  %v9442_v42 = vcombine.low %v6706_v15, %v6710_v40  ;;  %v9451_v1 = vcombine.high %v6714_v29, %v6718_v9  ;;  %v10293_v40 = vld [vmem:[#allocation23 + $0x24] ss:$8 sps:$4 sm:$0xff]  }
 0xebd   : > { %v9453_v34 = vcombine.high %v6715_v10, %v6719_v55  ;;  %v9452_v39 = vcombine.low %v6715_v10, %v6719_v55  ;;  %v10288_v15 = vld [vmem:[#allocation23 + $0x10] ss:$8 sps:$4 sm:$0xff]   ;;  %v10309_v55 = vld [vmem:[#allocation23 + $0x80] ss:$8 sps:$4 sm:$0xff]  }
 0xebe   : > { %v10306_v10 = vld [vmem:[#allocation23 + $0x70] ss:$8 sps:$4 sm:$0xff]  }
 0xebf   : > { %7549 = vmatpush1.bf16.msra.mxu1 %v9402_v54  ;;  %7602 = vmatpush1.bf16.msra.mxu0 %v9404_v14  ;;  %v6726_v54 = vld [vmem:[#allocation22 + $0x370] sm:$0xff]  ;;  %v6723_v14 = vld [vmem:[#allocation22 + $0x358] sm:$0xff] }
 0xec0   : > { %7550 = vmatprep.subr.bf16.mxu1 %v9411_v51  ;;  %7603 = vmatprep.subr.bf16.mxu0 %v9413_v17  ;;  %v6727_v51 = vld [vmem:[#allocation22 + $0x378] sm:$0xff]  ;;  %v9450_v17 = vcombine.low %v6714_v29, %v6718_v9  ;;  %v9459_v56 = vcombine.high %v6722_v5, %v6726_v54  ;;  %v10303_v29 = vld [vmem:[#allocation23 + $0x60] ss:$8 sps:$4 sm:$0xff]  }
 0xec1   : > { %v9461_v6 = vcombine.high %v6723_v14, %v6727_v51  ;;  %v9460_v30 = vcombine.low %v6723_v14, %v6727_v51  ;;  %v10308_v9 = vld [vmem:[#allocation23 + $0x74] ss:$8 sps:$4 sm:$0xff]   ;;  %v10323_v14 = vld [vmem:[#allocation23 + $0xc4] ss:$8 sps:$4 sm:$0xff]   ;;  %v10321_v51 = vld [vmem:[#allocation23 + $0xc0] ss:$8 sps:$4 sm:$0xff]  }
 0xec3   : > { %7551 = vmatpush1.bf16.msra.mxu1 %v9410_v26  ;;  %7604 = vmatpush1.bf16.msra.mxu0 %v9412_v24  ;;  %v6734_v26 = vld [vmem:[#allocation22 + $0x3b0] sm:$0xff]  ;;  %v6731_v24 = vld [vmem:[#allocation22 + $0x398] sm:$0xff] }
 0xec4   : > { %7552 = vmatprep.subr.bf16.mxu1 %v9419_v36  ;;  %7605 = vmatprep.subr.bf16.mxu0 %v9421_v45  ;;  %v6735_v36 = vld [vmem:[#allocation22 + $0x3b8] sm:$0xff]  ;;  %v9458_v45 = vcombine.low %v6722_v5, %v6726_v54  ;;  %v9467_v18 = vcombine.high %v6730_v16, %v6734_v26 }
 0xec5   : > { %v9469_v31 = vcombine.high %v6731_v24, %v6735_v36  ;;  %v9468_v43 = vcombine.low %v6731_v24, %v6735_v36  ;;  %v10320_v5 = vld [vmem:[#allocation23 + $0xb4] ss:$8 sps:$4 sm:$0xff]   ;;  %v10318_v54 = vld [vmem:[#allocation23 + $0xb0] ss:$8 sps:$4 sm:$0xff]   ;;  %v10335_v24 = vld [vmem:[#allocation23 + $0x104] ss:$8 sps:$4 sm:$0xff]  }
 0xec6   : > { %v12801_v36 = vld [vmem:[%s13056_s6] sm:$0xff] }
 0xec7   : > { %7553 = vmatpush1.bf16.msra.mxu1 %v9418_v46  ;;  %7606 = vmatpush1.bf16.msra.mxu0 %v9420_v8  ;;  %v6742_v46 = vld [vmem:[#allocation22 + $0x3f0] sm:$0xff]  ;;  %v6739_v8 = vld [vmem:[#allocation22 + $0x3d8] sm:$0xff] }
 0xec8   : > { %7554 = vmatprep.subr.bf16.mxu1 %v9427_v47  ;;  %7607 = vmatprep.subr.bf16.mxu0 %v9429_v13  ;;  %v6743_v47 = vld [vmem:[#allocation22 + $0x3f8] sm:$0xff]  ;;  %v9466_v13 = vcombine.low %v6730_v16, %v6734_v26  ;;  %v9475_v35 = vcombine.high %v6738_v4, %v6742_v46  ;;  %v9474_v20 = vcombine.low %v6738_v4, %v6742_v46 }
 0xec9   : > { %v9477_v2 = vcombine.high %v6739_v8, %v6743_v47  ;;  %v10332_v16 = vld [vmem:[#allocation23 + $0xf4] ss:$8 sps:$4 sm:$0xff]   ;;  %v10330_v26 = vld [vmem:[#allocation23 + $0xf0] ss:$8 sps:$4 sm:$0xff]  }
 0xecb   : > { %7555 = vmatpush1.bf16.msra.mxu1 %v9426_v41  ;;  %7608 = vmatpush1.bf16.msra.mxu0 %v9428_v37  ;;  %v9476_v41 = vcombine.low %v6739_v8, %v6743_v47  ;;  %v10287_v37 = vld [vmem:[#allocation23 + $0x4] ss:$8 sps:$4 sm:$0xff]  }
 0xecc   : > { %7556 = vmatprep.subr.bf16.mxu1 %v9435_v38  ;;  %7609 = vmatprep.subr.bf16.mxu0 %v9437_v49  ;;  %v10285_v38 = vld [vmem:[#allocation23] ss:$8 sps:$4 sm:$0xff]   ;;  %v10290_v49 = vld [vmem:[#allocation23 + $0x14] ss:$8 sps:$4 sm:$0xff]  }
 0xecf   : > { %7557 = vmatpush1.bf16.msra.mxu1 %v9434_v52  ;;  %7610 = vmatpush1.bf16.msra.mxu0 %v9436_v59  ;;  %v10294_v52 = vld [vmem:[#allocation23 + $0x30] ss:$8 sps:$4 sm:$0xff]   ;;  %v10297_v59 = vld [vmem:[#allocation23 + $0x40] ss:$8 sps:$4 sm:$0xff]  }
 0xed0   : > { %7558 = vmatprep.subr.bf16.mxu1 %v9443_v19  ;;  %7611 = vmatprep.subr.bf16.mxu0 %v9445_v33  ;;  %v10300_v19 = vld [vmem:[#allocation23 + $0x50] ss:$8 sps:$4 sm:$0xff]   ;;  %v10305_v33 = vld [vmem:[#allocation23 + $0x64] ss:$8 sps:$4 sm:$0xff]  }
 0xed3   : > { %7559 = vmatpush1.bf16.msra.mxu1 %v9442_v42  ;;  %7612 = vmatpush1.bf16.msra.mxu0 %v9444_v60  ;;  %v10314_v42 = vld [vmem:[#allocation23 + $0x94] ss:$8 sps:$4 sm:$0xff]   ;;  %v10312_v60 = vld [vmem:[#allocation23 + $0x90] ss:$8 sps:$4 sm:$0xff]  }
 0xed4   : > { %7560 = vmatprep.subr.bf16.mxu1 %v9451_v1  ;;  %7613 = vmatprep.subr.bf16.mxu0 %v9453_v34  ;;  %v10317_v1 = vld [vmem:[#allocation23 + $0xa4] ss:$8 sps:$4 sm:$0xff]   ;;  %v10315_v34 = vld [vmem:[#allocation23 + $0xa0] ss:$8 sps:$4 sm:$0xff]  }
 0xed7   : > { %7561 = vmatpush1.bf16.msra.mxu1 %v9450_v17  ;;  %7614 = vmatpush1.bf16.msra.mxu0 %v9452_v39  ;;  %v10326_v17 = vld [vmem:[#allocation23 + $0xd4] ss:$8 sps:$4 sm:$0xff]   ;;  %v10324_v39 = vld [vmem:[#allocation23 + $0xd0] ss:$8 sps:$4 sm:$0xff]  }
 0xed8   : > { %7562 = vmatprep.subr.bf16.mxu1 %v9459_v56  ;;  %7615 = vmatprep.subr.bf16.mxu0 %v9461_v6  ;;  %v10329_v56 = vld [vmem:[#allocation23 + $0xe4] ss:$8 sps:$4 sm:$0xff]   ;;  %v10327_v6 = vld [vmem:[#allocation23 + $0xe0] ss:$8 sps:$4 sm:$0xff]  }
 0xedb   : > { %7563 = vmatpush1.bf16.msra.mxu1 %v9458_v45  ;;  %7616 = vmatpush1.bf16.msra.mxu0 %v9460_v30  ;;  %v6753_v45 = vrot.slane %v12801_v36, %v11763_v21  ;;  %v6761_v30 = vrot.slane %v12801_v36, %v12007_v53 }
 0xedc   : > { %7564 = vmatprep.subr.bf16.mxu1 %v9467_v18  ;;  %7617 = vmatprep.subr.bf16.mxu0 %v9469_v31  ;;  %v6757_v18 = vrot.slane %v12801_v36, %v11806_v62  ;;  %v6765_v31 = vrot.slane %v12801_v36, %v12135_v50 }
 0xedf   : > { %7565 = vmatpush1.bf16.msra.mxu1 %v9466_v13  ;;  %7618 = vmatpush1.bf16.msra.mxu0 %v9468_v43 }
 0xee0   : > { %7566 = vmatprep.subr.bf16.mxu1 %v9475_v35  ;;  %7619 = vmatprep.subr.bf16.mxu0 %v9477_v2 }
 0xee3   : > { %7567 = vmatpush1.bf16.msra.mxu1 %v9474_v20  ;;  %7620 = vmatpush1.bf16.msra.mxu0 %v9476_v41 }
 0xee4   : > { %8466 = vmatprep.subr.bf16.mxu1 %v10287_v37 }
 0xee6   : > { %7569 = vmatmul.mubr.bf16.vlgmr.msra.gmra.mrb[56].mxu1 %v12760_v48  ;;  %7622 = vmatmul.mubr.bf16.vlgmr.msra.gmra.mrb[88].mxu0 %v12760_v48  ;;  %v10299_v48 = vld [vmem:[#allocation23 + $0x44] ss:$8 sps:$4 sm:$0xff]  }
 0xee7   : > { %7578 = vmatprep.mubr.bf16.mxu1 %v12782_v57  ;;  %7631 = vmatprep.mubr.bf16.mxu0 %v12782_v57  ;;  %v10302_v57 = vld [vmem:[#allocation23 + $0x54] ss:$8 sps:$4 sm:$0xff]  }
 0xee8   : > { %8467 = vmatpush1.bf16.msra.mxu1 %v10285_v38 }
 0xee9   : > { %8468 = vmatprep.subr.bf16.mxu1 %v10290_v49 }
 0xeec   : > { %8469 = vmatpush1.bf16.msra.mxu1 %v10288_v15 }
 0xeed   : > { %8470 = vmatprep.subr.bf16.mxu1 %v10293_v40 }
 0xeee   : > { %7579 = vmatmul.mubr.bf16.gmra.mrb[60].mxu1 %v12786_v63  ;;  %7632 = vmatmul.mubr.bf16.gmra.mrb[92].mxu0 %v12786_v63  ;;  %v10311_v63 = vld [vmem:[#allocation23 + $0x84] ss:$8 sps:$4 sm:$0xff]  }
 0xef0   : > { %8471 = vmatpush1.bf16.msra.mxu1 %v10291_v44 }
 0xef1   : > { %8472 = vmatprep.subr.bf16.mxu1 %v10296_v58 }
 0xef4   : > { %8473 = vmatpush1.bf16.msra.mxu1 %v10294_v52 }
 0xef5   : > { %8474 = vmatprep.subr.bf16.mxu1 %v10299_v48 }
 0xef8   : > { %8475 = vmatpush1.bf16.msra.mxu1 %v10297_v59 }
 0xef9   : > { %8476 = vmatprep.subr.bf16.mxu1 %v10302_v57 }
 0xefc   : > { %8477 = vmatpush1.bf16.msra.mxu1 %v10300_v19 }
 0xefd   : > { %8478 = vmatprep.subr.bf16.mxu1 %v10305_v33 }
 0xf00   : > { %8479 = vmatpush1.bf16.msra.mxu1 %v10303_v29 }
 0xf01   : > { %8480 = vmatprep.subr.bf16.mxu1 %v10308_v9 }
 0xf04   : > { %8481 = vmatpush1.bf16.msra.mxu1 %v10306_v10 }
 0xf05   : > { %8482 = vmatprep.subr.bf16.mxu1 %v10311_v63  ;;  %v10333_v63 = vld [vmem:[#allocation23 + $0x100] ss:$8 sps:$4 sm:$0xff]  }
 0xf08   : > { %8483 = vmatpush1.bf16.msra.mxu1 %v10309_v55 }
 0xf09   : > { %8484 = vmatprep.subr.bf16.mxu1 %v10314_v42 }
 0xf0c   : > { %8485 = vmatpush1.bf16.msra.mxu1 %v10312_v60 }
 0xf0d   : > { %8486 = vmatprep.subr.bf16.mxu1 %v10317_v1 }
 0xf10   : > { %8487 = vmatpush1.bf16.msra.mxu1 %v10315_v34  ;;  %v10338_v34 = vld [vmem:[#allocation23 + $0x114] ss:$8 sps:$4 sm:$0xff]  }
 0xf11   : > { %8488 = vmatprep.subr.bf16.mxu1 %v10320_v5 }
 0xf14   : > { %8489 = vmatpush1.bf16.msra.mxu1 %v10318_v54 }
 0xf15   : > { %8490 = vmatprep.subr.bf16.mxu1 %v10323_v14 }
 0xf18   : > { %8491 = vmatpush1.bf16.msra.mxu1 %v10321_v51 }
 0xf19   : > { %8492 = vmatprep.subr.bf16.mxu1 %v10326_v17 }
 0xf1c   : > { %8493 = vmatpush1.bf16.msra.mxu1 %v10324_v39 }
 0xf1d   : > { %8494 = vmatprep.subr.bf16.mxu1 %v10329_v56 }
 0xf20   : > { %8495 = vmatpush1.bf16.msra.mxu1 %v10327_v6 }
 0xf21   : > { %8496 = vmatprep.subr.bf16.mxu1 %v10332_v16 }
 0xf24   : > { %8497 = vmatpush1.bf16.msra.mxu1 %v10330_v26 }
 0xf25   : > { %8519 = vmatprep.subr.bf16.mxu1 %v10335_v24  ;;  %v10336_v24 = vld [vmem:[#allocation23 + $0x110] ss:$8 sps:$4 sm:$0xff]  }
 0xf79   : > { %v7464_v4 = vpop.f32.mrb[48].mxu1  ;;  %v7517_v46 = vpop.f32.mrb[80].mxu0 }
 0xf7a   : > { %v7465_v8 = vadd.f32 %v7464_v4, %v6753_v45  ;;  %v7518_v47 = vadd.f32 %v7517_v46, %v6761_v30  ;;  %v7466_v13 = vpop.f32.mrb[49].mxu1  ;;  %v7519_v43 = vpop.f32.mrb[81].mxu0 }
 0xf7b   : > { %v7467_v35 = vadd.f32 %v7466_v13, %v6757_v18  ;;  %v7520_v2 = vadd.f32 %v7519_v43, %v6765_v31  ;;  %v7468_v20 = vpop.f32.mrb[50].mxu1  ;;  %v7521_v41 = vpop.f32.mrb[82].mxu0  ;;  %v10341_v13 = vld [vmem:[#allocation23 + $0x124] ss:$8 sps:$4 sm:$0xff]  }
 0xf7c   : > { %v7469_v21 = vadd.f32 %v7468_v20, %v6753_v45  ;;  %v7522_v37 = vadd.f32 %v7521_v41, %v6761_v30  ;;  %v7470_v38 = vpop.f32.mrb[51].mxu1  ;;  %v7523_v53 = vpop.f32.mrb[83].mxu0  ;;  %v7642_v62 = vmax.f32 %v7465_v8, 0.0  ;;  %v7644_v40 = vmax.f32 %v7518_v47, 0.0 }
 0xf7d   : > { %v7471_v49 = vadd.f32 %v7470_v38, %v6757_v18  ;;  %v7524_v15 = vadd.f32 %v7523_v53, %v6765_v31  ;;  %v7643_v58 = vmax.f32 %v7467_v35, 0.0  ;;  %v7645_v52 = vmax.f32 %v7520_v2, 0.0  ;;  %v10347_v38 = vld [vmem:[#allocation23 + $0x144] ss:$8 sps:$4 sm:$0xff]   ;;  %v10345_v53 = vld [vmem:[#allocation23 + $0x140] ss:$8 sps:$4 sm:$0xff]  }
 0xf7e   : > { %v7650_v44 = vmax.f32 %v7469_v21, 0.0  ;;  %v7652_v50 = vmax.f32 %v7522_v37, 0.0  ;;  %v10342_v37 = vld [vmem:[#allocation23 + $0x130] ss:$8 sps:$4 sm:$0xff]  }
 0xf7f   : > { %v7651_v48 = vmax.f32 %v7471_v49, 0.0  ;;  %v7653_v59 = vmax.f32 %v7524_v15, 0.0  ;;  %v10350_v49 = vld [vmem:[#allocation23 + $0x154] ss:$8 sps:$4 sm:$0xff]   ;;  %v10348_v15 = vld [vmem:[#allocation23 + $0x150] ss:$8 sps:$4 sm:$0xff]  }
 0xf80   : > { %v7802_v57 = vpack.c.bf16 %v7650_v44, %v7642_v62  ;;  %v12811_v19 = vpack.c.bf16 %v7652_v50, %v7644_v40  ;;  %v10353_v62 = vld [vmem:[#allocation23 + $0x164] ss:$8 sps:$4 sm:$0xff]   ;;  %v10351_v40 = vld [vmem:[#allocation23 + $0x160] ss:$8 sps:$4 sm:$0xff]   ;;  %v10356_v44 = vld [vmem:[#allocation23 + $0x174] ss:$8 sps:$4 sm:$0xff]  }
 0xf81   : > { %v7803_v33 = vpack.c.bf16 %v7651_v48, %v7643_v58  ;;  %v7805_v29 = vpack.c.bf16 %v7653_v59, %v7645_v52  ;;  %v7474_v9 = vpop.f32.mrb[52].mxu1  ;;  %v7527_v10 = vpop.f32.mrb[84].mxu0  ;;  %v10354_v50 = vld [vmem:[#allocation23 + $0x170] ss:$8 sps:$4 sm:$0xff]   ;;  %v10359_v58 = vld [vmem:[#allocation23 + $0x184] ss:$8 sps:$4 sm:$0xff]  }
 0xf82   : > { %v7475_v55 = vadd.f32 %v7474_v9, %v6753_v45  ;;  %v7528_v42 = vadd.f32 %v7527_v10, %v6761_v30  ;;  %v7476_v60 = vpop.f32.mrb[53].mxu1  ;;  %v7529_v1 = vpop.f32.mrb[85].mxu0  ;;  %v10357_v52 = vld [vmem:[#allocation23 + $0x180] ss:$8 sps:$4 sm:$0xff]   ;;  %v10362_v48 = vld [vmem:[#allocation23 + $0x194] ss:$8 sps:$4 sm:$0xff]  }
 0xf83   : > { %v7477_v5 = vadd.f32 %v7476_v60, %v6757_v18  ;;  %v7530_v54 = vadd.f32 %v7529_v1, %v6765_v31  ;;  %v7478_v14 = vpop.f32.mrb[54].mxu1  ;;  %v7531_v51 = vpop.f32.mrb[86].mxu0  ;;  %8498 = vmatprep.mubr.bf16.mxu1 %v7803_v33  ;;  %v10360_v59 = vld [vmem:[#allocation23 + $0x190] ss:$8 sps:$4 sm:$0xff]   ;;  %v10363_v33 = vld [vmem:[#allocation23 + $0x1a0] ss:$8 sps:$4 sm:$0xff]   ;;  %v6769_v60 = vrot.slane %v12801_v36, %v12224_v7  ;;  %v6777_v1 = vrot.slane %v12801_v36, %v12283_v32 }
 0xf84   : > { %v7479_v17 = vadd.f32 %v7478_v14, %v6753_v45  ;;  %v7532_v39 = vadd.f32 %v7531_v51, %v6761_v30  ;;  %v7480_v56 = vpop.f32.mrb[55].mxu1  ;;  %v7533_v6 = vpop.f32.mrb[87].mxu0  ;;  %8499 = vmatmul.mubr.bf16.vlgmr.msra.gmra.mrb[64].mxu1 %v7802_v57  ;;  %v7658_v4 = vmax.f32 %v7475_v55, 0.0  ;;  %v7660_v46 = vmax.f32 %v7528_v42, 0.0  ;;  %v10365_v57 = vld [vmem:[#allocation23 + $0x1a4] ss:$8 sps:$4 sm:$0xff]  }
 0xf85   : > { %v7481_v16 = vadd.f32 %v7480_v56, %v6757_v18  ;;  %v7534_v26 = vadd.f32 %v7533_v6, %v6765_v31  ;;  %8520 = vmatpush1.bf16.msra.mxu1 %v10333_v63  ;;  %v7659_v43 = vmax.f32 %v7477_v5, 0.0  ;;  %v7661_v35 = vmax.f32 %v7530_v54, 0.0  ;;  %v10339_v18 = vld [vmem:[#allocation23 + $0x120] ss:$8 sps:$4 sm:$0xff]   ;;  %v10344_v31 = vld [vmem:[#allocation23 + $0x134] ss:$8 sps:$4 sm:$0xff]  }
 0xf86   : > { %v7666_v8 = vmax.f32 %v7479_v17, 0.0  ;;  %v7668_v47 = vmax.f32 %v7532_v39, 0.0  ;;  %8521 = vmatprep.subr.bf16.mxu1 %v10338_v34  ;;  %v10366_v9 = vld [vmem:[#allocation23 + $0x1b0] ss:$8 sps:$4 sm:$0xff]   ;;  %v10371_v10 = vld [vmem:[#allocation23 + $0x1c4] ss:$8 sps:$4 sm:$0xff]   ;;  %v6773_v5 = vrot.slane %v12801_v36, %v12227_v22  ;;  %v6781_v54 = vrot.slane %v12801_v36, %v12310_v25 }
 0xf87   : > { %v7667_v2 = vmax.f32 %v7481_v16, 0.0  ;;  %v7669_v20 = vmax.f32 %v7534_v26, 0.0  ;;  %v10369_v63 = vld [vmem:[#allocation23 + $0x1c0] ss:$8 sps:$4 sm:$0xff]   ;;  %v10374_v55 = vld [vmem:[#allocation23 + $0x1d4] ss:$8 sps:$4 sm:$0xff]  }
 0xf88   : > { %v7810_v41 = vpack.c.bf16 %v7666_v8, %v7658_v4  ;;  %v12813_v45 = vpack.c.bf16 %v7668_v47, %v7660_v46  ;;  %v10372_v42 = vld [vmem:[#allocation23 + $0x1d0] ss:$8 sps:$4 sm:$0xff]   ;;  %v10377_v34 = vld [vmem:[#allocation23 + $0x1e4] ss:$8 sps:$4 sm:$0xff]   ;;  %v10375_v17 = vld [vmem:[#allocation23 + $0x1e0] ss:$8 sps:$4 sm:$0xff]  }
 0xf89   : > { %v7811_v30 = vpack.c.bf16 %v7667_v2, %v7659_v43  ;;  %v12815_v21 = vpack.c.bf16 %v7669_v20, %v7661_v35  ;;  %8522 = vmatpush1.bf16.msra.mxu1 %v10336_v24  ;;  %v10380_v26 = vld [vmem:[#allocation23 + $0x1f4] ss:$8 sps:$4 sm:$0xff]   ;;  %v10378_v36 = vld [vmem:[#allocation23 + $0x1f0] ss:$8 sps:$4 sm:$0xff]  }
 0xf8a   : > { %8523 = vmatprep.subr.bf16.mxu1 %v10341_v13 }
 0xf8b   : > { %8508 = vmatprep.mubr.bf16.mxu1 %v7811_v30 }
 0xf8c   : > { %8509 = vmatmul.mubr.bf16.gmra.mrb[68].mxu1 %v7810_v41 }
 0xf8d   : > { %8524 = vmatpush1.bf16.msra.mxu1 %v10339_v18  ;;  %8551 = vmatprep.mubr.bf16.mxu1 %v7805_v29  ;;  %v10368_v29 = vld [vmem:[#allocation23 + $0x1b4] ss:$8 sps:$4 sm:$0xff]  }
 0xf8e   : > { %8525 = vmatprep.subr.bf16.mxu1 %v10344_v31  ;;  %v10383_v31 = vld [vmem:[#allocation23 + $0x204] ss:$8 sps:$4 sm:$0xff]  }
 0xf91   : > { %8526 = vmatpush1.bf16.msra.mxu1 %v10342_v37 }
 0xf92   : > { %8527 = vmatprep.subr.bf16.mxu1 %v10347_v38 }
 0xf95   : > { %8528 = vmatpush1.bf16.msra.mxu1 %v10345_v53 }
 0xf96   : > { %8529 = vmatprep.subr.bf16.mxu1 %v10350_v49 }
 0xf99   : > { %8530 = vmatpush1.bf16.msra.mxu1 %v10348_v15 }
 0xf9a   : > { %8531 = vmatprep.subr.bf16.mxu1 %v10353_v62 }
 0xf9d   : > { %8532 = vmatpush1.bf16.msra.mxu1 %v10351_v40 }
 0xf9e   : > { %8533 = vmatprep.subr.bf16.mxu1 %v10356_v44 }
 0xfa1   : > { %8534 = vmatpush1.bf16.msra.mxu1 %v10354_v50 }
 0xfa2   : > { %8535 = vmatprep.subr.bf16.mxu1 %v10359_v58 }
 0xfa5   : > { %8536 = vmatpush1.bf16.msra.mxu1 %v10357_v52  ;;  %v10381_v52 = vld [vmem:[#allocation23 + $0x200] ss:$8 sps:$4 sm:$0xff]  }
 0xfa6   : > { %8537 = vmatprep.subr.bf16.mxu1 %v10362_v48 }
 0xfa9   : > { %8538 = vmatpush1.bf16.msra.mxu1 %v10360_v59 }
 0xfaa   : > { %8539 = vmatprep.subr.bf16.mxu1 %v10365_v57 }
 0xfad   : > { %8540 = vmatpush1.bf16.msra.mxu1 %v10363_v33 }
 0xfae   : > { %8541 = vmatprep.subr.bf16.mxu1 %v10368_v29  ;;  %v10386_v29 = vld [vmem:[#allocation23 + $0x214] ss:$8 sps:$4 sm:$0xff]  }
 0xfb1   : > { %8542 = vmatpush1.bf16.msra.mxu1 %v10366_v9 }
 0xfb2   : > { %8543 = vmatprep.subr.bf16.mxu1 %v10371_v10 }
 0xfb5   : > { %8544 = vmatpush1.bf16.msra.mxu1 %v10369_v63 }
 0xfb6   : > { %8545 = vmatprep.subr.bf16.mxu1 %v10374_v55 }
 0xfb9   : > { %v7570_v14 = vpop.f32.mrb[56].mxu1  ;;  %v7623_v51 = vpop.f32.mrb[88].mxu0  ;;  %8546 = vmatpush1.bf16.msra.mxu1 %v10372_v42 }
 0xfba   : > { %v7571_v39 = vadd.f32 %v7570_v14, %v6769_v60  ;;  %v7624_v56 = vadd.f32 %v7623_v51, %v6777_v1  ;;  %v7572_v6 = vpop.f32.mrb[57].mxu1  ;;  %v7625_v16 = vpop.f32.mrb[89].mxu0  ;;  %8547 = vmatprep.subr.bf16.mxu1 %v10377_v34 }
 0xfbb   : > { %v7573_v24 = vadd.f32 %v7572_v6, %v6773_v5  ;;  %v7626_v4 = vadd.f32 %v7625_v16, %v6781_v54  ;;  %v7574_v46 = vpop.f32.mrb[58].mxu1  ;;  %v7627_v8 = vpop.f32.mrb[90].mxu0 }
 0xfbc   : > { %v7575_v47 = vadd.f32 %v7574_v46, %v6769_v60  ;;  %v7628_v13 = vadd.f32 %v7627_v8, %v6777_v1  ;;  %v7576_v43 = vpop.f32.mrb[59].mxu1  ;;  %v7629_v35 = vpop.f32.mrb[91].mxu0  ;;  %v7646_v20 = vmax.f32 %v7571_v39, 0.0  ;;  %v7648_v41 = vmax.f32 %v7624_v56, 0.0  ;;  %v10384_v56 = vld [vmem:[#allocation23 + $0x210] ss:$8 sps:$4 sm:$0xff]  }
 0xfbd   : > { %v7577_v2 = vadd.f32 %v7576_v43, %v6773_v5  ;;  %v7630_v25 = vadd.f32 %v7629_v35, %v6781_v54  ;;  %8548 = vmatpush1.bf16.msra.mxu1 %v10375_v17  ;;  %v7647_v37 = vmax.f32 %v7573_v24, 0.0  ;;  %v7649_v38 = vmax.f32 %v7626_v4, 0.0  ;;  %v10389_v4 = vld [vmem:[#allocation23 + $0x224] ss:$8 sps:$4 sm:$0xff]   ;;  %v10390_v43 = vld [vmem:[#allocation23 + $0x230] ss:$8 sps:$4 sm:$0xff]  }
 0xfbe   : > { %v7654_v30 = vmax.f32 %v7575_v47, 0.0  ;;  %v7656_v18 = vmax.f32 %v7628_v13, 0.0  ;;  %8549 = vmatprep.subr.bf16.mxu1 %v10380_v26  ;;  %v10395_v35 = vld [vmem:[#allocation23 + $0x244] ss:$8 sps:$4 sm:$0xff]  }
 0xfbf   : > { %v7655_v53 = vmax.f32 %v7577_v2, 0.0  ;;  %v7657_v49 = vmax.f32 %v7630_v25, 0.0  ;;  %v10393_v2 = vld [vmem:[#allocation23 + $0x240] ss:$8 sps:$4 sm:$0xff]   ;;  %v10398_v25 = vld [vmem:[#allocation23 + $0x254] ss:$8 sps:$4 sm:$0xff]  }
 0xfc0   : > { %v12825_v15 = vpack.c.bf16 %v7654_v30, %v7646_v20  ;;  %v12827_v62 = vpack.c.bf16 %v7656_v18, %v7648_v41  ;;  %v10401_v20 = vld [vmem:[#allocation23 + $0x264] ss:$8 sps:$4 sm:$0xff]   ;;  %v10399_v41 = vld [vmem:[#allocation23 + $0x260] ss:$8 sps:$4 sm:$0xff]   ;;  %v10404_v30 = vld [vmem:[#allocation23 + $0x274] ss:$8 sps:$4 sm:$0xff]  }
 0xfc1   : > { %v7807_v40 = vpack.c.bf16 %v7655_v53, %v7647_v37  ;;  %v12829_v44 = vpack.c.bf16 %v7657_v49, %v7649_v38  ;;  %v7580_v50 = vpop.f32.mrb[60].mxu1  ;;  %v7633_v58 = vpop.f32.mrb[92].mxu0  ;;  %8550 = vmatpush1.bf16.msra.mxu1 %v10378_v36  ;;  %v10396_v36 = vld [vmem:[#allocation23 + $0x250] ss:$8 sps:$4 sm:$0xff]   ;;  %v10410_v37 = vld [vmem:[#allocation23 + $0x294] ss:$8 sps:$4 sm:$0xff]  }
 0xfc2   : > { %v7581_v48 = vadd.f32 %v7580_v50, %v6769_v60  ;;  %v7634_v59 = vadd.f32 %v7633_v58, %v6777_v1  ;;  %v7582_v57 = vpop.f32.mrb[61].mxu1  ;;  %v7635_v33 = vpop.f32.mrb[93].mxu0  ;;  %8572 = vmatprep.subr.bf16.mxu1 %v10383_v31  ;;  %v10402_v18 = vld [vmem:[#allocation23 + $0x270] ss:$8 sps:$4 sm:$0xff]   ;;  %v10405_v31 = vld [vmem:[#allocation23 + $0x280] ss:$8 sps:$4 sm:$0xff]  }
 0xfc3   : > { %v7583_v9 = vadd.f32 %v7582_v57, %v6773_v5  ;;  %v7636_v10 = vadd.f32 %v7635_v33, %v6781_v54  ;;  %v7584_v63 = vpop.f32.mrb[62].mxu1  ;;  %v7637_v55 = vpop.f32.mrb[94].mxu0  ;;  %v10408_v38 = vld [vmem:[#allocation23 + $0x290] ss:$8 sps:$4 sm:$0xff]   ;;  %v10413_v53 = vld [vmem:[#allocation23 + $0x2a4] ss:$8 sps:$4 sm:$0xff]  }
 0xfc4   : > { %v7585_v42 = vadd.f32 %v7584_v63, %v6769_v60  ;;  %v7638_v34 = vadd.f32 %v7637_v55, %v6777_v1  ;;  %v7586_v14 = vpop.f32.mrb[63].mxu1  ;;  %v7639_v51 = vpop.f32.mrb[95].mxu0  ;;  %8552 = vmatmul.mubr.bf16.vlgmr.msra.gmra.mrb[64].mxu1 %v12811_v19  ;;  %v7662_v6 = vmax.f32 %v7581_v48, 0.0  ;;  %v7664_v16 = vmax.f32 %v7634_v59, 0.0  ;;  %v10411_v49 = vld [vmem:[#allocation23 + $0x2a0] ss:$8 sps:$4 sm:$0xff]  }
 0xfc5   : > { %v7587_v17 = vadd.f32 %v7586_v14, %v6773_v5  ;;  %v7640_v39 = vadd.f32 %v7639_v51, %v6781_v54  ;;  %8561 = vmatprep.mubr.bf16.mxu1 %v12815_v21  ;;  %8573 = vmatpush1.bf16.msra.mxu1 %v10381_v52  ;;  %v7663_v46 = vmax.f32 %v7583_v9, 0.0  ;;  %v7665_v8 = vmax.f32 %v7636_v10, 0.0  ;;  %v10387_v21 = vld [vmem:[#allocation23 + $0x220] ss:$8 sps:$4 sm:$0xff]   ;;  %v10392_v54 = vld [vmem:[#allocation23 + $0x234] ss:$8 sps:$4 sm:$0xff]  }
 0xfc6   : > { %v7670_v26 = vmax.f32 %v7585_v42, 0.0  ;;  %v7672_v24 = vmax.f32 %v7638_v34, 0.0  ;;  %8574 = vmatprep.subr.bf16.mxu1 %v10386_v29  ;;  %v10414_v50 = vld [vmem:[#allocation23 + $0x2b0] ss:$8 sps:$4 sm:$0xff]   ;;  %v10419_v58 = vld [vmem:[#allocation23 + $0x2c4] ss:$8 sps:$4 sm:$0xff]  }
 0xfc7   : > { %v7671_v60 = vmax.f32 %v7587_v17, 0.0  ;;  %v7673_v1 = vmax.f32 %v7640_v39, 0.0  ;;  %v10417_v52 = vld [vmem:[#allocation23 + $0x2c0] ss:$8 sps:$4 sm:$0xff]   ;;  %v10422_v48 = vld [vmem:[#allocation23 + $0x2d4] ss:$8 sps:$4 sm:$0xff]  }
 0xfc8   : > { %v12833_v47 = vpack.c.bf16 %v7670_v26, %v7662_v6  ;;  %v12835_v13 = vpack.c.bf16 %v7672_v24, %v7664_v16  ;;  %v10420_v59 = vld [vmem:[#allocation23 + $0x2d0] ss:$8 sps:$4 sm:$0xff]   ;;  %v10425_v57 = vld [vmem:[#allocation23 + $0x2e4] ss:$8 sps:$4 sm:$0xff]   ;;  %v10423_v33 = vld [vmem:[#allocation23 + $0x2e0] ss:$8 sps:$4 sm:$0xff]  }
 0xfc9   : > { %v12837_v19 = vpack.c.bf16 %v7671_v60, %v7663_v46  ;;  %v12839_v5 = vpack.c.bf16 %v7673_v1, %v7665_v8  ;;  %8575 = vmatpush1.bf16.msra.mxu1 %v10384_v56  ;;  %v10428_v29 = vld [vmem:[#allocation23 + $0x2f4] ss:$8 sps:$4 sm:$0xff]   ;;  %v10426_v9 = vld [vmem:[#allocation23 + $0x2f0] ss:$8 sps:$4 sm:$0xff]   ;;  %v10431_v10 = vld [vmem:[#allocation23 + $0x304] ss:$8 sps:$4 sm:$0xff]  }
 0xfca   : > { %8576 = vmatprep.subr.bf16.mxu1 %v10389_v4  ;;  %v10429_v63 = vld [vmem:[#allocation23 + $0x300] ss:$8 sps:$4 sm:$0xff]   ;;  %v10434_v55 = vld [vmem:[#allocation23 + $0x314] ss:$8 sps:$4 sm:$0xff]   ;;  %v10432_v42 = vld [vmem:[#allocation23 + $0x310] ss:$8 sps:$4 sm:$0xff]  }
 0xfcb   : > { %v10437_v34 = vld [vmem:[#allocation23 + $0x324] ss:$8 sps:$4 sm:$0xff]   ;;  %v10435_v14 = vld [vmem:[#allocation23 + $0x320] ss:$8 sps:$4 sm:$0xff]   ;;  %v10440_v51 = vld [vmem:[#allocation23 + $0x334] ss:$8 sps:$4 sm:$0xff]  }
 0xfcc   : > { %8562 = vmatmul.mubr.bf16.gmra.mrb[68].mxu1 %v12813_v45  ;;  %v10407_v45 = vld [vmem:[#allocation23 + $0x284] ss:$8 sps:$4 sm:$0xff]   ;;  %v10438_v17 = vld [vmem:[#allocation23 + $0x330] ss:$8 sps:$4 sm:$0xff]   ;;  %v10446_v56 = vld [vmem:[#allocation23 + $0x354] ss:$8 sps:$4 sm:$0xff]  }
 0xfcd   : > { %8577 = vmatpush1.bf16.msra.mxu1 %v10387_v21  ;;  %8604 = vmatprep.mubr.bf16.mxu1 %v7807_v40  ;;  %v10416_v40 = vld [vmem:[#allocation23 + $0x2b4] ss:$8 sps:$4 sm:$0xff]   ;;  %v10443_v39 = vld [vmem:[#allocation23 + $0x344] ss:$8 sps:$4 sm:$0xff]   ;;  %v10444_v6 = vld [vmem:[#allocation23 + $0x350] ss:$8 sps:$4 sm:$0xff]  }
 0xfce   : > { %8578 = vmatprep.subr.bf16.mxu1 %v10392_v54  ;;  %v10449_v16 = vld [vmem:[#allocation23 + $0x364] ss:$8 sps:$4 sm:$0xff]   ;;  %v10447_v26 = vld [vmem:[#allocation23 + $0x360] ss:$8 sps:$4 sm:$0xff]   ;;  %v10452_v24 = vld [vmem:[#allocation23 + $0x374] ss:$8 sps:$4 sm:$0xff]  }
 0xfcf   : > { %v10450_v4 = vld [vmem:[#allocation23 + $0x370] ss:$8 sps:$4 sm:$0xff]   ;;  %v10455_v46 = vld [vmem:[#allocation23 + $0x384] ss:$8 sps:$4 sm:$0xff]   ;;  %v10458_v8 = vld [vmem:[#allocation23 + $0x394] ss:$8 sps:$4 sm:$0xff]  }
 0xfd0   : > { %v10456_v60 = vld [vmem:[#allocation23 + $0x390] ss:$8 sps:$4 sm:$0xff]   ;;  %v10461_v1 = vld [vmem:[#allocation23 + $0x3a4] ss:$8 sps:$4 sm:$0xff]  }
 0xfd1   : > { %8579 = vmatpush1.bf16.msra.mxu1 %v10390_v43  ;;  %v10462_v21 = vld [vmem:[#allocation23 + $0x3b0] ss:$8 sps:$4 sm:$0xff]   ;;  %v10467_v54 = vld [vmem:[#allocation23 + $0x3c4] ss:$8 sps:$4 sm:$0xff]   ;;  %v10465_v43 = vld [vmem:[#allocation23 + $0x3c0] ss:$8 sps:$4 sm:$0xff]  }
 0xfd2   : > { %8580 = vmatprep.subr.bf16.mxu1 %v10395_v35  ;;  %v10470_v35 = vld [vmem:[#allocation23 + $0x3d4] ss:$8 sps:$4 sm:$0xff]  }
 0xfd5   : > { %8581 = vmatpush1.bf16.msra.mxu1 %v10393_v2  ;;  %v10468_v2 = vld [vmem:[#allocation23 + $0x3d0] ss:$8 sps:$4 sm:$0xff]  }
 0xfd6   : > { %8582 = vmatprep.subr.bf16.mxu1 %v10398_v25  ;;  %v10473_v25 = vld [vmem:[#allocation23 + $0x3e4] ss:$8 sps:$4 sm:$0xff]  }
 0xfd9   : > { %8583 = vmatpush1.bf16.msra.mxu1 %v10396_v36  ;;  %v10471_v36 = vld [vmem:[#allocation23 + $0x3e0] ss:$8 sps:$4 sm:$0xff]  }
 0xfda   : > { %8584 = vmatprep.subr.bf16.mxu1 %v10401_v20  ;;  %v10476_v20 = vld [vmem:[#allocation23 + $0x3f4] ss:$8 sps:$4 sm:$0xff]  }
 0xfdd   : > { %8585 = vmatpush1.bf16.msra.mxu1 %v10399_v41  ;;  %v10474_v41 = vld [vmem:[#allocation23 + $0x3f0] ss:$8 sps:$4 sm:$0xff]  }
 0xfde   : > { %8586 = vmatprep.subr.bf16.mxu1 %v10404_v30  ;;  %v12852_v30 = vld [vmem:[%s13054_s1 + $0x10] sm:$0xff] }
 0xfe1   : > { %8587 = vmatpush1.bf16.msra.mxu1 %v10402_v18  ;;  %v7821_v18 = vrot.slane %v12852_v30, %v12224_v7 }
 0xfe2   : > { %8588 = vmatprep.subr.bf16.mxu1 %v10407_v45  ;;  %v12859_v45 = vld [vmem:[%s13054_s1 + $0x18] sm:$0xff] }
 0xfe5   : > { %8589 = vmatpush1.bf16.msra.mxu1 %v10405_v31 }
 0xfe6   : > { %8590 = vmatprep.subr.bf16.mxu1 %v10410_v37 }
 0xfe9   : > { %8591 = vmatpush1.bf16.msra.mxu1 %v10408_v38 }
 0xfea   : > { %8592 = vmatprep.subr.bf16.mxu1 %v10413_v53 }
 0xfed   : > { %8593 = vmatpush1.bf16.msra.mxu1 %v10411_v49 }
 0xfee   : > { %8594 = vmatprep.subr.bf16.mxu1 %v10416_v40 }
 0xff1   : > { %8595 = vmatpush1.bf16.msra.mxu1 %v10414_v50 }
 0xff2   : > { %8596 = vmatprep.subr.bf16.mxu1 %v10419_v58 }
 0xff5   : > { %8597 = vmatpush1.bf16.msra.mxu1 %v10417_v52 }
 0xff6   : > { %8598 = vmatprep.subr.bf16.mxu1 %v10422_v48 }
 0xff9   : > { %8599 = vmatpush1.bf16.msra.mxu1 %v10420_v59 }
 0xffa   : > { %8600 = vmatprep.subr.bf16.mxu1 %v10425_v57 }
 0xffd   : > { %8601 = vmatpush1.bf16.msra.mxu1 %v10423_v33 }
 0xffe   : > { %8602 = vmatprep.subr.bf16.mxu1 %v10428_v29 }
0x1001   : > { %8603 = vmatpush1.bf16.msra.mxu1 %v10426_v9 }
0x1002   : > { %8625 = vmatprep.subr.bf16.mxu1 %v10431_v10 }
0x1004   : > { %8605 = vmatmul.mubr.bf16.vlgmr.msra.gmra.mrb[64].mxu1 %v12825_v15  ;;  %v10441_v15 = vld [vmem:[#allocation23 + $0x340] ss:$8 sps:$4 sm:$0xff]  }
0x1005   : > { %8614 = vmatprep.mubr.bf16.mxu1 %v12837_v19  ;;  %8626 = vmatpush1.bf16.msra.mxu1 %v10429_v63  ;;  %v10464_v19 = vld [vmem:[#allocation23 + $0x3b4] ss:$8 sps:$4 sm:$0xff]  }
0x1006   : > { %8627 = vmatprep.subr.bf16.mxu1 %v10434_v55 }
0x1009   : > { %8628 = vmatpush1.bf16.msra.mxu1 %v10432_v42 }
0x100a   : > { %8629 = vmatprep.subr.bf16.mxu1 %v10437_v34 }
0x100c   : > { %8615 = vmatmul.mubr.bf16.gmra.mrb[68].mxu1 %v12833_v47  ;;  %v10459_v47 = vld [vmem:[#allocation23 + $0x3a0] ss:$8 sps:$4 sm:$0xff]  }
0x100d   : > { %8630 = vmatpush1.bf16.msra.mxu1 %v10435_v14  ;;  %8657 = vmatprep.mubr.bf16.mxu1 %v12829_v44  ;;  %v10453_v44 = vld [vmem:[#allocation23 + $0x380] ss:$8 sps:$4 sm:$0xff]  }
0x100e   : > { %8631 = vmatprep.subr.bf16.mxu1 %v10440_v51 }
0x1011   : > { %8632 = vmatpush1.bf16.msra.mxu1 %v10438_v17 }
0x1012   : > { %8633 = vmatprep.subr.bf16.mxu1 %v10443_v39 }
0x1015   : > { %8634 = vmatpush1.bf16.msra.mxu1 %v10441_v15 }
0x1016   : > { %8635 = vmatprep.subr.bf16.mxu1 %v10446_v56 }
0x1019   : > { %8636 = vmatpush1.bf16.msra.mxu1 %v10444_v6 }
0x101a   : > { %8637 = vmatprep.subr.bf16.mxu1 %v10449_v16 }
0x101d   : > { %8638 = vmatpush1.bf16.msra.mxu1 %v10447_v26 }
0x101e   : > { %8639 = vmatprep.subr.bf16.mxu1 %v10452_v24 }
0x1021   : > { %8640 = vmatpush1.bf16.msra.mxu1 %v10450_v4 }
0x1022   : > { %8641 = vmatprep.subr.bf16.mxu1 %v10455_v46 }
0x1025   : > { %8642 = vmatpush1.bf16.msra.mxu1 %v10453_v44 }
0x1026   : > { %8643 = vmatprep.subr.bf16.mxu1 %v10458_v8 }
0x1029   : > { %8644 = vmatpush1.bf16.msra.mxu1 %v10456_v60 }
0x102a   : > { %8645 = vmatprep.subr.bf16.mxu1 %v10461_v1 }
0x102d   : > { %8646 = vmatpush1.bf16.msra.mxu1 %v10459_v47 }
0x102e   : > { %8647 = vmatprep.subr.bf16.mxu1 %v10464_v19 }
0x1031   : > { %8648 = vmatpush1.bf16.msra.mxu1 %v10462_v21 }
0x1032   : > { %8649 = vmatprep.subr.bf16.mxu1 %v10467_v54 }
0x1035   : > { %8650 = vmatpush1.bf16.msra.mxu1 %v10465_v43 }
0x1036   : > { %8651 = vmatprep.subr.bf16.mxu1 %v10470_v35 }
0x1039   : > { %8652 = vmatpush1.bf16.msra.mxu1 %v10468_v2 }
0x103a   : > { %8653 = vmatprep.subr.bf16.mxu1 %v10473_v25 }
0x103d   : > { %8654 = vmatpush1.bf16.msra.mxu1 %v10471_v36 }
0x103e   : > { %8655 = vmatprep.subr.bf16.mxu1 %v10476_v20 }
0x1041   : > { %8656 = vmatpush1.bf16.msra.mxu1 %v10474_v41 }
0x1044   : > { %8658 = vmatmul.mubr.bf16.vlgmr.msra.gmra.mrb[64].mxu1 %v12827_v62  ;;  %v7825_v62 = vrot.slane %v12859_v45, %v12224_v7 }
0x1045   : > { %8667 = vmatprep.mubr.bf16.mxu1 %v12839_v5 }
0x104c   : > { %8668 = vmatmul.mubr.bf16.gmra.mrb[68].mxu1 %v12835_v13 }
0x1117   : > { %v8659_v31 = vpop.f32.mrb[64].mxu1 }
0x1118   : > { %v9766_v5 = vadd.f32 %v8659_v31, %v7821_v18  ;;  %v8661_v37 = vpop.f32.mrb[65].mxu1 }
0x1119   : > { %v9767_v13 = vadd.f32 %v8661_v37, %v7825_v62  ;;  %v8663_v38 = vpop.f32.mrb[66].mxu1 }
0x111a   : > { %v8678_v53 = vadd.f32 %v9766_v5, %v12750_v0  ;;  %v9768_v49 = vadd.f32 %v8663_v38, %v7821_v18  ;;  %v8665_v40 = vpop.f32.mrb[67].mxu1 }
0x111b   : > { %v8679_v50 = vadd.f32 %v9767_v13, %v12746_v27  ;;  %v9769_v58 = vadd.f32 %v8665_v40, %v7825_v62 }
0x111c   : > { %v8680_v52 = vadd.f32 %v9768_v49, %v12752_v11 }
0x111d   : > { %v8681_v48 = vadd.f32 %v9769_v58, %v12748_v12  ;;  %v8686_v59 = vadd.f32 %v8679_v50, %v8678_v53  ;;  %v8757_v58 = vrot.slane %v12859_v45, %v12227_v22 }
0x111f   : > { %v8669_v57 = vpop.f32.mrb[68].mxu1  ;;  %8687 = vadd.xlane.f32.xlu0 %v8686_v59  ;;  %v8689_v7 = vadd.f32 %v8681_v48, %v8680_v52  ;;  %v8773_v59 = vrot.slane %v12859_v45, %v12283_v32 }
0x1120   : > { %v9770_v33 = vadd.f32 %v8669_v57, %v7821_v18  ;;  %v8671_v29 = vpop.f32.mrb[69].mxu1 }
0x1121   : > { %v9771_v9 = vadd.f32 %v8671_v29, %v7825_v62  ;;  %v8673_v10 = vpop.f32.mrb[70].mxu1  ;;  %8690 = vadd.xlane.f32.xlu1 %v8689_v7 }
0x1122   : > { %v8682_v0 = vadd.f32 %v9770_v33, %v12776_v28  ;;  %v9772_v63 = vadd.f32 %v8673_v10, %v7821_v18  ;;  %v8675_v55 = vpop.f32.mrb[71].mxu1 }
0x1123   : > { %v8683_v27 = vadd.f32 %v9771_v9, %v12772_v3  ;;  %v9773_v42 = vadd.f32 %v8675_v55, %v7825_v62 }
0x1124   : > { %v8684_v11 = vadd.f32 %v9772_v63, %v12778_v23 }
0x1125   : > { %v8685_v12 = vadd.f32 %v9773_v42, %v12774_v61  ;;  %v8692_v34 = vadd.f32 %v8683_v27, %v8682_v0 }
0x1127   : > { %8693 = vadd.xlane.f32.xlu0 %v8692_v34  ;;  %v8695_v14 = vadd.f32 %v8685_v12, %v8684_v11 }
0x1129   : > { %8696 = vadd.xlane.f32.xlu1 %v8695_v14 }
0x11ac   : > { %v8688_v51 = vpop.xlane.xlu0 %8687 }
0x11ad   : > { %v8698_v17 = vmul.f32 0.00390625, %v8688_v51 }
0x11ae   : > { %v8691_v39 = vpop.xlane.xlu1 %8690 }
0x11af   : > { %v8702_v15 = vsub.f32 %v8678_v53, %v8698_v17  ;;  %v8703_v56 = vsub.f32 %v8679_v50, %v8698_v17  ;;  %v8699_v6 = vmul.f32 0.00390625, %v8691_v39  ;;  %v8753_v50 = vrot.slane %v12852_v30, %v12227_v22 }
0x11b1   : > { %v8704_v28 = vsub.f32 %v8680_v52, %v8699_v6  ;;  %v8705_v16 = vsub.f32 %v8681_v48, %v8699_v6  ;;  %v8710_v26 = vmul.f32 %v8702_v15, %v8702_v15  ;;  %v8711_v24 = vmul.f32 %v8703_v56, %v8703_v56 }
0x11b2   : > { %v8769_v48 = vrot.slane %v12852_v30, %v12283_v32 }
0x11b3   : > { %v8718_v3 = vadd.f32 %v8711_v24, %v8710_v26  ;;  %v8712_v4 = vmul.f32 %v8704_v28, %v8704_v28  ;;  %v8713_v46 = vmul.f32 %v8705_v16, %v8705_v16 }
0x11b4   : > { %v8694_v23 = vpop.xlane.xlu0 %8693 }
0x11b5   : > { %v8700_v44 = vmul.f32 0.00390625, %v8694_v23  ;;  %8719 = vadd.xlane.f32.xlu0 %v8718_v3  ;;  %v8721_v61 = vadd.f32 %v8713_v46, %v8712_v4 }
0x11b6   : > { %v8697_v8 = vpop.xlane.xlu1 %8696 }
0x11b7   : > { %v8706_v60 = vsub.f32 %v8682_v0, %v8700_v44  ;;  %v8707_v1 = vsub.f32 %v8683_v27, %v8700_v44  ;;  %v8701_v47 = vmul.f32 0.00390625, %v8697_v8  ;;  %8722 = vadd.xlane.f32.xlu1 %v8721_v61 }
0x11b9   : > { %v8708_v19 = vsub.f32 %v8684_v11, %v8701_v47  ;;  %v8709_v21 = vsub.f32 %v8685_v12, %v8701_v47  ;;  %v8714_v54 = vmul.f32 %v8706_v60, %v8706_v60  ;;  %v8715_v43 = vmul.f32 %v8707_v1, %v8707_v1 }
0x11bb   : > { %v8724_v35 = vadd.f32 %v8715_v43, %v8714_v54  ;;  %v8716_v2 = vmul.f32 %v8708_v19, %v8708_v19  ;;  %v8717_v25 = vmul.f32 %v8709_v21, %v8709_v21 }
0x11bd   : > { %8725 = vadd.xlane.f32.xlu0 %v8724_v35  ;;  %v8727_v36 = vadd.f32 %v8717_v25, %v8716_v2 }
0x11bf   : > { %8728 = vadd.xlane.f32.xlu1 %v8727_v36 }
0x1242   : > { %v8720_v20 = vpop.xlane.xlu0 %8719 }
0x1243   : > { %v8730_v41 = vmul.f32 0.00390625, %v8720_v20 }
0x1244   : > { %v8723_v18 = vpop.xlane.xlu1 %8722 }
0x1245   : > { %v8734_v62 = vadd.f32 1e-06, %v8730_v41  ;;  %v8731_v31 = vmul.f32 0.00390625, %v8723_v18 }
0x1247   : > { %10557 = vrsqrt.f32 %v8734_v62  ;;  %v8735_v5 = vadd.f32 1e-06, %v8731_v31 }
0x1249   : > { %10559 = vrsqrt.f32 %v8735_v5 }
0x124a   : > { %v8726_v37 = vpop.xlane.xlu0 %8725 }
0x124b   : > { %v8732_v13 = vmul.f32 0.00390625, %v8726_v37 }
0x124c   : > { %v8729_v38 = vpop.xlane.xlu1 %8728 }
0x124d   : > { %v8736_v53 = vadd.f32 1e-06, %v8732_v13  ;;  %v8733_v49 = vmul.f32 0.00390625, %v8729_v38 }
0x124f   : > { %10561 = vrsqrt.f32 %v8736_v53  ;;  %v8737_v40 = vadd.f32 1e-06, %v8733_v49 }
0x1251   : > { %v10558_v52 = vpop.eup %10557  ;;  %10563 = vrsqrt.f32 %v8737_v40 }
0x1252   : > { %v8742_v57 = vmul.f32 %v10558_v52, %v8702_v15  ;;  %v8743_v7 = vmul.f32 %v10558_v52, %v8703_v56 }
0x1253   : > { %v10560_v33 = vpop.eup %10559 }
0x1254   : > { %v8758_v29 = vmul.f32 %v8753_v50, %v8742_v57  ;;  %v8759_v9 = vmul.f32 %v8757_v58, %v8743_v7  ;;  %v8744_v10 = vmul.f32 %v10560_v33, %v8704_v28  ;;  %v8745_v0 = vmul.f32 %v10560_v33, %v8705_v16 }
0x1256   : > { %v8774_v63 = vadd.f32 %v8769_v48, %v8758_v29  ;;  %v8775_v55 = vadd.f32 %v8773_v59, %v8759_v9  ;;  %v8760_v27 = vmul.f32 %v8753_v50, %v8744_v10  ;;  %v8761_v22 = vmul.f32 %v8757_v58, %v8745_v0 }
0x1258   : > { %8782 = vst [vmem:[%s846_s16] sm:$0xff] %v8774_v63  ;;  %8783 = vst [vmem:[%s846_s16 + $0x8] sm:$0xff] %v8775_v55  ;;  %v8776_v30 = vadd.f32 %v8769_v48, %v8760_v27  ;;  %v8777_v42 = vadd.f32 %v8773_v59, %v8761_v22 }
0x1259   : > { %v10562_v11 = vpop.eup %10561 }
0x125a   : > { %8784 = vst [vmem:[%s846_s16 + $0x10] sm:$0xff] %v8776_v30  ;;  %8785 = vst [vmem:[%s846_s16 + $0x18] sm:$0xff] %v8777_v42  ;;  %v8746_v32 = vmul.f32 %v10562_v11, %v8706_v60  ;;  %v8747_v45 = vmul.f32 %v10562_v11, %v8707_v1 }
0x125b   : > { %v10564_v12 = vpop.eup %10563 }
0x125c   : > { %v8762_v34 = vmul.f32 %v8753_v50, %v8746_v32  ;;  %v8763_v14 = vmul.f32 %v8757_v58, %v8747_v45  ;;  %v8748_v51 = vmul.f32 %v10564_v12, %v8708_v19  ;;  %v8749_v17 = vmul.f32 %v10564_v12, %v8709_v21 }
0x125e   : > { %v8778_v39 = vadd.f32 %v8769_v48, %v8762_v34  ;;  %v8779_v15 = vadd.f32 %v8773_v59, %v8763_v14  ;;  %v8764_v56 = vmul.f32 %v8753_v50, %v8748_v51  ;;  %v8765_v6 = vmul.f32 %v8757_v58, %v8749_v17 }
0x1260   : > { %8786 = vst [vmem:[%s846_s16 + $0x20] sm:$0xff] %v8778_v39  ;;  %8787 = vst [vmem:[%s846_s16 + $0x28] sm:$0xff] %v8779_v15  ;;  %v8780_v28 = vadd.f32 %v8769_v48, %v8764_v56  ;;  %v8781_v16 = vadd.f32 %v8773_v59, %v8765_v6 }
0x1262   : > { %8788 = vst [vmem:[%s846_s16 + $0x30] sm:$0xff] %v8780_v28  ;;  %8789 = vst [vmem:[%s846_s16 + $0x38] sm:$0xff] %v8781_v16 }
0x1263   : > { %10992 = shalt.err (!%p10989_p11)
}
0x1264   : > { %s10993_s22 = scalar_lea.hbm %s12885_s23, 1024  ;;  %s10997_s30 = scalar_lea.hbm %s13058_s18, 2048 }
0x1265   : > { %p10994_p1 = scmp.ne.s32.totalorder %s12885_s23, %s10993_s22  ;;  %p10998_p7 = scmp.lt.u32.totalorder %s12885_s23, %s13058_s18 }
0x1266   : > { %p10999_p9 = scmp.lt.u32.totalorder %s10997_s30, %s10993_s22  ;;  %p11001_p5 = scmp.lt.u32.totalorder %s10993_s22, %s12885_s23 }
0x1267   : > { %p10995_p10 = pnand %p10994_p1, %p13059_p6 }
0x1268   : > { %p11000_p3 = por %p10999_p9, %p10998_p7 }
0x1269   : > { %p10996_p0 = pneg %p10995_p10 }
0x126a   : > { %p11002_p8 = por %p11001_p5, %p11000_p3 }
0x126c   : > { %p11003_p13 = pnand %p11002_p8, %p10996_p0 }
0x126e   : > { %11006 = shalt.err (!%p11003_p13)
}
0x126f   : > { %s11107_s8 = smov 256   ;;  %s11108_s15 = smov 16  }
0x1270   : > { %9862 = dma.vmem_to_hbm [thread:$0]  (%p13059_p6), %s12887_s11, 1024, %s12885_s23, %s8791_s0, %s11107_s8, %s11107_s8, %s11108_s15  }
0x1271 PF: > { %s13060_s5 = sld [smem:[#allocation36_spill]]  ;;  %s13061_s16 = sld [smem:[#allocation42_spill]] }
0x1272   : > { %p13063_p12 = scmp.ge.s32.totalorder %s11077_s27, 2 }
0x1277   : > { %s8820_s12 = sand.u32 1, %s13060_s5   ;;  %p13062_p4 = scmp.ne.s32.totalorder %s13061_s16, 0 }
0x1278   : > { %s8821_s9 = scalar_lea.sflag [#allocation4], %s8820_s12 }
0x1279   : > { %p9909_p2 = pnand %p13063_p12, %p13062_p4 }
0x127b   : > { %11060 = dma.done.wait (!%p9909_p2), %s8821_s9, 1024  }
0x127c   : > { %11062 = vsyncadd (!%p9909_p2), %s8821_s9, 4294966272  ;;  %s13064_s27 = sld [smem:[#allocation39_spill]]  ;;  %s13065_s3 = sld [smem:[#allocation37_spill]] }
0x127d   : > { %s13066_s26 = sld [smem:[#allocation40_spill]]  ;;  %s13067_s24 = smov %s11069_s25 }
0x1282   : > { %p41_p11 = scmp.ge.s32.totalorder %s13064_s27, 4   ;;  %s13068_s25 = smov %s13065_s3 }
0x1284   :  { %43 = sbr.rel (!%p41_p11) target bundleno = 31 (0x1f), region = 213 }
0x128b   :  { %8826 = vsyncpa [#allocation3], 1 }
0x128c   :  { %8828 = vsyncpa [#allocation3 + $0x1], 1 }
0x128d   :  { %8829 = vsyncpa [#allocation6], 1 }
0x128e   :  { %8831 = vsyncpa [#allocation6 + $0x1], 1 }
0x128f   :  { %8832 = vsyncpa [#allocation9], 1 }
0x1290   :  { %8834 = vsyncpa [#allocation9 + $0x1], 1 }
0x1291   :  { %8835 = vsyncpa [#allocation12], 1 }
0x1292   :  { %8836 = vsyncpa [#allocation15], 1 }
0x1293   :  { %8837 = vsyncpa [#allocation18], 1 }
0x1294   :  { %8838 = vsyncpa [#allocation21], 1 }
0x1295   :  { %8839 = vsyncpa [#allocation24], 1 }
0x1296   :  { %8840 = vsyncpa [#allocation4], 1 }
0x1297   :  { %8842 = vsyncpa [#allocation4 + $0x1], 1 }

</bundles_post_ra>
